<compile_context>
chip_gen: v5e
topology: v5e:2x2
jax: 0.10.0
libtpu: 0.0.40
codegen_flags: <defaults>
</compile_context>

<pallas_src>
import functools

import jax
import jax.numpy as jnp
from jax.experimental import pallas as pl
from jax.experimental.pallas import tpu as pltpu

EPS = 1e-5


# --------------------------------------------------------------------------- #
# Fused BasicBlock kernel
# --------------------------------------------------------------------------- #
def _basic_block_kernel(*refs, stride, Ho, Wo, has_sc):
    """Whole BasicBlock for one image; all intermediates stay in VMEM.

    refs = [phase_0..phase_{s*s-1}, w1, b1, w2, b2, (w_sc, b_sc)?, out,
            h_scratch, acc_scratch]
      phase_p : (1, Hp, Wp, cin)    bf16  polyphase slices of spatially padded x
      w1      : (9, cin,  cout)     bf16  conv1 3x3 taps, BN1 scale folded in
      b1      : (1, cout)           f32   BN1 folded bias
      w2      : (9, cout, cout)     bf16  conv2 3x3 taps, BN2 scale folded in
      b2      : (1, cout)           f32   BN2 folded bias
      w_sc    : (cin, cout)         bf16  1x1 shortcut, BN_sc scale folded in
      b_sc    : (1, cout)           f32
      out     : (1, Ho, Wo, cout)   f32   final ReLU output
      h_scr   : (Ho+2, Wo+2, cout)  bf16  ReLU(conv1) with +1 zero halo (VMEM)
      acc_scr : (Ho*Wo, cout)       f32   shared MXU accumulator (VMEM)
    """
    nphase = stride * stride
    phase_refs = refs[:nphase]
    idx = nphase
    w1_ref, b1_ref, w2_ref, b2_ref = refs[idx:idx + 4]
    idx += 4
    if has_sc:
        wsc_ref, bsc_ref = refs[idx:idx + 2]
        idx += 2
    o_ref = refs[idx]
    h_ref, acc_ref = refs[idx + 1], refs[idx + 2]

    cin = phase_refs[0].shape[3]
    cout = o_ref.shape[3]

    # ---- conv1 (3x3, stride s) + BN1 + ReLU -> VMEM h scratch ------------- #
    acc_ref[...] = jnp.zeros_like(acc_ref)
    center = None
    for kh in range(3):
        for kw in range(3):
            ph = phase_refs[(kh % stride) * stride + (kw % stride)]
            patch = ph[0, pl.ds(kh // stride, Ho), pl.ds(kw // stride, Wo), :]
            patch = patch.reshape(Ho * Wo, cin)
            if kh == 1 and kw == 1:
                center = patch                    # x[s*i, s*j, :]  (1x1 taps)
            acc_ref[...] += jnp.dot(patch, w1_ref[kh * 3 + kw],
                                    preferred_element_type=jnp.float32)

    h = jnp.maximum(acc_ref[...] + b1_ref[...], 0.0).astype(jnp.bfloat16)
    h_ref[...] = jnp.zeros_like(h_ref)            # establish the zero halo
    h_ref[pl.ds(1, Ho), pl.ds(1, Wo), :] = h.reshape(Ho, Wo, cout)

    # ---- shortcut: seed the conv2 accumulator with residual + BN2 bias ---- #
    if has_sc:
        acc_ref[...] = (jnp.dot(center, wsc_ref[...],
                                preferred_element_type=jnp.float32)
                        + bsc_ref[...] + b2_ref[...])
    else:
        acc_ref[...] = center.astype(jnp.float32) + b2_ref[...]

    # ---- conv2 (3x3, stride 1) + BN2 + residual + final ReLU -------------- #
    for kh in range(3):
        for kw in range(3):
            patch = h_ref[pl.ds(kh, Ho), pl.ds(kw, Wo), :]
            patch = patch.reshape(Ho * Wo, cout)
            acc_ref[...] += jnp.dot(patch, w2_ref[kh * 3 + kw],
                                    preferred_element_type=jnp.float32)

    y = jnp.maximum(acc_ref[...], 0.0)
    o_ref[0] = y.reshape(Ho, Wo, cout).astype(o_ref.dtype)


# --------------------------------------------------------------------------- #
# pallas_call wrapper
# --------------------------------------------------------------------------- #
def _block_call(phases, w1, b1, w2, b2, wsc, bsc, *, stride, Ho, Wo, cout):
    N, Hp, Wp, cin = phases[0].shape
    nphase = len(phases)
    has_sc = wsc is not None

    kernel = functools.partial(_basic_block_kernel, stride=stride,
                               Ho=Ho, Wo=Wo, has_sc=has_sc)

    # Block shapes use the *real* channel counts (no 128-padding in HBM); the
    # last two block dims equal the full array dims, so the (8,128) rule holds.
    in_specs = [pl.BlockSpec((1, Hp, Wp, cin), lambda n: (n, 0, 0, 0))
                for _ in range(nphase)]
    in_specs += [pl.BlockSpec((9, cin, cout), lambda n: (0, 0, 0)),
                 pl.BlockSpec((1, cout), lambda n: (0, 0)),
                 pl.BlockSpec((9, cout, cout), lambda n: (0, 0, 0)),
                 pl.BlockSpec((1, cout), lambda n: (0, 0))]
    args = list(phases) + [w1, b1, w2, b2]
    if has_sc:
        in_specs += [pl.BlockSpec((cin, cout), lambda n: (0, 0)),
                     pl.BlockSpec((1, cout), lambda n: (0, 0))]
        args += [wsc, bsc]

    return pl.pallas_call(
        kernel,
        out_shape=jax.ShapeDtypeStruct((N, Ho, Wo, cout), jnp.float32),
        grid=(N,),
        in_specs=in_specs,
        out_specs=pl.BlockSpec((1, Ho, Wo, cout), lambda n: (n, 0, 0, 0)),
        scratch_shapes=[pltpu.VMEM((Ho + 2, Wo + 2, cout), jnp.bfloat16),
                        pltpu.VMEM((Ho * Wo, cout), jnp.float32)],
        compiler_params=pltpu.CompilerParams(
            dimension_semantics=("parallel",),
            vmem_limit_bytes=64 * 1024 * 1024),
    )(*args)


# --------------------------------------------------------------------------- #
# Parameter folding / relayout (BN scale folded into bf16 weights)
# --------------------------------------------------------------------------- #
def _fold_bn(gamma, beta, mean, var, eps=EPS):
    scale = gamma / jnp.sqrt(var + eps)
    return scale, beta - mean * scale


def _prep_w3x3(w, scale):
    # (cout, cin, 3, 3) -> (9, cin, cout) with the BN scale folded in, bf16.
    cout, cin = w.shape[0], w.shape[1]
    wf = w * scale[:, None, None, None]
    wf = jnp.transpose(wf, (2, 3, 1, 0)).reshape(9, cin, cout)
    return wf.astype(jnp.bfloat16)


def _prep_w1x1(w, scale):
    # (cout, cin, 1, 1) -> (cin, cout), BN scale folded, bf16.
    return (w[:, :, 0, 0] * scale[:, None]).T.astype(jnp.bfloat16)


def _prep_bias(b):
    return b.reshape(1, -1).astype(jnp.float32)


# --------------------------------------------------------------------------- #
# BasicBlock forward (NCHW in / NCHW out, like the PyTorch module)
# --------------------------------------------------------------------------- #
def basic_block_forward(x_nchw, p, stride):
    N, cin, H, W = x_nchw.shape
    cout = p["w1"].shape[0]
    assert stride in (1, 2) and H % stride == 0 and W % stride == 0
    Ho, Wo = H // stride, W // stride

    # NHWC + 1-pixel spatial halo, bf16 MXU operands; channels stay unpadded
    # (lane padding happens in VMEM, not in HBM).
    x_nhwc = jnp.transpose(x_nchw, (0, 2, 3, 1)).astype(jnp.bfloat16)
    x_pad = jnp.pad(x_nhwc, ((0, 0), (1, 1), (1, 1), (0, 0)))

    if stride == 1:
        phases = [x_pad]
    else:
        # Polyphase split: the strided conv becomes unit-stride tap loads in
        # the kernel (4x fewer FLOPs than stride-1-then-subsample).
        phases = [x_pad[:, a::stride, b::stride, :]
                  for a in range(stride) for b in range(stride)]

    s1, b1 = _fold_bn(**p["bn1"])
    s2, b2 = _fold_bn(**p["bn2"])
    w1 = _prep_w3x3(p["w1"], s1)
    w2 = _prep_w3x3(p["w2"], s2)
    b1p = _prep_bias(b1)
    b2p = _prep_bias(b2)

    has_conv_sc = (stride != 1) or (cin != cout)
    if has_conv_sc:
        ssc, bsc = _fold_bn(**p["bn_sc"])
        wsc = _prep_w1x1(p["w_sc"], ssc)
        bscp = _prep_bias(bsc)
    else:
        wsc = bscp = None

    out_nhwc = _block_call(phases, w1, b1p, w2, b2p, wsc, bscp,
                           stride=stride, Ho=Ho, Wo=Wo, cout=cout)
    return jnp.transpose(out_nhwc, (0, 3, 1, 2))   # -> NCHW, f32


# --------------------------------------------------------------------------- #
# Deterministic parameter init + pure-JAX (f32) reference
# --------------------------------------------------------------------------- #
def init_bn(key, c):
    k1, k2, k3, k4 = jax.random.split(key, 4)
    return dict(
        gamma=jax.random.uniform(k1, (c,), jnp.float32, 0.5, 1.5),
        beta=jax.random.normal(k2, (c,), jnp.float32) * 0.1,
        mean=jax.random.normal(k3, (c,), jnp.float32) * 0.1,
        var=jax.random.uniform(k4, (c,), jnp.float32, 0.5, 1.5),
    )


def init_basic_block(key, cin, cout, stride):
    ks = jax.random.split(key, 6)
    p = dict(
        w1=jax.random.normal(ks[0], (cout, cin, 3, 3), jnp.float32) * 0.1,
        bn1=init_bn(ks[1], cout),
        w2=jax.random.normal(ks[2], (cout, cout, 3, 3), jnp.float32) * 0.1,
        bn2=init_bn(ks[3], cout),
    )
    if stride != 1 or cin != cout:
        p["w_sc"] = jax.random.normal(ks[4], (cout, cin, 1, 1), jnp.float32) * 0.1
        p["bn_sc"] = init_bn(ks[5], cout)
    return p


def ref_basic_block(x, p, stride, eps=EPS):
    def conv(x, w, s, pad):
        return jax.lax.conv_general_dilated(
            x, w, window_strides=(s, s), padding=[(pad, pad), (pad, pad)],
            dimension_numbers=("NCHW", "OIHW", "NCHW"))

    def bn(x, bp):
        inv = bp["gamma"] / jnp.sqrt(bp["var"] + eps)
        return (x * inv[None, :, None, None]
                + (bp["beta"] - bp["mean"] * inv)[None, :, None, None])

    cin, cout = x.shape[1], p["w1"].shape[0]
    r = jnp.maximum(bn(conv(x, p["w1"], stride, 1), p["bn1"]), 0.0)
    r = bn(conv(r, p["w2"], 1, 1), p["bn2"])
    if stride != 1 or cin != cout:
        s = bn(conv(x, p["w_sc"], stride, 0), p["bn_sc"])
    else:
        s = x
    return jnp.maximum(r + s, 0.0)


if __name__ == "__main__":
    key = jax.random.PRNGKey(0)
    kx, kp1, kp2 = jax.random.split(key, 3)

    forward = jax.jit(basic_block_forward, static_argnums=2)

    # bf16 MXU operands (f32 accumulation) -> loosened tolerance vs f32 reference.
    TOL = dict(atol=7e-2, rtol=7e-2)

    # Case 1: downsampling block (stride=2, channel expansion -> conv shortcut).
    x = jax.random.normal(kx, (2, 4, 16, 16), jnp.float32)
    p = init_basic_block(kp1, 4, 8, 2)
    y = jax.block_until_ready(forward(x, p, 2))
    y_ref = ref_basic_block(x, p, 2)
    assert y.shape == (2, 8, 8, 8)
    assert jnp.allclose(y, y_ref, **TOL), "stride-2 block mismatch"

    # Case 2: identity-shortcut block (stride=1, Cin == Cout).
    x2 = jax.random.normal(kx, (2, 8, 16, 16), jnp.float32)
    p2 = init_basic_block(kp2, 8, 8, 1)
    y2 = jax.block_until_ready(forward(x2, p2, 1))
    y2_ref = ref_basic_block(x2, p2, 1)
    assert y2.shape == (2, 8, 16, 16)
    assert jnp.allclose(y2, y2_ref, **TOL), "identity block mismatch"

    print("KERNEL_OK")
</pallas_src>

<mosaic_0001>
module attributes {stable_mosaic.version = 11 : i64} {
  func.func @_basic_block_kernel(%arg0: i32, %arg1: memref<1x9x9x4xbf16, #tpu.memory_space<vmem>>, %arg2: memref<1x9x9x4xbf16, #tpu.memory_space<vmem>>, %arg3: memref<1x9x9x4xbf16, #tpu.memory_space<vmem>>, %arg4: memref<1x9x9x4xbf16, #tpu.memory_space<vmem>>, %arg5: memref<9x4x8xbf16, #tpu.memory_space<vmem>>, %arg6: memref<1x8xf32, #tpu.memory_space<vmem>>, %arg7: memref<9x8x8xbf16, #tpu.memory_space<vmem>>, %arg8: memref<1x8xf32, #tpu.memory_space<vmem>>, %arg9: memref<4x8xbf16, #tpu.memory_space<vmem>>, %arg10: memref<1x8xf32, #tpu.memory_space<vmem>>, %arg11: memref<1x8x8x8xf32, #tpu.memory_space<vmem>>, %arg12: memref<10x10x8xbf16, #tpu.memory_space<vmem>>, %arg13: memref<64x8xf32, #tpu.memory_space<vmem>>) attributes {dimension_semantics = [#tpu.dimension_semantics<parallel>], iteration_bounds = array<i64: 2>, scalar_prefetch = 0 : i64, scratch_operands = 2 : i64, tpu.core_type = #tpu.core_type<tc>, window_params = [{transform_indices = @transform_0, window_bounds = array<i64: 1, 9, 9, 4>}, {transform_indices = @transform_1, window_bounds = array<i64: 1, 9, 9, 4>}, {transform_indices = @transform_2, window_bounds = array<i64: 1, 9, 9, 4>}, {transform_indices = @transform_3, window_bounds = array<i64: 1, 9, 9, 4>}, {pipeline_mode = #tpu.pipeline_mode<synchronous>, transform_indices = @transform_4, window_bounds = array<i64: 9, 4, 8>}, {pipeline_mode = #tpu.pipeline_mode<synchronous>, transform_indices = @transform_5, window_bounds = array<i64: 1, 8>}, {pipeline_mode = #tpu.pipeline_mode<synchronous>, transform_indices = @transform_6, window_bounds = array<i64: 9, 8, 8>}, {pipeline_mode = #tpu.pipeline_mode<synchronous>, transform_indices = @transform_7, window_bounds = array<i64: 1, 8>}, {pipeline_mode = #tpu.pipeline_mode<synchronous>, transform_indices = @transform_8, window_bounds = array<i64: 4, 8>}, {pipeline_mode = #tpu.pipeline_mode<synchronous>, transform_indices = @transform_9, window_bounds = array<i64: 1, 8>}, {transform_indices = @transform_10, window_bounds = array<i64: 1, 8, 8, 8>}]} {
    %cst = arith.constant 0.000000e+00 : f32
    %0 = vector.broadcast %cst : f32 to vector<64x8xf32>
    %c0 = arith.constant 0 : index
    %c0_0 = arith.constant 0 : index
    %1 = vector.load %arg13[%c0, %c0_0] : memref<64x8xf32, #tpu.memory_space<vmem>>, vector<64x8xf32>
    tpu.vector_store %arg13[%c0, %c0_0], %0 {strides = array<i32>} : memref<64x8xf32, #tpu.memory_space<vmem>>, vector<64x8xf32>,
    %c0_1 = arith.constant 0 : index
    %c0_2 = arith.constant 0 : index
    %c0_3 = arith.constant 0 : index
    %c0_4 = arith.constant 0 : index
    %2 = vector.load %arg1[%c0_1, %c0_2, %c0_3, %c0_4] : memref<1x9x9x4xbf16, #tpu.memory_space<vmem>>, vector<1x8x8x4xbf16>
    %3 = vector.shape_cast %2 : vector<1x8x8x4xbf16> to vector<8x8x4xbf16>
    %4 = vector.shape_cast %3 : vector<8x8x4xbf16> to vector<64x4xbf16>
    %c0_5 = arith.constant 0 : index
    %c0_6 = arith.constant 0 : index
    %5 = vector.load %arg13[%c0_5, %c0_6] : memref<64x8xf32, #tpu.memory_space<vmem>>, vector<64x8xf32>
    %c0_7 = arith.constant 0 : index
    %c0_8 = arith.constant 0 : index
    %c0_9 = arith.constant 0 : index
    %6 = vector.load %arg5[%c0_7, %c0_8, %c0_9] : memref<9x4x8xbf16, #tpu.memory_space<vmem>>, vector<1x4x8xbf16>
    %7 = vector.shape_cast %6 : vector<1x4x8xbf16> to vector<4x8xbf16>
    %cst_10 = arith.constant dense<0.000000e+00> : vector<64x8xf32>
    %8 = tpu.matmul %4, %7, %cst_10 {dimension_numbers = #tpu.dot_dimension_numbers<[1], [0], [0], [1], [0, 0, 1, 1], [], []>} : vector<64x4xbf16>, vector<4x8xbf16>, vector<64x8xf32> -> vector<64x8xf32>
    %9 = arith.addf %5, %8 : vector<64x8xf32>
    %c0_11 = arith.constant 0 : index
    %c0_12 = arith.constant 0 : index
    %10 = vector.load %arg13[%c0_11, %c0_12] : memref<64x8xf32, #tpu.memory_space<vmem>>, vector<64x8xf32>
    tpu.vector_store %arg13[%c0_11, %c0_12], %9 {strides = array<i32>} : memref<64x8xf32, #tpu.memory_space<vmem>>, vector<64x8xf32>,
    %c0_13 = arith.constant 0 : index
    %c0_14 = arith.constant 0 : index
    %c0_15 = arith.constant 0 : index
    %c0_16 = arith.constant 0 : index
    %11 = vector.load %arg2[%c0_13, %c0_14, %c0_15, %c0_16] : memref<1x9x9x4xbf16, #tpu.memory_space<vmem>>, vector<1x8x8x4xbf16>
    %12 = vector.shape_cast %11 : vector<1x8x8x4xbf16> to vector<8x8x4xbf16>
    %13 = vector.shape_cast %12 : vector<8x8x4xbf16> to vector<64x4xbf16>
    %c0_17 = arith.constant 0 : index
    %c0_18 = arith.constant 0 : index
    %14 = vector.load %arg13[%c0_17, %c0_18] : memref<64x8xf32, #tpu.memory_space<vmem>>, vector<64x8xf32>
    %c1 = arith.constant 1 : index
    %c0_19 = arith.constant 0 : index
    %c0_20 = arith.constant 0 : index
    %15 = vector.load %arg5[%c1, %c0_19, %c0_20] : memref<9x4x8xbf16, #tpu.memory_space<vmem>>, vector<1x4x8xbf16>
    %16 = vector.shape_cast %15 : vector<1x4x8xbf16> to vector<4x8xbf16>
    %cst_21 = arith.constant dense<0.000000e+00> : vector<64x8xf32>
    %17 = tpu.matmul %13, %16, %cst_21 {dimension_numbers = #tpu.dot_dimension_numbers<[1], [0], [0], [1], [0, 0, 1, 1], [], []>} : vector<64x4xbf16>, vector<4x8xbf16>, vector<64x8xf32> -> vector<64x8xf32>
    %18 = arith.addf %14, %17 : vector<64x8xf32>
    %c0_22 = arith.constant 0 : index
    %c0_23 = arith.constant 0 : index
    %19 = vector.load %arg13[%c0_22, %c0_23] : memref<64x8xf32, #tpu.memory_space<vmem>>, vector<64x8xf32>
    tpu.vector_store %arg13[%c0_22, %c0_23], %18 {strides = array<i32>} : memref<64x8xf32, #tpu.memory_space<vmem>>, vector<64x8xf32>,
    %c0_24 = arith.constant 0 : index
    %c0_25 = arith.constant 0 : index
    %c1_26 = arith.constant 1 : index
    %c0_27 = arith.constant 0 : index
    %20 = vector.load %arg1[%c0_24, %c0_25, %c1_26, %c0_27] : memref<1x9x9x4xbf16, #tpu.memory_space<vmem>>, vector<1x8x8x4xbf16>
    %21 = vector.shape_cast %20 : vector<1x8x8x4xbf16> to vector<8x8x4xbf16>
    %22 = vector.shape_cast %21 : vector<8x8x4xbf16> to vector<64x4xbf16>
    %c0_28 = arith.constant 0 : index
    %c0_29 = arith.constant 0 : index
    %23 = vector.load %arg13[%c0_28, %c0_29] : memref<64x8xf32, #tpu.memory_space<vmem>>, vector<64x8xf32>
    %c2 = arith.constant 2 : index
    %c0_30 = arith.constant 0 : index
    %c0_31 = arith.constant 0 : index
    %24 = vector.load %arg5[%c2, %c0_30, %c0_31] : memref<9x4x8xbf16, #tpu.memory_space<vmem>>, vector<1x4x8xbf16>
    %25 = vector.shape_cast %24 : vector<1x4x8xbf16> to vector<4x8xbf16>
    %cst_32 = arith.constant dense<0.000000e+00> : vector<64x8xf32>
    %26 = tpu.matmul %22, %25, %cst_32 {dimension_numbers = #tpu.dot_dimension_numbers<[1], [0], [0], [1], [0, 0, 1, 1], [], []>} : vector<64x4xbf16>, vector<4x8xbf16>, vector<64x8xf32> -> vector<64x8xf32>
    %27 = arith.addf %23, %26 : vector<64x8xf32>
    %c0_33 = arith.constant 0 : index
    %c0_34 = arith.constant 0 : index
    %28 = vector.load %arg13[%c0_33, %c0_34] : memref<64x8xf32, #tpu.memory_space<vmem>>, vector<64x8xf32>
    tpu.vector_store %arg13[%c0_33, %c0_34], %27 {strides = array<i32>} : memref<64x8xf32, #tpu.memory_space<vmem>>, vector<64x8xf32>,
    %c0_35 = arith.constant 0 : index
    %c0_36 = arith.constant 0 : index
    %c0_37 = arith.constant 0 : index
    %c0_38 = arith.constant 0 : index
    %29 = vector.load %arg3[%c0_35, %c0_36, %c0_37, %c0_38] : memref<1x9x9x4xbf16, #tpu.memory_space<vmem>>, vector<1x8x8x4xbf16>
    %30 = vector.shape_cast %29 : vector<1x8x8x4xbf16> to vector<8x8x4xbf16>
    %31 = vector.shape_cast %30 : vector<8x8x4xbf16> to vector<64x4xbf16>
    %c0_39 = arith.constant 0 : index
    %c0_40 = arith.constant 0 : index
    %32 = vector.load %arg13[%c0_39, %c0_40] : memref<64x8xf32, #tpu.memory_space<vmem>>, vector<64x8xf32>
    %c3 = arith.constant 3 : index
    %c0_41 = arith.constant 0 : index
    %c0_42 = arith.constant 0 : index
    %33 = vector.load %arg5[%c3, %c0_41, %c0_42] : memref<9x4x8xbf16, #tpu.memory_space<vmem>>, vector<1x4x8xbf16>
    %34 = vector.shape_cast %33 : vector<1x4x8xbf16> to vector<4x8xbf16>
    %cst_43 = arith.constant dense<0.000000e+00> : vector<64x8xf32>
    %35 = tpu.matmul %31, %34, %cst_43 {dimension_numbers = #tpu.dot_dimension_numbers<[1], [0], [0], [1], [0, 0, 1, 1], [], []>} : vector<64x4xbf16>, vector<4x8xbf16>, vector<64x8xf32> -> vector<64x8xf32>
    %36 = arith.addf %32, %35 : vector<64x8xf32>
    %c0_44 = arith.constant 0 : index
    %c0_45 = arith.constant 0 : index
    %37 = vector.load %arg13[%c0_44, %c0_45] : memref<64x8xf32, #tpu.memory_space<vmem>>, vector<64x8xf32>
    tpu.vector_store %arg13[%c0_44, %c0_45], %36 {strides = array<i32>} : memref<64x8xf32, #tpu.memory_space<vmem>>, vector<64x8xf32>,
    %c0_46 = arith.constant 0 : index
    %c0_47 = arith.constant 0 : index
    %c0_48 = arith.constant 0 : index
    %c0_49 = arith.constant 0 : index
    %38 = vector.load %arg4[%c0_46, %c0_47, %c0_48, %c0_49] : memref<1x9x9x4xbf16, #tpu.memory_space<vmem>>, vector<1x8x8x4xbf16>
    %39 = vector.shape_cast %38 : vector<1x8x8x4xbf16> to vector<8x8x4xbf16>
    %40 = vector.shape_cast %39 : vector<8x8x4xbf16> to vector<64x4xbf16>
    %c0_50 = arith.constant 0 : index
    %c0_51 = arith.constant 0 : index
    %41 = vector.load %arg13[%c0_50, %c0_51] : memref<64x8xf32, #tpu.memory_space<vmem>>, vector<64x8xf32>
    %c4 = arith.constant 4 : index
    %c0_52 = arith.constant 0 : index
    %c0_53 = arith.constant 0 : index
    %42 = vector.load %arg5[%c4, %c0_52, %c0_53] : memref<9x4x8xbf16, #tpu.memory_space<vmem>>, vector<1x4x8xbf16>
    %43 = vector.shape_cast %42 : vector<1x4x8xbf16> to vector<4x8xbf16>
    %cst_54 = arith.constant dense<0.000000e+00> : vector<64x8xf32>
    %44 = tpu.matmul %40, %43, %cst_54 {dimension_numbers = #tpu.dot_dimension_numbers<[1], [0], [0], [1], [0, 0, 1, 1], [], []>} : vector<64x4xbf16>, vector<4x8xbf16>, vector<64x8xf32> -> vector<64x8xf32>
    %45 = arith.addf %41, %44 : vector<64x8xf32>
    %c0_55 = arith.constant 0 : index
    %c0_56 = arith.constant 0 : index
    %46 = vector.load %arg13[%c0_55, %c0_56] : memref<64x8xf32, #tpu.memory_space<vmem>>, vector<64x8xf32>
    tpu.vector_store %arg13[%c0_55, %c0_56], %45 {strides = array<i32>} : memref<64x8xf32, #tpu.memory_space<vmem>>, vector<64x8xf32>,
    %c0_57 = arith.constant 0 : index
    %c0_58 = arith.constant 0 : index
    %c1_59 = arith.constant 1 : index
    %c0_60 = arith.constant 0 : index
    %47 = vector.load %arg3[%c0_57, %c0_58, %c1_59, %c0_60] : memref<1x9x9x4xbf16, #tpu.memory_space<vmem>>, vector<1x8x8x4xbf16>
    %48 = vector.shape_cast %47 : vector<1x8x8x4xbf16> to vector<8x8x4xbf16>
    %49 = vector.shape_cast %48 : vector<8x8x4xbf16> to vector<64x4xbf16>
    %c0_61 = arith.constant 0 : index
    %c0_62 = arith.constant 0 : index
    %50 = vector.load %arg13[%c0_61, %c0_62] : memref<64x8xf32, #tpu.memory_space<vmem>>, vector<64x8xf32>
    %c5 = arith.constant 5 : index
    %c0_63 = arith.constant 0 : index
    %c0_64 = arith.constant 0 : index
    %51 = vector.load %arg5[%c5, %c0_63, %c0_64] : memref<9x4x8xbf16, #tpu.memory_space<vmem>>, vector<1x4x8xbf16>
    %52 = vector.shape_cast %51 : vector<1x4x8xbf16> to vector<4x8xbf16>
    %cst_65 = arith.constant dense<0.000000e+00> : vector<64x8xf32>
    %53 = tpu.matmul %49, %52, %cst_65 {dimension_numbers = #tpu.dot_dimension_numbers<[1], [0], [0], [1], [0, 0, 1, 1], [], []>} : vector<64x4xbf16>, vector<4x8xbf16>, vector<64x8xf32> -> vector<64x8xf32>
    %54 = arith.addf %50, %53 : vector<64x8xf32>
    %c0_66 = arith.constant 0 : index
    %c0_67 = arith.constant 0 : index
    %55 = vector.load %arg13[%c0_66, %c0_67] : memref<64x8xf32, #tpu.memory_space<vmem>>, vector<64x8xf32>
    tpu.vector_store %arg13[%c0_66, %c0_67], %54 {strides = array<i32>} : memref<64x8xf32, #tpu.memory_space<vmem>>, vector<64x8xf32>,
    %c0_68 = arith.constant 0 : index
    %c1_69 = arith.constant 1 : index
    %c0_70 = arith.constant 0 : index
    %c0_71 = arith.constant 0 : index
    %56 = vector.load %arg1[%c0_68, %c1_69, %c0_70, %c0_71] : memref<1x9x9x4xbf16, #tpu.memory_space<vmem>>, vector<1x8x8x4xbf16>
    %57 = vector.shape_cast %56 : vector<1x8x8x4xbf16> to vector<8x8x4xbf16>
    %58 = vector.shape_cast %57 : vector<8x8x4xbf16> to vector<64x4xbf16>
    %c0_72 = arith.constant 0 : index
    %c0_73 = arith.constant 0 : index
    %59 = vector.load %arg13[%c0_72, %c0_73] : memref<64x8xf32, #tpu.memory_space<vmem>>, vector<64x8xf32>
    %c6 = arith.constant 6 : index
    %c0_74 = arith.constant 0 : index
    %c0_75 = arith.constant 0 : index
    %60 = vector.load %arg5[%c6, %c0_74, %c0_75] : memref<9x4x8xbf16, #tpu.memory_space<vmem>>, vector<1x4x8xbf16>
    %61 = vector.shape_cast %60 : vector<1x4x8xbf16> to vector<4x8xbf16>
    %cst_76 = arith.constant dense<0.000000e+00> : vector<64x8xf32>
    %62 = tpu.matmul %58, %61, %cst_76 {dimension_numbers = #tpu.dot_dimension_numbers<[1], [0], [0], [1], [0, 0, 1, 1], [], []>} : vector<64x4xbf16>, vector<4x8xbf16>, vector<64x8xf32> -> vector<64x8xf32>
    %63 = arith.addf %59, %62 : vector<64x8xf32>
    %c0_77 = arith.constant 0 : index
    %c0_78 = arith.constant 0 : index
    %64 = vector.load %arg13[%c0_77, %c0_78] : memref<64x8xf32, #tpu.memory_space<vmem>>, vector<64x8xf32>
    tpu.vector_store %arg13[%c0_77, %c0_78], %63 {strides = array<i32>} : memref<64x8xf32, #tpu.memory_space<vmem>>, vector<64x8xf32>,
    %c0_79 = arith.constant 0 : index
    %c1_80 = arith.constant 1 : index
    %c0_81 = arith.constant 0 : index
    %c0_82 = arith.constant 0 : index
    %65 = vector.load %arg2[%c0_79, %c1_80, %c0_81, %c0_82] : memref<1x9x9x4xbf16, #tpu.memory_space<vmem>>, vector<1x8x8x4xbf16>
    %66 = vector.shape_cast %65 : vector<1x8x8x4xbf16> to vector<8x8x4xbf16>
    %67 = vector.shape_cast %66 : vector<8x8x4xbf16> to vector<64x4xbf16>
    %c0_83 = arith.constant 0 : index
    %c0_84 = arith.constant 0 : index
    %68 = vector.load %arg13[%c0_83, %c0_84] : memref<64x8xf32, #tpu.memory_space<vmem>>, vector<64x8xf32>
    %c7 = arith.constant 7 : index
    %c0_85 = arith.constant 0 : index
    %c0_86 = arith.constant 0 : index
    %69 = vector.load %arg5[%c7, %c0_85, %c0_86] : memref<9x4x8xbf16, #tpu.memory_space<vmem>>, vector<1x4x8xbf16>
    %70 = vector.shape_cast %69 : vector<1x4x8xbf16> to vector<4x8xbf16>
    %cst_87 = arith.constant dense<0.000000e+00> : vector<64x8xf32>
    %71 = tpu.matmul %67, %70, %cst_87 {dimension_numbers = #tpu.dot_dimension_numbers<[1], [0], [0], [1], [0, 0, 1, 1], [], []>} : vector<64x4xbf16>, vector<4x8xbf16>, vector<64x8xf32> -> vector<64x8xf32>
    %72 = arith.addf %68, %71 : vector<64x8xf32>
    %c0_88 = arith.constant 0 : index
    %c0_89 = arith.constant 0 : index
    %73 = vector.load %arg13[%c0_88, %c0_89] : memref<64x8xf32, #tpu.memory_space<vmem>>, vector<64x8xf32>
    tpu.vector_store %arg13[%c0_88, %c0_89], %72 {strides = array<i32>} : memref<64x8xf32, #tpu.memory_space<vmem>>, vector<64x8xf32>,
    %c0_90 = arith.constant 0 : index
    %c1_91 = arith.constant 1 : index
    %c1_92 = arith.constant 1 : index
    %c0_93 = arith.constant 0 : index
    %74 = vector.load %arg1[%c0_90, %c1_91, %c1_92, %c0_93] : memref<1x9x9x4xbf16, #tpu.memory_space<vmem>>, vector<1x8x8x4xbf16>
    %75 = vector.shape_cast %74 : vector<1x8x8x4xbf16> to vector<8x8x4xbf16>
    %76 = vector.shape_cast %75 : vector<8x8x4xbf16> to vector<64x4xbf16>
    %c0_94 = arith.constant 0 : index
    %c0_95 = arith.constant 0 : index
    %77 = vector.load %arg13[%c0_94, %c0_95] : memref<64x8xf32, #tpu.memory_space<vmem>>, vector<64x8xf32>
    %c8 = arith.constant 8 : index
    %c0_96 = arith.constant 0 : index
    %c0_97 = arith.constant 0 : index
    %78 = vector.load %arg5[%c8, %c0_96, %c0_97] : memref<9x4x8xbf16, #tpu.memory_space<vmem>>, vector<1x4x8xbf16>
    %79 = vector.shape_cast %78 : vector<1x4x8xbf16> to vector<4x8xbf16>
    %cst_98 = arith.constant dense<0.000000e+00> : vector<64x8xf32>
    %80 = tpu.matmul %76, %79, %cst_98 {dimension_numbers = #tpu.dot_dimension_numbers<[1], [0], [0], [1], [0, 0, 1, 1], [], []>} : vector<64x4xbf16>, vector<4x8xbf16>, vector<64x8xf32> -> vector<64x8xf32>
    %81 = arith.addf %77, %80 : vector<64x8xf32>
    %c0_99 = arith.constant 0 : index
    %c0_100 = arith.constant 0 : index
    %82 = vector.load %arg13[%c0_99, %c0_100] : memref<64x8xf32, #tpu.memory_space<vmem>>, vector<64x8xf32>
    tpu.vector_store %arg13[%c0_99, %c0_100], %81 {strides = array<i32>} : memref<64x8xf32, #tpu.memory_space<vmem>>, vector<64x8xf32>,
    %c0_101 = arith.constant 0 : index
    %c0_102 = arith.constant 0 : index
    %83 = vector.load %arg13[%c0_101, %c0_102] : memref<64x8xf32, #tpu.memory_space<vmem>>, vector<64x8xf32>
    %c0_103 = arith.constant 0 : index
    %c0_104 = arith.constant 0 : index
    %84 = vector.load %arg6[%c0_103, %c0_104] : memref<1x8xf32, #tpu.memory_space<vmem>>, vector<1x8xf32>
    %85 = vector.broadcast %84 : vector<1x8xf32> to vector<64x8xf32>
    %86 = arith.addf %83, %85 : vector<64x8xf32>
    %cst_105 = arith.constant 0.000000e+00 : f32
    %87 = vector.broadcast %cst_105 : f32 to vector<64x8xf32>
    %88 = arith.maximumf %86, %87 : vector<64x8xf32>
    %89 = arith.truncf %88 : vector<64x8xf32> to vector<64x8xbf16>
    %cst_106 = arith.constant 0.000000e+00 : bf16
    %90 = vector.broadcast %cst_106 : bf16 to vector<10x10x8xbf16>
    %c0_107 = arith.constant 0 : index
    %c0_108 = arith.constant 0 : index
    %c0_109 = arith.constant 0 : index
    %91 = vector.load %arg12[%c0_107, %c0_108, %c0_109] : memref<10x10x8xbf16, #tpu.memory_space<vmem>>, vector<10x10x8xbf16>
    tpu.vector_store %arg12[%c0_107, %c0_108, %c0_109], %90 {strides = array<i32>} : memref<10x10x8xbf16, #tpu.memory_space<vmem>>, vector<10x10x8xbf16>,
    %92 = vector.shape_cast %89 : vector<64x8xbf16> to vector<8x8x8xbf16>
    %c1_110 = arith.constant 1 : index
    %c1_111 = arith.constant 1 : index
    %c0_112 = arith.constant 0 : index
    %93 = vector.load %arg12[%c1_110, %c1_111, %c0_112] : memref<10x10x8xbf16, #tpu.memory_space<vmem>>, vector<8x8x8xbf16>
    tpu.vector_store %arg12[%c1_110, %c1_111, %c0_112], %92 {strides = array<i32>} : memref<10x10x8xbf16, #tpu.memory_space<vmem>>, vector<8x8x8xbf16>,
    %c0_113 = arith.constant 0 : index
    %c0_114 = arith.constant 0 : index
    %94 = vector.load %arg9[%c0_113, %c0_114] : memref<4x8xbf16, #tpu.memory_space<vmem>>, vector<4x8xbf16>
    %cst_115 = arith.constant dense<0.000000e+00> : vector<64x8xf32>
    %95 = tpu.matmul %40, %94, %cst_115 {dimension_numbers = #tpu.dot_dimension_numbers<[1], [0], [0], [1], [0, 0, 1, 1], [], []>} : vector<64x4xbf16>, vector<4x8xbf16>, vector<64x8xf32> -> vector<64x8xf32>
    %c0_116 = arith.constant 0 : index
    %c0_117 = arith.constant 0 : index
    %96 = vector.load %arg10[%c0_116, %c0_117] : memref<1x8xf32, #tpu.memory_space<vmem>>, vector<1x8xf32>
    %97 = vector.broadcast %96 : vector<1x8xf32> to vector<64x8xf32>
    %98 = arith.addf %95, %97 : vector<64x8xf32>
    %c0_118 = arith.constant 0 : index
    %c0_119 = arith.constant 0 : index
    %99 = vector.load %arg8[%c0_118, %c0_119] : memref<1x8xf32, #tpu.memory_space<vmem>>, vector<1x8xf32>
    %100 = vector.broadcast %99 : vector<1x8xf32> to vector<64x8xf32>
    %101 = arith.addf %98, %100 : vector<64x8xf32>
    %c0_120 = arith.constant 0 : index
    %c0_121 = arith.constant 0 : index
    %102 = vector.load %arg13[%c0_120, %c0_121] : memref<64x8xf32, #tpu.memory_space<vmem>>, vector<64x8xf32>
    tpu.vector_store %arg13[%c0_120, %c0_121], %101 {strides = array<i32>} : memref<64x8xf32, #tpu.memory_space<vmem>>, vector<64x8xf32>,
    %c0_122 = arith.constant 0 : index
    %c0_123 = arith.constant 0 : index
    %c0_124 = arith.constant 0 : index
    %103 = vector.load %arg12[%c0_122, %c0_123, %c0_124] : memref<10x10x8xbf16, #tpu.memory_space<vmem>>, vector<8x8x8xbf16>
    %104 = vector.shape_cast %103 : vector<8x8x8xbf16> to vector<64x8xbf16>
    %c0_125 = arith.constant 0 : index
    %c0_126 = arith.constant 0 : index
    %105 = vector.load %arg13[%c0_125, %c0_126] : memref<64x8xf32, #tpu.memory_space<vmem>>, vector<64x8xf32>
    %c0_127 = arith.constant 0 : index
    %c0_128 = arith.constant 0 : index
    %c0_129 = arith.constant 0 : index
    %106 = vector.load %arg7[%c0_127, %c0_128, %c0_129] : memref<9x8x8xbf16, #tpu.memory_space<vmem>>, vector<1x8x8xbf16>
    %107 = vector.shape_cast %106 : vector<1x8x8xbf16> to vector<8x8xbf16>
    %cst_130 = arith.constant dense<0.000000e+00> : vector<64x8xf32>
    %108 = tpu.matmul %104, %107, %cst_130 {dimension_numbers = #tpu.dot_dimension_numbers<[1], [0], [0], [1], [0, 0, 1, 1], [], []>} : vector<64x8xbf16>, vector<8x8xbf16>, vector<64x8xf32> -> vector<64x8xf32>
    %109 = arith.addf %105, %108 : vector<64x8xf32>
    %c0_131 = arith.constant 0 : index
    %c0_132 = arith.constant 0 : index
    %110 = vector.load %arg13[%c0_131, %c0_132] : memref<64x8xf32, #tpu.memory_space<vmem>>, vector<64x8xf32>
    tpu.vector_store %arg13[%c0_131, %c0_132], %109 {strides = array<i32>} : memref<64x8xf32, #tpu.memory_space<vmem>>, vector<64x8xf32>,
    %c0_133 = arith.constant 0 : index
    %c1_134 = arith.constant 1 : index
    %c0_135 = arith.constant 0 : index
    %111 = vector.load %arg12[%c0_133, %c1_134, %c0_135] : memref<10x10x8xbf16, #tpu.memory_space<vmem>>, vector<8x8x8xbf16>
    %112 = vector.shape_cast %111 : vector<8x8x8xbf16> to vector<64x8xbf16>
    %c0_136 = arith.constant 0 : index
    %c0_137 = arith.constant 0 : index
    %113 = vector.load %arg13[%c0_136, %c0_137] : memref<64x8xf32, #tpu.memory_space<vmem>>, vector<64x8xf32>
    %c1_138 = arith.constant 1 : index
    %c0_139 = arith.constant 0 : index
    %c0_140 = arith.constant 0 : index
    %114 = vector.load %arg7[%c1_138, %c0_139, %c0_140] : memref<9x8x8xbf16, #tpu.memory_space<vmem>>, vector<1x8x8xbf16>
    %115 = vector.shape_cast %114 : vector<1x8x8xbf16> to vector<8x8xbf16>
    %cst_141 = arith.constant dense<0.000000e+00> : vector<64x8xf32>
    %116 = tpu.matmul %112, %115, %cst_141 {dimension_numbers = #tpu.dot_dimension_numbers<[1], [0], [0], [1], [0, 0, 1, 1], [], []>} : vector<64x8xbf16>, vector<8x8xbf16>, vector<64x8xf32> -> vector<64x8xf32>
    %117 = arith.addf %113, %116 : vector<64x8xf32>
    %c0_142 = arith.constant 0 : index
    %c0_143 = arith.constant 0 : index
    %118 = vector.load %arg13[%c0_142, %c0_143] : memref<64x8xf32, #tpu.memory_space<vmem>>, vector<64x8xf32>
    tpu.vector_store %arg13[%c0_142, %c0_143], %117 {strides = array<i32>} : memref<64x8xf32, #tpu.memory_space<vmem>>, vector<64x8xf32>,
    %c0_144 = arith.constant 0 : index
    %c2_145 = arith.constant 2 : index
    %c0_146 = arith.constant 0 : index
    %119 = vector.load %arg12[%c0_144, %c2_145, %c0_146] : memref<10x10x8xbf16, #tpu.memory_space<vmem>>, vector<8x8x8xbf16>
    %120 = vector.shape_cast %119 : vector<8x8x8xbf16> to vector<64x8xbf16>
    %c0_147 = arith.constant 0 : index
    %c0_148 = arith.constant 0 : index
    %121 = vector.load %arg13[%c0_147, %c0_148] : memref<64x8xf32, #tpu.memory_space<vmem>>, vector<64x8xf32>
    %c2_149 = arith.constant 2 : index
    %c0_150 = arith.constant 0 : index
    %c0_151 = arith.constant 0 : index
    %122 = vector.load %arg7[%c2_149, %c0_150, %c0_151] : memref<9x8x8xbf16, #tpu.memory_space<vmem>>, vector<1x8x8xbf16>
    %123 = vector.shape_cast %122 : vector<1x8x8xbf16> to vector<8x8xbf16>
    %cst_152 = arith.constant dense<0.000000e+00> : vector<64x8xf32>
    %124 = tpu.matmul %120, %123, %cst_152 {dimension_numbers = #tpu.dot_dimension_numbers<[1], [0], [0], [1], [0, 0, 1, 1], [], []>} : vector<64x8xbf16>, vector<8x8xbf16>, vector<64x8xf32> -> vector<64x8xf32>
    %125 = arith.addf %121, %124 : vector<64x8xf32>
    %c0_153 = arith.constant 0 : index
    %c0_154 = arith.constant 0 : index
    %126 = vector.load %arg13[%c0_153, %c0_154] : memref<64x8xf32, #tpu.memory_space<vmem>>, vector<64x8xf32>
    tpu.vector_store %arg13[%c0_153, %c0_154], %125 {strides = array<i32>} : memref<64x8xf32, #tpu.memory_space<vmem>>, vector<64x8xf32>,
    %c1_155 = arith.constant 1 : index
    %c0_156 = arith.constant 0 : index
    %c0_157 = arith.constant 0 : index
    %127 = vector.load %arg12[%c1_155, %c0_156, %c0_157] : memref<10x10x8xbf16, #tpu.memory_space<vmem>>, vector<8x8x8xbf16>
    %128 = vector.shape_cast %127 : vector<8x8x8xbf16> to vector<64x8xbf16>
    %c0_158 = arith.constant 0 : index
    %c0_159 = arith.constant 0 : index
    %129 = vector.load %arg13[%c0_158, %c0_159] : memref<64x8xf32, #tpu.memory_space<vmem>>, vector<64x8xf32>
    %c3_160 = arith.constant 3 : index
    %c0_161 = arith.constant 0 : index
    %c0_162 = arith.constant 0 : index
    %130 = vector.load %arg7[%c3_160, %c0_161, %c0_162] : memref<9x8x8xbf16, #tpu.memory_space<vmem>>, vector<1x8x8xbf16>
    %131 = vector.shape_cast %130 : vector<1x8x8xbf16> to vector<8x8xbf16>
    %cst_163 = arith.constant dense<0.000000e+00> : vector<64x8xf32>
    %132 = tpu.matmul %128, %131, %cst_163 {dimension_numbers = #tpu.dot_dimension_numbers<[1], [0], [0], [1], [0, 0, 1, 1], [], []>} : vector<64x8xbf16>, vector<8x8xbf16>, vector<64x8xf32> -> vector<64x8xf32>
    %133 = arith.addf %129, %132 : vector<64x8xf32>
    %c0_164 = arith.constant 0 : index
    %c0_165 = arith.constant 0 : index
    %134 = vector.load %arg13[%c0_164, %c0_165] : memref<64x8xf32, #tpu.memory_space<vmem>>, vector<64x8xf32>
    tpu.vector_store %arg13[%c0_164, %c0_165], %133 {strides = array<i32>} : memref<64x8xf32, #tpu.memory_space<vmem>>, vector<64x8xf32>,
    %c1_166 = arith.constant 1 : index
    %c1_167 = arith.constant 1 : index
    %c0_168 = arith.constant 0 : index
    %135 = vector.load %arg12[%c1_166, %c1_167, %c0_168] : memref<10x10x8xbf16, #tpu.memory_space<vmem>>, vector<8x8x8xbf16>
    %136 = vector.shape_cast %135 : vector<8x8x8xbf16> to vector<64x8xbf16>
    %c0_169 = arith.constant 0 : index
    %c0_170 = arith.constant 0 : index
    %137 = vector.load %arg13[%c0_169, %c0_170] : memref<64x8xf32, #tpu.memory_space<vmem>>, vector<64x8xf32>
    %c4_171 = arith.constant 4 : index
    %c0_172 = arith.constant 0 : index
    %c0_173 = arith.constant 0 : index
    %138 = vector.load %arg7[%c4_171, %c0_172, %c0_173] : memref<9x8x8xbf16, #tpu.memory_space<vmem>>, vector<1x8x8xbf16>
    %139 = vector.shape_cast %138 : vector<1x8x8xbf16> to vector<8x8xbf16>
    %cst_174 = arith.constant dense<0.000000e+00> : vector<64x8xf32>
    %140 = tpu.matmul %136, %139, %cst_174 {dimension_numbers = #tpu.dot_dimension_numbers<[1], [0], [0], [1], [0, 0, 1, 1], [], []>} : vector<64x8xbf16>, vector<8x8xbf16>, vector<64x8xf32> -> vector<64x8xf32>
    %141 = arith.addf %137, %140 : vector<64x8xf32>
    %c0_175 = arith.constant 0 : index
    %c0_176 = arith.constant 0 : index
    %142 = vector.load %arg13[%c0_175, %c0_176] : memref<64x8xf32, #tpu.memory_space<vmem>>, vector<64x8xf32>
    tpu.vector_store %arg13[%c0_175, %c0_176], %141 {strides = array<i32>} : memref<64x8xf32, #tpu.memory_space<vmem>>, vector<64x8xf32>,
    %c1_177 = arith.constant 1 : index
    %c2_178 = arith.constant 2 : index
    %c0_179 = arith.constant 0 : index
    %143 = vector.load %arg12[%c1_177, %c2_178, %c0_179] : memref<10x10x8xbf16, #tpu.memory_space<vmem>>, vector<8x8x8xbf16>
    %144 = vector.shape_cast %143 : vector<8x8x8xbf16> to vector<64x8xbf16>
    %c0_180 = arith.constant 0 : index
    %c0_181 = arith.constant 0 : index
    %145 = vector.load %arg13[%c0_180, %c0_181] : memref<64x8xf32, #tpu.memory_space<vmem>>, vector<64x8xf32>
    %c5_182 = arith.constant 5 : index
    %c0_183 = arith.constant 0 : index
    %c0_184 = arith.constant 0 : index
    %146 = vector.load %arg7[%c5_182, %c0_183, %c0_184] : memref<9x8x8xbf16, #tpu.memory_space<vmem>>, vector<1x8x8xbf16>
    %147 = vector.shape_cast %146 : vector<1x8x8xbf16> to vector<8x8xbf16>
    %cst_185 = arith.constant dense<0.000000e+00> : vector<64x8xf32>
    %148 = tpu.matmul %144, %147, %cst_185 {dimension_numbers = #tpu.dot_dimension_numbers<[1], [0], [0], [1], [0, 0, 1, 1], [], []>} : vector<64x8xbf16>, vector<8x8xbf16>, vector<64x8xf32> -> vector<64x8xf32>
    %149 = arith.addf %145, %148 : vector<64x8xf32>
    %c0_186 = arith.constant 0 : index
    %c0_187 = arith.constant 0 : index
    %150 = vector.load %arg13[%c0_186, %c0_187] : memref<64x8xf32, #tpu.memory_space<vmem>>, vector<64x8xf32>
    tpu.vector_store %arg13[%c0_186, %c0_187], %149 {strides = array<i32>} : memref<64x8xf32, #tpu.memory_space<vmem>>, vector<64x8xf32>,
    %c2_188 = arith.constant 2 : index
    %c0_189 = arith.constant 0 : index
    %c0_190 = arith.constant 0 : index
    %151 = vector.load %arg12[%c2_188, %c0_189, %c0_190] : memref<10x10x8xbf16, #tpu.memory_space<vmem>>, vector<8x8x8xbf16>
    %152 = vector.shape_cast %151 : vector<8x8x8xbf16> to vector<64x8xbf16>
    %c0_191 = arith.constant 0 : index
    %c0_192 = arith.constant 0 : index
    %153 = vector.load %arg13[%c0_191, %c0_192] : memref<64x8xf32, #tpu.memory_space<vmem>>, vector<64x8xf32>
    %c6_193 = arith.constant 6 : index
    %c0_194 = arith.constant 0 : index
    %c0_195 = arith.constant 0 : index
    %154 = vector.load %arg7[%c6_193, %c0_194, %c0_195] : memref<9x8x8xbf16, #tpu.memory_space<vmem>>, vector<1x8x8xbf16>
    %155 = vector.shape_cast %154 : vector<1x8x8xbf16> to vector<8x8xbf16>
    %cst_196 = arith.constant dense<0.000000e+00> : vector<64x8xf32>
    %156 = tpu.matmul %152, %155, %cst_196 {dimension_numbers = #tpu.dot_dimension_numbers<[1], [0], [0], [1], [0, 0, 1, 1], [], []>} : vector<64x8xbf16>, vector<8x8xbf16>, vector<64x8xf32> -> vector<64x8xf32>
    %157 = arith.addf %153, %156 : vector<64x8xf32>
    %c0_197 = arith.constant 0 : index
    %c0_198 = arith.constant 0 : index
    %158 = vector.load %arg13[%c0_197, %c0_198] : memref<64x8xf32, #tpu.memory_space<vmem>>, vector<64x8xf32>
    tpu.vector_store %arg13[%c0_197, %c0_198], %157 {strides = array<i32>} : memref<64x8xf32, #tpu.memory_space<vmem>>, vector<64x8xf32>,
    %c2_199 = arith.constant 2 : index
    %c1_200 = arith.constant 1 : index
    %c0_201 = arith.constant 0 : index
    %159 = vector.load %arg12[%c2_199, %c1_200, %c0_201] : memref<10x10x8xbf16, #tpu.memory_space<vmem>>, vector<8x8x8xbf16>
    %160 = vector.shape_cast %159 : vector<8x8x8xbf16> to vector<64x8xbf16>
    %c0_202 = arith.constant 0 : index
    %c0_203 = arith.constant 0 : index
    %161 = vector.load %arg13[%c0_202, %c0_203] : memref<64x8xf32, #tpu.memory_space<vmem>>, vector<64x8xf32>
    %c7_204 = arith.constant 7 : index
    %c0_205 = arith.constant 0 : index
    %c0_206 = arith.constant 0 : index
    %162 = vector.load %arg7[%c7_204, %c0_205, %c0_206] : memref<9x8x8xbf16, #tpu.memory_space<vmem>>, vector<1x8x8xbf16>
    %163 = vector.shape_cast %162 : vector<1x8x8xbf16> to vector<8x8xbf16>
    %cst_207 = arith.constant dense<0.000000e+00> : vector<64x8xf32>
    %164 = tpu.matmul %160, %163, %cst_207 {dimension_numbers = #tpu.dot_dimension_numbers<[1], [0], [0], [1], [0, 0, 1, 1], [], []>} : vector<64x8xbf16>, vector<8x8xbf16>, vector<64x8xf32> -> vector<64x8xf32>
    %165 = arith.addf %161, %164 : vector<64x8xf32>
    %c0_208 = arith.constant 0 : index
    %c0_209 = arith.constant 0 : index
    %166 = vector.load %arg13[%c0_208, %c0_209] : memref<64x8xf32, #tpu.memory_space<vmem>>, vector<64x8xf32>
    tpu.vector_store %arg13[%c0_208, %c0_209], %165 {strides = array<i32>} : memref<64x8xf32, #tpu.memory_space<vmem>>, vector<64x8xf32>,
    %c2_210 = arith.constant 2 : index
    %c2_211 = arith.constant 2 : index
    %c0_212 = arith.constant 0 : index
    %167 = vector.load %arg12[%c2_210, %c2_211, %c0_212] : memref<10x10x8xbf16, #tpu.memory_space<vmem>>, vector<8x8x8xbf16>
    %168 = vector.shape_cast %167 : vector<8x8x8xbf16> to vector<64x8xbf16>
    %c0_213 = arith.constant 0 : index
    %c0_214 = arith.constant 0 : index
    %169 = vector.load %arg13[%c0_213, %c0_214] : memref<64x8xf32, #tpu.memory_space<vmem>>, vector<64x8xf32>
    %c8_215 = arith.constant 8 : index
    %c0_216 = arith.constant 0 : index
    %c0_217 = arith.constant 0 : index
    %170 = vector.load %arg7[%c8_215, %c0_216, %c0_217] : memref<9x8x8xbf16, #tpu.memory_space<vmem>>, vector<1x8x8xbf16>
    %171 = vector.shape_cast %170 : vector<1x8x8xbf16> to vector<8x8xbf16>
    %cst_218 = arith.constant dense<0.000000e+00> : vector<64x8xf32>
    %172 = tpu.matmul %168, %171, %cst_218 {dimension_numbers = #tpu.dot_dimension_numbers<[1], [0], [0], [1], [0, 0, 1, 1], [], []>} : vector<64x8xbf16>, vector<8x8xbf16>, vector<64x8xf32> -> vector<64x8xf32>
    %173 = arith.addf %169, %172 : vector<64x8xf32>
    %c0_219 = arith.constant 0 : index
    %c0_220 = arith.constant 0 : index
    %174 = vector.load %arg13[%c0_219, %c0_220] : memref<64x8xf32, #tpu.memory_space<vmem>>, vector<64x8xf32>
    tpu.vector_store %arg13[%c0_219, %c0_220], %173 {strides = array<i32>} : memref<64x8xf32, #tpu.memory_space<vmem>>, vector<64x8xf32>,
    %c0_221 = arith.constant 0 : index
    %c0_222 = arith.constant 0 : index
    %175 = vector.load %arg13[%c0_221, %c0_222] : memref<64x8xf32, #tpu.memory_space<vmem>>, vector<64x8xf32>
    %cst_223 = arith.constant 0.000000e+00 : f32
    %176 = vector.broadcast %cst_223 : f32 to vector<64x8xf32>
    %177 = arith.maximumf %175, %176 : vector<64x8xf32>
    %178 = vector.shape_cast %177 : vector<64x8xf32> to vector<8x8x8xf32>
    %c0_224 = arith.constant 0 : index
    %c0_225 = arith.constant 0 : index
    %c0_226 = arith.constant 0 : index
    %c0_227 = arith.constant 0 : index
    %179 = vector.load %arg11[%c0_224, %c0_225, %c0_226, %c0_227] : memref<1x8x8x8xf32, #tpu.memory_space<vmem>>, vector<1x8x8x8xf32>
    %180 = vector.shape_cast %179 : vector<1x8x8x8xf32> to vector<8x8x8xf32>
    %181 = vector.shape_cast %178 : vector<8x8x8xf32> to vector<1x8x8x8xf32>
    tpu.vector_store %arg11[%c0_224, %c0_225, %c0_226, %c0_227], %181 {strides = array<i32>} : memref<1x8x8x8xf32, #tpu.memory_space<vmem>>, vector<1x8x8x8xf32>,
    return
  }
  func.func @transform_0(%arg0: i32) -> (i32, i32, i32, i32) {
    %c0_i32 = arith.constant 0 : i32
    %c0_i32_0 = arith.constant 0 : i32
    %c0_i32_1 = arith.constant 0 : i32
    %c0_i32_2 = arith.constant 0 : i32
    return %arg0, %c0_i32, %c0_i32_0, %c0_i32_1 : i32, i32, i32, i32
  }
  func.func @transform_1(%arg0: i32) -> (i32, i32, i32, i32) {
    %c0_i32 = arith.constant 0 : i32
    %c0_i32_0 = arith.constant 0 : i32
    %c0_i32_1 = arith.constant 0 : i32
    %c0_i32_2 = arith.constant 0 : i32
    return %arg0, %c0_i32, %c0_i32_0, %c0_i32_1 : i32, i32, i32, i32
  }
  func.func @transform_2(%arg0: i32) -> (i32, i32, i32, i32) {
    %c0_i32 = arith.constant 0 : i32
    %c0_i32_0 = arith.constant 0 : i32
    %c0_i32_1 = arith.constant 0 : i32
    %c0_i32_2 = arith.constant 0 : i32
    return %arg0, %c0_i32, %c0_i32_0, %c0_i32_1 : i32, i32, i32, i32
  }
  func.func @transform_3(%arg0: i32) -> (i32, i32, i32, i32) {
    %c0_i32 = arith.constant 0 : i32
    %c0_i32_0 = arith.constant 0 : i32
    %c0_i32_1 = arith.constant 0 : i32
    %c0_i32_2 = arith.constant 0 : i32
    return %arg0, %c0_i32, %c0_i32_0, %c0_i32_1 : i32, i32, i32, i32
  }
  func.func @transform_4(%arg0: i32) -> (i32, i32, i32) {
    %c0_i32 = arith.constant 0 : i32
    %c0_i32_0 = arith.constant 0 : i32
    %c0_i32_1 = arith.constant 0 : i32
    %c0_i32_2 = arith.constant 0 : i32
    return %c0_i32, %c0_i32_0, %c0_i32_1 : i32, i32, i32
  }
  func.func @transform_5(%arg0: i32) -> (i32, i32) {
    %c0_i32 = arith.constant 0 : i32
    %c0_i32_0 = arith.constant 0 : i32
    %c0_i32_1 = arith.constant 0 : i32
    return %c0_i32, %c0_i32_0 : i32, i32
  }
  func.func @transform_6(%arg0: i32) -> (i32, i32, i32) {
    %c0_i32 = arith.constant 0 : i32
    %c0_i32_0 = arith.constant 0 : i32
    %c0_i32_1 = arith.constant 0 : i32
    %c0_i32_2 = arith.constant 0 : i32
    return %c0_i32, %c0_i32_0, %c0_i32_1 : i32, i32, i32
  }
  func.func @transform_7(%arg0: i32) -> (i32, i32) {
    %c0_i32 = arith.constant 0 : i32
    %c0_i32_0 = arith.constant 0 : i32
    %c0_i32_1 = arith.constant 0 : i32
    return %c0_i32, %c0_i32_0 : i32, i32
  }
  func.func @transform_8(%arg0: i32) -> (i32, i32) {
    %c0_i32 = arith.constant 0 : i32
    %c0_i32_0 = arith.constant 0 : i32
    %c0_i32_1 = arith.constant 0 : i32
    return %c0_i32, %c0_i32_0 : i32, i32
  }
  func.func @transform_9(%arg0: i32) -> (i32, i32) {
    %c0_i32 = arith.constant 0 : i32
    %c0_i32_0 = arith.constant 0 : i32
    %c0_i32_1 = arith.constant 0 : i32
    return %c0_i32, %c0_i32_0 : i32, i32
  }
  func.func @transform_10(%arg0: i32) -> (i32, i32, i32, i32) {
    %c0_i32 = arith.constant 0 : i32
    %c0_i32_0 = arith.constant 0 : i32
    %c0_i32_1 = arith.constant 0 : i32
    %c0_i32_2 = arith.constant 0 : i32
    return %arg0, %c0_i32, %c0_i32_0, %c0_i32_1 : i32, i32, i32, i32
  }
}

</mosaic_0001>

<bundles_post_ra>
// kernel: basic_block_forward.1
= control target key start
LH: loop header
LB: loop body
LE: loop exit
PB: predicated region body
PF: predicated region fallthrough
CT: control target
= control target key end

     0   :  { %s3809_s13 = smov 0   ;;  %s4587_s0 = inlined_call_operand.vmem [shape: bf16[2,9,9,4], index: 0, kind: input, shape index: {}]   ;;  %s4588_s1 = inlined_call_operand.vmem [shape: bf16[2,9,9,4], index: 1, kind: input, shape index: {}]   ;;  %s4589_s2 = inlined_call_operand.vmem [shape: bf16[2,9,9,4], index: 2, kind: input, shape index: {}]   ;;  %s4590_s3 = inlined_call_operand.vmem [shape: bf16[2,9,9,4], index: 3, kind: input, shape index: {}]   ;;  %s4591_s4 = inlined_call_operand.vmem [shape: bf16[9,4,8], index: 4, kind: input, shape index: {}]   ;;  %s4592_s5 = inlined_call_operand.vmem [shape: f32[1,8], index: 5, kind: input, shape index: {}]   ;;  %s4593_s6 = inlined_call_operand.vmem [shape: bf16[9,8,8], index: 6, kind: input, shape index: {}]   ;;  %s4594_s7 = inlined_call_operand.vmem [shape: f32[1,8], index: 7, kind: input, shape index: {}]   ;;  %s4595_s8 = inlined_call_operand.vmem [shape: bf16[4,8], index: 8, kind: input, shape index: {}]   ;;  %s4596_s9 = inlined_call_operand.vmem [shape: f32[1,8], index: 9, kind: input, shape index: {}]   ;;  %s4597_s10 = inlined_call_operand.vmem [shape: f32[2,8,8,8], index: 10, kind: output, shape index: {}]  }
   0x1 LB: > { %s3385_s14 = sadd.s32 4294967295, %s3750_s13   ;;  %p3389_p0 = scmp.ge.s32.totalorder %s3750_s13, 1  ;;  %s3750_s13 = sphi %s3809_s13, %s20_s13  }
   0x2   : > { %p342_p1 = scmp.lt.s32.totalorder %s3750_s13, 3 }
   0x4   : > { %p343_p2 = pnand %p3389_p0, %p342_p1 }
   0x5   : > { %p395_p3 = scmp.lt.s32.totalorder (!%p343_p2), %s3385_s14, 1 }
   0x6   : > { %346 = sbr.rel (%p343_p2) target bundleno = 638 (0x27e), region = 60 }
   0xb   : > { %v446_v0 = vld [vmem:[%s4591_s4] sm:$0x3]  ;;  %vm480_vm0 = vcmask 1041408   ;;  %v3442_v2 = vld [vmem:[%s4591_s4 + $0x6] sm:$0x3]  ;;  %s4607_s14 = smov (!%p395_p3, %s3385_s14), 1 }
   0xc   : > { %v482_v1 = vsel %vm480_vm0, %v446_v0, 0  ;;  %v3416_v3 = vld [vmem:[%s4591_s4 + $0x2] sm:$0x3]  ;;  %v891_v4 = vsel %vm480_vm0, %v3442_v2, 0  ;;  %v3437_v6 = vld [vmem:[%s4591_s4 + $0x4] sm:$0x3] }
   0xd   : > { %491 = vmatpush.bf16.msra.mxu0 %v482_v1  ;;  %3727 = vmatpush.bf16.msra.mxu3 %v482_v1  ;;  %v580_v5 = vsel %vm480_vm0, %v3416_v3, 0  ;;  %v793_v7 = vsel %vm480_vm0, %v3437_v6, 0  ;;  %s3836_s23 = smul.u32 72, %s4607_s14  ;;  %vm467_vm1 = vcmask 31744   ;;  %vm643_vm2 = vsmask.f32 3328 }
   0xe   : > { %3728 = vmatpush.bf16.msra.mxu1 %v580_v5  ;;  %3729 = vmatpush.bf16.msra.mxu2 %v793_v7  ;;  %vm644_vm3 = vsmask.f32 7440  ;;  %vm421_vm5 = vcmask 64512   ;;  %vm1953_vm6 = vcmask 1043456   ;;  %vm1692_vm7 = vcmask 57344   ;;  %s3690_s18 = sshll.u32 %s4607_s14, 6 }
   0xf   : > { %s3842_s26 = scalar_lea.vmem %s4587_s0, %s3836_s23  ;;  %s3848_s29 = scalar_lea.vmem %s4588_s1, %s3836_s23  ;;  %vm3867_vm4 = vmor %vm643_vm2, %vm644_vm3  ;;  %vm1690_vm8 = vcmask 60416   ;;  %vm1800_vm9 = vsmask.f32 256  ;;  %vm1794_vm10 = vsmask.f32 7938  ;;  %vm2244_vm13 = vcmask 1042432  }
  0x10   : > { %v3398_v8 = vld [vmem:[%s3842_s26] sm:$0xf]  ;;  %v3691_v9 = vld [vmem:[%s3842_s26 + $0x4] sm:$0xf0]  ;;  %v3402_v10 = vld [vmem:[%s3842_s26 + $0x10] sm:$0xf]  ;;  %s3925_s22 = scalar_lea.vmem %s4589_s2, %s3836_s23  ;;  %s3947_s30 = scalar_lea.vmem %s4590_s3, %s3836_s23 }
  0x11   : > { %900 = vmatpush.bf16.msrb.mxu3 %v891_v4  ;;  %589 = vmatpush.bf16.msrb.mxu0 %v580_v5  ;;  %v3399_v11 = vor.u32 %v3691_v9, %v3398_v8  ;;  %v3692_v12 = vld [vmem:[%s3842_s26 + $0x14] sm:$0xf0]  ;;  %v3423_v14 = vld [vmem:[%s3848_s29 + $0x10] sm:$0xf]  ;;  %v632_v17 = vld [vmem:[%s3842_s26 + $0x14] sm:$0x1]  ;;  %s4553_s21 = scalar_lea.vmem %s4597_s10, %s3690_s18 }
  0x12   : > { %v3403_v13 = vor.u32 %v3692_v12, %v3402_v10  ;;  %v3696_v15 = vld [vmem:[%s3848_s29 + $0x14] sm:$0xf0]  ;;  %v631_v16 = vld [vmem:[%s3842_s26 + $0x10] sm:$0xf]  ;;  %v634_v20 = vld [vmem:[%s3842_s26 + $0x1c] sm:$0x1] }
  0x13   : > { %3412 = vmatmul.msk.bf16.vlgmr.msra.gmra.mxu0 %vm467_vm1, %v3399_v11  ;;  %v3424_v18 = vor.u32 %v3696_v15, %v3423_v14  ;;  %v633_v19 = vld [vmem:[%s3842_s26 + $0x18] sm:$0xf]  ;;  %v675_v21 = vshrl.u32 %v631_v16, 16  ;;  %v678_v22 = vshll.u32 %v631_v16, 16  ;;  %v684_v23 = vshll.u32 %v632_v17, 16  ;;  %vm4219_vm11 = vmand %vm1692_vm7, %vm1800_vm9 }
  0x14   : > { %3413 = vmatmul.msk.bf16.vlgmr.msra.gmra.mxu3 %vm467_vm1, %v3403_v13  ;;  %v689_v24 = vshrl.u32 %v633_v19, 16  ;;  %v692_v25 = vshll.u32 %v633_v19, 16  ;;  %v698_v26 = vshll.u32 %v634_v20, 16  ;;  %v3419_v29 = vld [vmem:[%s3848_s29] sm:$0xf]  ;;  %vm4226_vm12 = vmand %vm1690_vm8, %vm1794_vm10  ;;  %vm2245_vm14 = vcmask 1046532  }
  0x15   : > { %802 = vmatpush.bf16.msra.mxu0 %v793_v7  ;;  %3434 = vmatmul.msk.bf16.vlgmr.msra.gmra.mxu1 %vm467_vm1, %v3424_v18  ;;  %v677_v27 = vrot.slane %v675_v21, 4  ;;  %v680_v28 = vrot.slane %v678_v22, 5  ;;  %v3695_v30 = vld [vmem:[%s3848_s29 + $0x4] sm:$0xf0]  ;;  %v686_v34 = vrot.slane %v684_v23, 5  ;;  %vm4241_vm15 = vmor %vm2244_vm13, %vm2245_vm14 }
  0x16   : > { %v691_v31 = vrot.slane %v689_v24, 4  ;;  %v694_v32 = vrot.slane %v692_v25, 5  ;;  %v627_v35 = vld [vmem:[%s3842_s26] sm:$0xf]  ;;  %v629_v36 = vld [vmem:[%s3842_s26 + $0x8] sm:$0xf]  ;;  %v3420_v52 = vor.u32 %v3695_v30, %v3419_v29 }
  0x17   : > { %v681_v33 = vor.u32 %v680_v28, %v677_v27  ;;  %v700_v39 = vrot.slane %v698_v26, 5  ;;  %v628_v40 = vld [vmem:[%s3842_s26 + $0x4] sm:$0x1]  ;;  %v647_v41 = vshrl.u32 %v627_v35, 16  ;;  %v650_v42 = vshll.u32 %v627_v35, 16 }
  0x18   : > { %v695_v38 = vor.u32 %v694_v32, %v691_v31  ;;  %v661_v44 = vshrl.u32 %v629_v36, 16  ;;  %v664_v45 = vshll.u32 %v629_v36, 16  ;;  %v635_v46 = vld [vmem:[%s3842_s26 + $0x20] sm:$0xf]  ;;  %v630_v49 = vld [vmem:[%s3842_s26 + $0xc] sm:$0x1] }
  0x19   : > { %v682_v43 = vrot.slane %v681_v33, 4  ;;  %v3406_v47 = vld [vmem:[%s3842_s26 + $0x20] sm:$0xf]  ;;  %v649_v50 = vrot.slane %v647_v41, 4  ;;  %v652_v51 = vrot.slane %v650_v42, 5  ;;  %v656_v62 = vshll.u32 %v628_v40, 16 }
  0x1a   : > { %v696_v48 = vrot.slane %v695_v38, 4  ;;  %v663_v54 = vrot.slane %v661_v44, 4  ;;  %v666_v55 = vrot.slane %v664_v45, 5  ;;  %v636_v56 = vld [vmem:[%s3842_s26 + $0x24] sm:$0x1]  ;;  %v703_v63 = vshrl.u32 %v635_v46, 16 }
  0x1b   : > { %v687_v53 = vsel %vm3867_vm4, %v682_v43, %v686_v34  ;;  %v637_v57 = vld [vmem:[%s3842_s26 + $0x28] sm:$0xf]  ;;  %v3427_v61 = vld [vmem:[%s3848_s29 + $0x20] sm:$0xf]  ;;  %v653_v2 = vor.u32 %v652_v51, %v649_v50  ;;  %v670_v3 = vshll.u32 %v630_v49, 16  ;;  %v706_v5 = vshll.u32 %v635_v46, 16 }
  0x1c   : > { %v3693_v58 = vld [vmem:[%s3842_s26 + $0x24] sm:$0xf0]  ;;  %v701_v59 = vsel %vm3867_vm4, %v696_v48, %v700_v39  ;;  %v770_v60 = vunpack.c.l.b16 %v687_v53  ;;  %v638_v4 = vld [vmem:[%s3842_s26 + $0x2c] sm:$0x1]  ;;  %v705_v6 = vrot.slane %v703_v63, 4  ;;  %v712_v7 = vshll.u32 %v636_v56, 16 }
  0x1d   : > { %v771_v0 = vunpack.c.l.b16 %v701_v59  ;;  %v3697_v1 = vld [vmem:[%s3848_s29 + $0x24] sm:$0xf0]  ;;  %v717_v8 = vshrl.u32 %v637_v57, 16  ;;  %v720_v9 = vshll.u32 %v637_v57, 16  ;;  %v3407_v10 = vor.u32 %v3693_v58, %v3406_v47  ;;  %v639_v25 = vld [vmem:[%s3842_s26 + $0x30] sm:$0xf] }
  0x1e   : > { %v667_v12 = vor.u32 %v666_v55, %v663_v54  ;;  %v708_v13 = vrot.slane %v706_v5, 5  ;;  %v3428_v14 = vor.u32 %v3697_v1, %v3427_v61  ;;  %v726_v17 = vshll.u32 %v638_v4, 16  ;;  %v641_v26 = vld [vmem:[%s3842_s26 + $0x38] sm:$0xf]  ;;  %v3463_v29 = vld [vmem:[%s4591_s4 + $0x8] sm:$0x3] }
  0x1f   : > { %v777_v11 = vpack.c.b16 %v771_v0, %v770_v60  ;;  %v719_v15 = vrot.slane %v717_v8, 4  ;;  %v722_v16 = vrot.slane %v720_v9, 5  ;;  %v654_v18 = vrot.slane %v653_v2, 4  ;;  %v3526_v30 = vld [vmem:[%s4591_s4 + $0xe] sm:$0x3] }
  0x20   : > { %v658_v19 = vrot.slane %v656_v62, 5  ;;  %v672_v20 = vrot.slane %v670_v3, 5  ;;  %v709_v21 = vor.u32 %v708_v13, %v705_v6  ;;  %v714_v22 = vrot.slane %v712_v7, 5  ;;  %v3484_v34 = vld [vmem:[%s4591_s4 + $0xa] sm:$0x3] }
  0x21   : > { %3439 = vmatmul.msk.bf16.vlgmr.msra.gmra.mxu2 %vm467_vm1, %v777_v11  ;;  %v723_v23 = vor.u32 %v722_v16, %v719_v15  ;;  %v728_v24 = vrot.slane %v726_v17, 5  ;;  %v668_v27 = vrot.slane %v667_v12, 4  ;;  %v989_v32 = vsel %vm480_vm0, %v3463_v29, 0  ;;  %v3497_v39 = vld [vmem:[%s4591_s4 + $0xc] sm:$0x3] }
  0x22   : > { %v710_v28 = vrot.slane %v709_v21, 4  ;;  %v1397_v33 = vsel %vm480_vm0, %v3526_v30, 0  ;;  %v1199_v35 = vsel %vm480_vm0, %v3484_v34, 0  ;;  %v731_v36 = vshrl.u32 %v639_v25, 16  ;;  %v640_v53 = vld [vmem:[%s3842_s26 + $0x34] sm:$0x1] }
  0x23   : > { %3433 = vmatmul.msk.bf16.vlgmr.msrb.gmra.mxu0 %vm467_vm1, %v3420_v52  ;;  %v724_v31 = vrot.slane %v723_v23, 4  ;;  %v734_v38 = vshll.u32 %v639_v25, 16  ;;  %1406 = vmatpush.bf16.msra.mxu3 %v1397_v33  ;;  %v745_v42 = vshrl.u32 %v641_v26, 16  ;;  %v659_v43 = vsel %vm3867_vm4, %v654_v18, %v658_v19  ;;  %v642_v54 = vld [vmem:[%s3842_s26 + $0x3c] sm:$0x1] }
  0x24   : > { %3414 = vmatmul.msk.bf16.gmra.mxu3 %vm467_vm1, %v3407_v10  ;;  %998 = vmatpush.bf16.msrb.mxu0 %v989_v32  ;;  %v715_v40 = vsel %vm3867_vm4, %v710_v28, %v714_v22  ;;  %v673_v44 = vsel %vm3867_vm4, %v668_v27, %v672_v20  ;;  %v748_v45 = vshll.u32 %v641_v26, 16  ;;  %v1298_v46 = vsel %vm480_vm0, %v3497_v39, 0  ;;  %v3410_v57 = vld [vmem:[%s3842_s26 + $0x30] sm:$0xf]  ;;  %v3694_v58 = vld [vmem:[%s3842_s26 + $0x34] sm:$0xf0] }
  0x25   : > { %3435 = vmatmul.msk.bf16.gmra.mxu1 %vm467_vm1, %v3428_v14  ;;  %v729_v41 = vsel %vm3867_vm4, %v724_v31, %v728_v24  ;;  %v772_v47 = vunpack.c.l.b16 %v715_v40  ;;  %v733_v49 = vrot.slane %v731_v36, 4  ;;  %v736_v50 = vrot.slane %v734_v38, 5  ;;  %1307 = vmatpush.bf16.msrb.mxu2 %v1298_v46  ;;  %v3431_v60 = vld [vmem:[%s3848_s29 + $0x30] sm:$0xf]  ;;  %v3698_v61 = vld [vmem:[%s3848_s29 + $0x34] sm:$0xf0] }
  0x26   : > { %1208 = vmatpush.bf16.msrb.mxu1 %v1199_v35  ;;  %v773_v48 = vunpack.c.l.b16 %v729_v41  ;;  %v768_v51 = vunpack.c.l.b16 %v659_v43  ;;  %v769_v52 = vunpack.c.l.b16 %v673_v44  ;;  %v747_v55 = vrot.slane %v745_v42, 4  ;;  %v1036_v4 = vld [vmem:[%s3925_s22] sm:$0xf]  ;;  %v1038_v5 = vld [vmem:[%s3925_s22 + $0x8] sm:$0xf] }
  0x27   : > { %v750_v56 = vrot.slane %v748_v45, 5  ;;  %v737_v62 = vor.u32 %v736_v50, %v733_v49  ;;  %v740_v63 = vshll.u32 %v640_v53, 16  ;;  %v754_v0 = vshll.u32 %v642_v54, 16  ;;  %v3563_v18 = vld [vmem:[%s4591_s4 + $0x10] sm:$0x3] }
  0x28   : > { %v778_v59 = vpack.c.b16 %v773_v48, %v772_v47  ;;  %v776_v1 = vpack.c.b16 %v769_v52, %v768_v51  ;;  %v3411_v3 = vor.u32 %v3694_v58, %v3410_v57  ;;  %v3432_v6 = vor.u32 %v3698_v61, %v3431_v60  ;;  %v1037_v20 = vld [vmem:[%s3925_s22 + $0x4] sm:$0x1]  ;;  %v1039_v21 = vld [vmem:[%s3925_s22 + $0xc] sm:$0x1]  ;;  %v3466_v38 = vld [vmem:[%s3947_s30] sm:$0xf] }
  0x29   : > { %v751_v2 = vor.u32 %v750_v56, %v747_v55  ;;  %v1053_v7 = vshrl.u32 %v1036_v4, 16  ;;  %v1056_v8 = vshll.u32 %v1036_v4, 16  ;;  %v1067_v9 = vshrl.u32 %v1038_v5, 16  ;;  %v3703_v39 = vld [vmem:[%s3947_s30 + $0x4] sm:$0xf0] }
  0x2a   : > { %v738_v10 = vrot.slane %v737_v62, 4  ;;  %v742_v11 = vrot.slane %v740_v63, 5  ;;  %v756_v12 = vrot.slane %v754_v0, 5  ;;  %v1070_v13 = vshll.u32 %v1038_v5, 16  ;;  %v3445_v40 = vld [vmem:[%s3925_s22] sm:$0xf] }
  0x2b   : > { %v752_v14 = vrot.slane %v751_v2, 4  ;;  %v1055_v15 = vrot.slane %v1053_v7, 4  ;;  %v1058_v16 = vrot.slane %v1056_v8, 5  ;;  %v1069_v17 = vrot.slane %v1067_v9, 4  ;;  %v3699_v41 = vld [vmem:[%s3925_s22 + $0x4] sm:$0xf0] }
  0x2c   : > { %v1607_v19 = vsel %vm480_vm0, %v3563_v18, 0  ;;  %v1072_v23 = vrot.slane %v1070_v13, 5  ;;  %v1062_v24 = vshll.u32 %v1037_v20, 16  ;;  %v1076_v25 = vshll.u32 %v1039_v21, 16  ;;  %v1040_v47 = vld [vmem:[%s3925_s22 + $0x10] sm:$0xf] }
  0x2d   : > { %v1059_v22 = vor.u32 %v1058_v16, %v1055_v15  ;;  %v743_v26 = vsel %vm3867_vm4, %v738_v10, %v742_v11  ;;  %v757_v27 = vsel %vm3867_vm4, %v752_v14, %v756_v12  ;;  %v3957_v45 = vor.u32 %v3703_v39, %v3466_v38  ;;  %v1042_v48 = vld [vmem:[%s3925_s22 + $0x18] sm:$0xf]  ;;  %v1041_v58 = vld [vmem:[%s3925_s22 + $0x14] sm:$0x1]  ;;  %v3500_v4 = vld [vmem:[%s3842_s26 + $0x8] sm:$0xf] }
  0x2e   : > { %v1073_v29 = vor.u32 %v1072_v23, %v1069_v17  ;;  %v1064_v30 = vrot.slane %v1062_v24, 5  ;;  %v1078_v31 = vrot.slane %v1076_v25, 5  ;;  %v774_v33 = vunpack.c.l.b16 %v743_v26  ;;  %v3707_v5 = vld [vmem:[%s3842_s26 + $0xc] sm:$0xf0]  ;;  %v3704_v9 = vld [vmem:[%s3947_s30 + $0x14] sm:$0xf0] }
  0x2f   : > { %v1060_v28 = vrot.slane %v1059_v22, 4  ;;  %v775_v34 = vunpack.c.l.b16 %v757_v27  ;;  %v3446_v46 = vor.u32 %v3699_v41, %v3445_v40  ;;  %v1081_v49 = vshrl.u32 %v1040_v47, 16  ;;  %v3470_v8 = vld [vmem:[%s3947_s30 + $0x10] sm:$0xf]  ;;  %v3700_v11 = vld [vmem:[%s3925_s22 + $0x14] sm:$0xf0] }
  0x30   : > { %v1074_v32 = vrot.slane %v1073_v29, 4  ;;  %v1084_v50 = vshll.u32 %v1040_v47, 16  ;;  %v1095_v51 = vshrl.u32 %v1042_v48, 16  ;;  %v1098_v52 = vshll.u32 %v1042_v48, 16  ;;  %v3449_v10 = vld [vmem:[%s3925_s22 + $0x10] sm:$0xf] }
  0x31   : > { %3440 = vmatmul.msk.bf16.gmra.mxu2 %vm467_vm1, %v778_v59  ;;  %v1065_v35 = vsel %vm3867_vm4, %v1060_v28, %v1064_v30  ;;  %v779_v42 = vpack.c.b16 %v775_v34, %v774_v33  ;;  %v1083_v54 = vrot.slane %v1081_v49, 4  ;;  %v1043_v59 = vld [vmem:[%s3925_s22 + $0x1c] sm:$0x1]  ;;  %v1090_v61 = vshll.u32 %v1041_v58, 16  ;;  %v1044_v17 = vld [vmem:[%s3925_s22 + $0x20] sm:$0xf] }
  0x32   : > { %v1079_v36 = vsel %vm3867_vm4, %v1074_v32, %v1078_v31  ;;  %v1174_v43 = vunpack.c.l.b16 %v1065_v35  ;;  %v1086_v55 = vrot.slane %v1084_v50, 5  ;;  %v1097_v56 = vrot.slane %v1095_v51, 4  ;;  %v1046_v18 = vld [vmem:[%s3925_s22 + $0x28] sm:$0xf]  ;;  %v1045_v28 = vld [vmem:[%s3925_s22 + $0x24] sm:$0x1] }
  0x33   : > { %3438 = vmatmul.msk.bf16.vlgmr.msra.gmra.mxu0 %vm467_vm1, %v776_v1  ;;  %v1175_v44 = vunpack.c.l.b16 %v1079_v36  ;;  %v1100_v57 = vrot.slane %v1098_v52, 5  ;;  %v1104_v63 = vshll.u32 %v1043_v59, 16  ;;  %v1092_v1 = vrot.slane %v1090_v61, 5  ;;  %v1047_v29 = vld [vmem:[%s3925_s22 + $0x2c] sm:$0x1] }
  0x34   : > { %3415 = vmatmul.msk.bf16.gmra.mxu3 %vm467_vm1, %v3411_v3  ;;  %1616 = vmatpush.bf16.msra.mxu0 %v1607_v19  ;;  %v1087_v60 = vor.u32 %v1086_v55, %v1083_v54  ;;  %v3501_v12 = vor.u32 %v3707_v5, %v3500_v4  ;;  %v3978_v15 = vor.u32 %v3704_v9, %v3470_v8  ;;  %v1109_v19 = vshrl.u32 %v1044_v17, 16  ;;  %v3504_v39 = vld [vmem:[%s3842_s26 + $0x18] sm:$0xf]  ;;  %v3708_v40 = vld [vmem:[%s3842_s26 + $0x1c] sm:$0xf0] }
  0x35   : > { %3436 = vmatmul.msk.bf16.gmra.mxu1 %vm467_vm1, %v3432_v6  ;;  %v1182_v53 = vpack.c.b16 %v1175_v44, %v1174_v43  ;;  %v1101_v62 = vor.u32 %v1100_v57, %v1097_v56  ;;  %v1106_v3 = vrot.slane %v1104_v63, 5  ;;  %v3450_v16 = vor.u32 %v3700_v11, %v3449_v10  ;;  %v3474_v43 = vld [vmem:[%s3947_s30 + $0x20] sm:$0xf]  ;;  %v3705_v44 = vld [vmem:[%s3947_s30 + $0x24] sm:$0xf0] }
  0x36   : > { %v1088_v0 = vrot.slane %v1087_v60, 4  ;;  %v1112_v20 = vshll.u32 %v1044_v17, 16  ;;  %v1123_v21 = vshrl.u32 %v1046_v18, 16  ;;  %v1126_v22 = vshll.u32 %v1046_v18, 16  ;;  %v3701_v47 = vld [vmem:[%s3925_s22 + $0x24] sm:$0xf0] }
  0x37   : > { %v1102_v2 = vrot.slane %v1101_v62, 4  ;;  %v1111_v24 = vrot.slane %v1109_v19, 4  ;;  %v1118_v31 = vshll.u32 %v1045_v28, 16  ;;  %v1132_v33 = vshll.u32 %v1047_v29, 16  ;;  %v3547_v55 = vld [vmem:[%s3842_s26 + $0x8] sm:$0xf] }
  0x38   : > { %v1093_v6 = vsel %vm3867_vm4, %v1088_v0, %v1092_v1  ;;  %v1114_v25 = vrot.slane %v1112_v20, 5  ;;  %v1125_v26 = vrot.slane %v1123_v21, 4  ;;  %v1128_v27 = vrot.slane %v1126_v22, 5  ;;  %v3549_v56 = vld [vmem:[%s3842_s26 + $0x10] sm:$0xf] }
  0x39   : > { %v1107_v7 = vsel %vm3867_vm4, %v1102_v2, %v1106_v3  ;;  %v1176_v13 = vunpack.c.l.b16 %v1093_v6  ;;  %v1120_v35 = vrot.slane %v1118_v31, 5  ;;  %v1134_v38 = vrot.slane %v1132_v33, 5  ;;  %v1050_v59 = vld [vmem:[%s3925_s22 + $0x38] sm:$0xf]  ;;  %v1049_v60 = vld [vmem:[%s3925_s22 + $0x34] sm:$0x1] }
  0x3a   : > { %v1177_v14 = vunpack.c.l.b16 %v1107_v7  ;;  %v1115_v30 = vor.u32 %v1114_v25, %v1111_v24  ;;  %v1129_v32 = vor.u32 %v1128_v27, %v1125_v26  ;;  %v3505_v48 = vor.u32 %v3708_v40, %v3504_v39  ;;  %v1051_v61 = vld [vmem:[%s3925_s22 + $0x3c] sm:$0x1]  ;;  %v3478_v11 = vld [vmem:[%s3947_s30 + $0x30] sm:$0xf]  ;;  %v3548_v26 = vld [vmem:[%s3842_s26 + $0xc] sm:$0x1] }
  0x3b   : > { %v3999_v51 = vor.u32 %v3705_v44, %v3474_v43  ;;  %v1461_v0 = vshrl.u32 %v3547_v55, 16  ;;  %v1464_v1 = vshll.u32 %v3547_v55, 16  ;;  %v1475_v2 = vshrl.u32 %v3549_v56, 16  ;;  %v3709_v21 = vld [vmem:[%s3842_s26 + $0x2c] sm:$0xf0] }
  0x3c   : > { %v1183_v23 = vpack.c.b16 %v1177_v14, %v1176_v13  ;;  %v1116_v34 = vrot.slane %v1115_v30, 4  ;;  %v1130_v36 = vrot.slane %v1129_v32, 4  ;;  %v1146_v4 = vshll.u32 %v1049_v60, 16  ;;  %v3550_v27 = vld [vmem:[%s3842_s26 + $0x14] sm:$0x1] }
  0x3d   : > { %v1151_v5 = vshrl.u32 %v1050_v59, 16  ;;  %v1154_v6 = vshll.u32 %v1050_v59, 16  ;;  %v1478_v7 = vshll.u32 %v3549_v56, 16  ;;  %v1160_v8 = vshll.u32 %v1051_v61, 16  ;;  %v3457_v28 = vld [vmem:[%s3925_s22 + $0x30] sm:$0xf] }
  0x3e   : > { %v1121_v41 = vsel %vm3867_vm4, %v1116_v34, %v1120_v35  ;;  %v1148_v10 = vrot.slane %v1146_v4, 5  ;;  %v1463_v17 = vrot.slane %v1461_v0, 4  ;;  %v1466_v18 = vrot.slane %v1464_v1, 5  ;;  %v3702_v29 = vld [vmem:[%s3925_s22 + $0x34] sm:$0xf0] }
  0x3f   : > { %v1178_v49 = vunpack.c.l.b16 %v1121_v41  ;;  %v1153_v13 = vrot.slane %v1151_v5, 4  ;;  %v1156_v14 = vrot.slane %v1154_v6, 5  ;;  %v1477_v19 = vrot.slane %v1475_v2, 4  ;;  %v3512_v60 = vld [vmem:[%s3842_s26 + $0x38] sm:$0xf] }
  0x40   : > { %v3752_v20 = vmov 0.0   ;;  %v1480_v22 = vrot.slane %v1478_v7, 5  ;;  %v1162_v25 = vrot.slane %v1160_v8, 5  ;;  %v1467_v33 = vor.u32 %v1466_v18, %v1463_v17  ;;  %v3710_v61 = vld [vmem:[%s3842_s26 + $0x3c] sm:$0xf0] }
  0x41   : > { %3441 = vmatmul.msk.bf16.gmra.mxu2 %vm467_vm1, %v779_v42  ;;  %v1135_v42 = vsel %vm3867_vm4, %v1130_v36, %v1134_v38  ;;  %422 = vst.msk [vmem:[#allocation3] sm:$0xff] %vm421_vm5, %v3752_v20  ;;  %v1157_v24 = vor.u32 %v1156_v14, %v1153_v13  ;;  %v1470_v35 = vshll.u32 %v3548_v26, 16  ;;  %v1484_v38 = vshll.u32 %v3550_v27, 16  ;;  %v3554_v4 = vld [vmem:[%s3842_s26 + $0x24] sm:$0x1] }
  0x42   : > { %v1179_v50 = vunpack.c.l.b16 %v1135_v42  ;;  %423 = vst.msk [vmem:[#allocation3 + $0x8] sm:$0xff] %vm421_vm5, %v3752_v20  ;;  %v1481_v36 = vor.u32 %v1480_v22, %v1477_v19  ;;  %v3458_v40 = vor.u32 %v3702_v29, %v3457_v28  ;;  %v1468_v43 = vrot.slane %v1467_v33, 4  ;;  %v3555_v17 = vld [vmem:[%s3842_s26 + $0x28] sm:$0xf]  ;;  %v3557_v18 = vld [vmem:[%s3842_s26 + $0x30] sm:$0xf] }
  0x43   : > { %3480 = vmatmul.msk.bf16.vlgmr.msrb.gmra.mxu0 %vm467_vm1, %v3957_v45  ;;  %424 = vst.msk [vmem:[#allocation3 + $0x10] sm:$0xff] %vm421_vm5, %v3752_v20  ;;  %v1158_v30 = vrot.slane %v1157_v24, 4  ;;  %v1472_v44 = vrot.slane %v1470_v35, 5  ;;  %v3513_v5 = vor.u32 %v3710_v61, %v3512_v60  ;;  %v1517_v19 = vshrl.u32 %v3555_v17, 16  ;;  %v3556_v29 = vld [vmem:[%s3842_s26 + $0x2c] sm:$0x1] }
  0x44   : > { %3459 = vmatmul.msk.bf16.vlgmr.msrb.gmra.mxu3 %vm467_vm1, %v3446_v46  ;;  %v3453_v46 = vld [vmem:[%s3925_s22 + $0x20] sm:$0xf]  ;;  %v1184_v54 = vpack.c.b16 %v1179_v50, %v1178_v49  ;;  %425 = vst.msk [vmem:[#allocation3 + $0x18] sm:$0xff] %vm421_vm5, %v3752_v20  ;;  %v1534_v24 = vshll.u32 %v3557_v18, 16  ;;  %v3533_v33 = vld [vmem:[%s3848_s29 + $0x18] sm:$0xf] }
  0x45   : > { %3485 = vmatmul.msk.bf16.vlgmr.msrb.gmra.mxu1 %vm467_vm1, %v1182_v53  ;;  %v3454_v52 = vor.u32 %v3701_v47, %v3453_v46  ;;  %v1048_v53 = vld [vmem:[%s3925_s22 + $0x30] sm:$0xf]  ;;  %426 = vst.msk [vmem:[#allocation3 + $0x20] sm:$0xff] %vm421_vm5, %v3752_v20  ;;  %v1163_v39 = vsel %vm3867_vm4, %v1158_v30, %v1162_v25  ;;  %v1482_v46 = vrot.slane %v1481_v36, 4  ;;  %v1486_v47 = vrot.slane %v1484_v38, 5 }
  0x46   : > { %v1137_v57 = vshrl.u32 %v1048_v53, 16  ;;  %v1140_v58 = vshll.u32 %v1048_v53, 16  ;;  %427 = vst.msk [vmem:[#allocation3 + $0x28] sm:$0xff] %vm421_vm5, %v3752_v20  ;;  %v1181_v41 = vunpack.c.l.b16 %v1163_v39  ;;  %v3553_v49 = vld [vmem:[%s3842_s26 + $0x20] sm:$0xf]  ;;  %v1473_v50 = vsel %vm3867_vm4, %v1468_v43, %v1472_v44 }
  0x47   : > { %428 = vst.msk [vmem:[#allocation3 + $0x30] sm:$0xff] %vm421_vm5, %v3752_v20  ;;  %v1503_v55 = vshrl.u32 %v3553_v49, 16  ;;  %v1506_v56 = vshll.u32 %v3553_v49, 16  ;;  %v1519_v27 = vrot.slane %v1517_v19, 4  ;;  %v3558_v35 = vld [vmem:[%s3842_s26 + $0x34] sm:$0x1] }
  0x48   : > { %v1139_v62 = vrot.slane %v1137_v57, 4  ;;  %v1142_v63 = vrot.slane %v1140_v58, 5  ;;  %429 = vst.msk [vmem:[#allocation3 + $0x38] sm:$0xff] %vm421_vm5, %v3752_v20  ;;  %v3529_v57 = vld [vmem:[%s3848_s29 + $0x8] sm:$0xf]  ;;  %v1582_v58 = vunpack.c.l.b16 %v1473_v50  ;;  %v1520_v20 = vshll.u32 %v3555_v17, 16 }
  0x49   : > { %v1505_v1 = vrot.slane %v1503_v55, 4  ;;  %v1508_v2 = vrot.slane %v1506_v56, 5  ;;  %v438_v36 = vld [vmem:[#allocation3] sm:$0xff]  ;;  %v1540_v44 = vshll.u32 %v3558_v35, 16  ;;  %v3561_v55 = vld [vmem:[%s3842_s26 + $0x40] sm:$0xf] }
  0x4a   : > { %v1143_v3 = vor.u32 %v1142_v63, %v1139_v62  ;;  %v3711_v62 = vld [vmem:[%s3848_s29 + $0xc] sm:$0xf0]  ;;  %v1522_v28 = vrot.slane %v1520_v20, 5  ;;  %v439_v56 = vld [vmem:[#allocation3 + $0x8] sm:$0xff] }
  0x4b   : > { %v3530_v6 = vor.u32 %v3711_v62, %v3529_v57 }
  0x4c   : > { %v1144_v9 = vrot.slane %v1143_v3, 4  ;;  %v3552_v3 = vld [vmem:[%s3842_s26 + $0x1c] sm:$0x1]  ;;  %v1523_v39 = vor.u32 %v1522_v28, %v1519_v27  ;;  %v442_v35 = vld [vmem:[#allocation3 + $0x20] sm:$0xff] }
  0x51   : > { %3514 = vmatmul.msk.bf16.vlgmr.msrb.gmra.mxu2 %vm467_vm1, %v3501_v12  ;;  %v3706_v12 = vld [vmem:[%s3947_s30 + $0x34] sm:$0xf0] }
  0x52   : > { %v4026_v31 = vor.u32 %v3706_v12, %v3478_v11  ;;  %v1512_v11 = vshll.u32 %v3554_v4, 16 }
  0x53   : > { %3481 = vmatmul.msk.bf16.gmra.mxu0 %vm467_vm1, %v3978_v15 }
  0x54   : > { %3460 = vmatmul.msk.bf16.gmra.mxu3 %vm467_vm1, %v3450_v16  ;;  %v3508_v16 = vld [vmem:[%s3842_s26 + $0x28] sm:$0xf] }
  0x55   : > { %3486 = vmatmul.msk.bf16.gmra.mxu1 %vm467_vm1, %v1183_v23  ;;  %v1149_v23 = vsel %vm3867_vm4, %v1144_v9, %v1148_v10  ;;  %v3509_v32 = vor.u32 %v3709_v21, %v3508_v16  ;;  %v1498_v9 = vshll.u32 %v3552_v3, 16  ;;  %v1509_v10 = vor.u32 %v1508_v2, %v1505_v1 }
  0x56   : > { %v1180_v34 = vunpack.c.l.b16 %v1149_v23  ;;  %v1514_v16 = vrot.slane %v1512_v11, 5  ;;  %v1531_v23 = vshrl.u32 %v3557_v18, 16  ;;  %v1562_v1 = vshll.u32 %v3561_v55, 16 }
  0x57   : > { %v1500_v13 = vrot.slane %v1498_v9, 5  ;;  %v1510_v14 = vrot.slane %v1509_v10, 4  ;;  %v3713_v9 = vld [vmem:[%s3848_s29 + $0x2c] sm:$0xf0] }
  0x58   : > { %v1185_v42 = vpack.c.b16 %v1181_v41, %v1180_v34  ;;  %v1533_v30 = vrot.slane %v1531_v23, 4  ;;  %v3712_v34 = vld [vmem:[%s3848_s29 + $0x1c] sm:$0xf0]  ;;  %v1564_v11 = vrot.slane %v1562_v1, 5 }
  0x59   : > { %v1515_v22 = vsel %vm3867_vm4, %v1510_v14, %v1514_v16  ;;  %v3562_v14 = vld [vmem:[%s3842_s26 + $0x44] sm:$0x1] }
  0x5a   : > { %v1585_v26 = vunpack.c.l.b16 %v1515_v22 }
  0x61   : > { %3515 = vmatmul.msk.bf16.gmra.mxu2 %vm467_vm1, %v3505_v48  ;;  %v3551_v48 = vld [vmem:[%s3842_s26 + $0x18] sm:$0xf] }
  0x62   : > { %v1489_v53 = vshrl.u32 %v3551_v48, 16 }
  0x63   : > { %3482 = vmatmul.msk.bf16.gmra.mxu0 %vm467_vm1, %v3999_v51 }
  0x64   : > { %3461 = vmatmul.msk.bf16.gmra.mxu3 %vm467_vm1, %v3454_v52  ;;  %v1487_v52 = vsel %vm3867_vm4, %v1482_v46, %v1486_v47  ;;  %v1491_v63 = vrot.slane %v1489_v53, 4  ;;  %v3559_v53 = vld [vmem:[%s3842_s26 + $0x38] sm:$0xf] }
  0x65   : > { %3487 = vmatmul.msk.bf16.gmra.mxu1 %vm467_vm1, %v1184_v54  ;;  %v1492_v54 = vshll.u32 %v3551_v48, 16  ;;  %v1583_v59 = vunpack.c.l.b16 %v1487_v52  ;;  %v1524_v48 = vrot.slane %v1523_v39, 4  ;;  %v1542_v52 = vrot.slane %v1540_v44, 5 }
  0x66   : > { %v1548_v60 = vshll.u32 %v3559_v53, 16 }
  0x67   : > { %v1494_v0 = vrot.slane %v1492_v54, 5  ;;  %v1590_v7 = vpack.c.b16 %v1583_v59, %v1582_v58  ;;  %v440_v54 = vld [vmem:[#allocation3 + $0x10] sm:$0xff]  ;;  %v1545_v59 = vshrl.u32 %v3559_v53, 16  ;;  %v443_v53 = vld [vmem:[#allocation3 + $0x28] sm:$0xff] }
  0x69   : > { %v1495_v8 = vor.u32 %v1494_v0, %v1491_v63  ;;  %v1559_v0 = vshrl.u32 %v3561_v55, 16  ;;  %v3541_v55 = vld [vmem:[%s3848_s29 + $0x38] sm:$0xf] }
  0x6b   : > { %v1496_v12 = vrot.slane %v1495_v8, 4  ;;  %v3537_v8 = vld [vmem:[%s3848_s29 + $0x28] sm:$0xf]  ;;  %v1561_v10 = vrot.slane %v1559_v0, 4 }
  0x6c   : > { %v3538_v18 = vor.u32 %v3713_v9, %v3537_v8 }
  0x6d   : > { %v1501_v21 = vsel %vm3867_vm4, %v1496_v12, %v1500_v13  ;;  %v441_v12 = vld [vmem:[#allocation3 + $0x18] sm:$0xff]  ;;  %v3560_v13 = vld [vmem:[%s3842_s26 + $0x3c] sm:$0x1] }
  0x6e   : > { %v1584_v25 = vunpack.c.l.b16 %v1501_v21  ;;  %v1554_v23 = vshll.u32 %v3560_v13, 16 }
  0x70   : > { %v1591_v38 = vpack.c.b16 %v1585_v26, %v1584_v25  ;;  %v1568_v25 = vshll.u32 %v3562_v14, 16 }
  0x71   : > { %3516 = vmatmul.msk.bf16.gmra.mxu2 %vm467_vm1, %v3509_v32  ;;  %v1536_v32 = vrot.slane %v1534_v24, 5  ;;  %v1565_v24 = vor.u32 %v1564_v11, %v1561_v10 }
  0x73   : > { %3483 = vmatmul.msk.bf16.gmra.mxu0 %vm467_vm1, %v4026_v31  ;;  %v1537_v43 = vor.u32 %v1536_v32, %v1533_v30  ;;  %v1556_v32 = vrot.slane %v1554_v23, 5 }
  0x74   : > { %3462 = vmatmul.msk.bf16.gmra.mxu3 %vm467_vm1, %v3458_v40  ;;  %v1526_v40 = vshll.u32 %v3556_v29, 16 }
  0x75   : > { %3488 = vmatmul.msk.bf16.gmra.mxu1 %vm467_vm1, %v1185_v42  ;;  %v3534_v42 = vor.u32 %v3712_v34, %v3533_v33  ;;  %v1538_v50 = vrot.slane %v1537_v43, 4  ;;  %v1566_v33 = vrot.slane %v1565_v24, 4  ;;  %v1570_v34 = vrot.slane %v1568_v25, 5 }
  0x76   : > { %v1528_v49 = vrot.slane %v1526_v40, 5 }
  0x77   : > { %v1543_v63 = vsel %vm3867_vm4, %v1538_v50, %v1542_v52  ;;  %v1571_v43 = vsel %vm3867_vm4, %v1566_v33, %v1570_v34 }
  0x78   : > { %v1529_v58 = vsel %vm3867_vm4, %v1524_v48, %v1528_v49  ;;  %v1589_v50 = vunpack.c.l.b16 %v1571_v43 }
  0x79   : > { %v1586_v4 = vunpack.c.l.b16 %v1529_v58 }
  0x81   : > { %3517 = vmatmul.msk.bf16.gmra.mxu2 %vm467_vm1, %v3513_v5  ;;  %v1587_v5 = vunpack.c.l.b16 %v1543_v63 }
  0x83   : > { %3564 = vmatmul.msk.bf16.vlgmr.msra.gmra.mxu0 %vm467_vm1, %v1590_v7  ;;  %v1550_v7 = vrot.slane %v1548_v60, 5  ;;  %v1592_v19 = vpack.c.b16 %v1587_v5, %v1586_v4  ;;  %v444_v5 = vld [vmem:[#allocation3 + $0x30] sm:$0xff] }
  0x84   : > { %3543 = vmatmul.msk.bf16.vlgmr.msra.gmra.mxu3 %vm467_vm1, %v3530_v6  ;;  %v1547_v6 = vrot.slane %v1545_v59, 4 }
  0x86   : > { %v1551_v20 = vor.u32 %v1550_v7, %v1547_v6 }
  0x88   : > { %v1552_v30 = vrot.slane %v1551_v20, 4 }
  0x90   : > { %v493_v41 = vpop.f32.mrf.mxu0 }
  0x91   : > { %v513_v46 = vadd.f32 %v493_v41, %v438_v36 }
  0x92   : > { %v596_v47 = vpop.f32.mrf.mxu1 }
  0x93   : > { %521 = vst.msk [vmem:[#allocation3] sm:$0xff] %vm421_vm5, %v513_v46  ;;  %3565 = vmatmul.msk.bf16.gmra.mxu0 %vm467_vm1, %v1591_v38 }
  0x94   : > { %3544 = vmatmul.msk.bf16.gmra.mxu3 %vm467_vm1, %v3534_v42  ;;  %v1557_v42 = vsel %vm3867_vm4, %v1552_v30, %v1556_v32 }
  0x95   : > { %v1588_v49 = vunpack.c.l.b16 %v1557_v42 }
  0x97   : > { %v498_v57 = vpop.f32.mrf.mxu3  ;;  %v1593_v60 = vpack.c.b16 %v1589_v50, %v1588_v49 }
  0x98   : > { %v515_v61 = vadd.f32 %v498_v57, %v440_v54  ;;  %v495_v62 = vpop.f32.mrf.mxu0 }
  0x99   : > { %v514_v2 = vadd.f32 %v495_v62, %v439_v56  ;;  %v3714_v56 = vld [vmem:[%s3848_s29 + $0x3c] sm:$0xf0] }
  0x9a   : > { %523 = vst.msk [vmem:[#allocation3 + $0x10] sm:$0xff] %vm421_vm5, %v515_v61  ;;  %v598_v3 = vpop.f32.mrf.mxu1  ;;  %v537_v16 = vld [vmem:[#allocation3] sm:$0xff]  ;;  %v3542_v63 = vor.u32 %v3714_v56, %v3541_v55 }
  0x9b   : > { %522 = vst.msk [vmem:[#allocation3 + $0x8] sm:$0xff] %vm421_vm5, %v514_v2 }
  0x9f   : > { %v500_v17 = vpop.f32.mrf.mxu3 }
  0xa0   : > { %v516_v21 = vadd.f32 %v500_v17, %v441_v12  ;;  %v591_v22 = vpop.f32.mrf.mxu0 }
  0xa1   : > { %v611_v26 = vadd.f32 %v591_v22, %v537_v16  ;;  %v539_v27 = vld [vmem:[#allocation3 + $0x10] sm:$0xff] }
  0xa2   : > { %524 = vst.msk [vmem:[#allocation3 + $0x18] sm:$0xff] %vm421_vm5, %v516_v21  ;;  %v613_v28 = vadd.f32 %v596_v47, %v539_v27  ;;  %v601_v29 = vpop.f32.mrf.mxu1  ;;  %v538_v38 = vld [vmem:[#allocation3 + $0x8] sm:$0xff] }
  0xa3   : > { %619 = vst.msk [vmem:[#allocation3] sm:$0xff] %vm421_vm5, %v611_v26  ;;  %3566 = vmatmul.msk.bf16.gmra.mxu0 %vm467_vm1, %v1592_v19 }
  0xa4   : > { %621 = vst.msk [vmem:[#allocation3 + $0x10] sm:$0xff] %vm421_vm5, %v613_v28  ;;  %3545 = vmatmul.msk.bf16.gmra.mxu3 %vm467_vm1, %v3538_v18  ;;  %v809_v36 = vpop.f32.mrf.mxu2  ;;  %v445_v18 = vld [vmem:[#allocation3 + $0x38] sm:$0xff] }
  0xa7   : > { %v503_v39 = vpop.f32.mrf.mxu3 }
  0xa8   : > { %v517_v40 = vadd.f32 %v503_v39, %v442_v35  ;;  %v593_v41 = vpop.f32.mrf.mxu0 }
  0xa9   : > { %v612_v44 = vadd.f32 %v593_v41, %v538_v38  ;;  %v540_v46 = vld [vmem:[#allocation3 + $0x18] sm:$0xff] }
  0xaa   : > { %525 = vst.msk [vmem:[#allocation3 + $0x20] sm:$0xff] %vm421_vm5, %v517_v40  ;;  %v614_v47 = vadd.f32 %v598_v3, %v540_v46  ;;  %v758_v57 = vld [vmem:[#allocation3] sm:$0xff]  ;;  %v603_v58 = vpop.f32.mrf.mxu1 }
  0xab   : > { %620 = vst.msk [vmem:[#allocation3 + $0x8] sm:$0xff] %vm421_vm5, %v612_v44  ;;  %v760_v48 = vld [vmem:[#allocation3 + $0x10] sm:$0xff] }
  0xac   : > { %622 = vst.msk [vmem:[#allocation3 + $0x18] sm:$0xff] %vm421_vm5, %v614_v47  ;;  %v826_v52 = vadd.f32 %v809_v36, %v760_v48  ;;  %v811_v54 = vpop.f32.mrf.mxu2 }
  0xae   : > { %834 = vst.msk [vmem:[#allocation3 + $0x10] sm:$0xff] %vm421_vm5, %v826_v52  ;;  %v1847_v52 = vld [vmem:[%s4595_s8] sm:$0x3] }
  0xaf   : > { %v505_v59 = vpop.f32.mrf.mxu3 }
  0xb0   : > { %v518_v61 = vadd.f32 %v505_v59, %v443_v53  ;;  %v804_v62 = vpop.f32.mrf.mxu0 }
  0xb1   : > { %v541_v0 = vld [vmem:[#allocation3 + $0x20] sm:$0xff]  ;;  %v824_v1 = vadd.f32 %v804_v62, %v758_v57 }
  0xb2   : > { %526 = vst.msk [vmem:[#allocation3 + $0x28] sm:$0xff] %vm421_vm5, %v518_v61  ;;  %v615_v2 = vadd.f32 %v601_v29, %v541_v0  ;;  %v759_v9 = vld [vmem:[#allocation3 + $0x8] sm:$0xff]  ;;  %v606_v11 = vpop.f32.mrf.mxu1 }
  0xb3   : > { %832 = vst.msk [vmem:[#allocation3] sm:$0xff] %vm421_vm5, %v824_v1  ;;  %v761_v3 = vld [vmem:[#allocation3 + $0x18] sm:$0xff]  ;;  %3567 = vmatmul.msk.bf16.gmra.mxu0 %vm467_vm1, %v1593_v60 }
  0xb4   : > { %623 = vst.msk [vmem:[#allocation3 + $0x20] sm:$0xff] %vm421_vm5, %v615_v2  ;;  %v827_v4 = vadd.f32 %v811_v54, %v761_v3  ;;  %3546 = vmatmul.msk.bf16.gmra.mxu3 %vm467_vm1, %v3542_v63  ;;  %v814_v6 = vpop.f32.mrf.mxu2  ;;  %v1853_v54 = vsel %vm480_vm0, %v1847_v52, 0  ;;  %v1920_v63 = vld [vmem:[%s4593_s6] sm:$0xf] }
  0xb5   : > { %1862 = vmatpush.bf16.msra.mxu1 %v1853_v54  ;;  %v850_v55 = vld [vmem:[#allocation3 + $0x10] sm:$0xff]  ;;  %v1955_v0 = vsel %vm1953_vm6, %v1920_v63, 0 }
  0xb6   : > { %835 = vst.msk [vmem:[#allocation3 + $0x18] sm:$0xff] %vm421_vm5, %v827_v4  ;;  %1964 = vmatpush.bf16.msra.mxu2 %v1955_v0 }
  0xb7   : > { %v508_v7 = vpop.f32.mrf.mxu3 }
  0xb8   : > { %v519_v8 = vadd.f32 %v508_v7, %v444_v5  ;;  %v806_v10 = vpop.f32.mrf.mxu0  ;;  %3568 = vmatmul.msk.bf16.vlgmr.msra.gmra.mxu1 %vm467_vm1, %v3957_v45 }
  0xb9   : > { %v542_v12 = vld [vmem:[#allocation3 + $0x28] sm:$0xff]  ;;  %v825_v13 = vadd.f32 %v806_v10, %v759_v9 }
  0xba   : > { %527 = vst.msk [vmem:[#allocation3 + $0x30] sm:$0xff] %vm421_vm5, %v519_v8  ;;  %v616_v14 = vadd.f32 %v603_v58, %v542_v12  ;;  %v608_v25 = vpop.f32.mrf.mxu1  ;;  %v848_v29 = vld [vmem:[#allocation3] sm:$0xff] }
  0xbb   : > { %833 = vst.msk [vmem:[#allocation3 + $0x8] sm:$0xff] %vm421_vm5, %v825_v13  ;;  %v762_v16 = vld [vmem:[#allocation3 + $0x20] sm:$0xff] }
  0xbc   : > { %624 = vst.msk [vmem:[#allocation3 + $0x28] sm:$0xff] %vm421_vm5, %v616_v14  ;;  %v828_v17 = vadd.f32 %v814_v6, %v762_v16  ;;  %v816_v19 = vpop.f32.mrf.mxu2 }
  0xbd   : > { %v851_v2 = vld [vmem:[#allocation3 + $0x18] sm:$0xff] }
  0xbe   : > { %836 = vst.msk [vmem:[#allocation3 + $0x20] sm:$0xff] %vm421_vm5, %v828_v17 }
  0xbf   : > { %v510_v20 = vpop.f32.mrf.mxu3 }
  0xc0   : > { %v520_v21 = vadd.f32 %v510_v20, %v445_v18  ;;  %v1000_v22 = vpop.f32.mrf.mxu0 }
  0xc1   : > { %v543_v23 = vld [vmem:[#allocation3 + $0x30] sm:$0xff] }
  0xc2   : > { %528 = vst.msk [vmem:[#allocation3 + $0x38] sm:$0xff] %vm421_vm5, %v520_v21  ;;  %v617_v24 = vadd.f32 %v606_v11, %v543_v23  ;;  %v1210_v36 = vpop.f32.mrf.mxu1  ;;  %v849_v41 = vld [vmem:[#allocation3 + $0x8] sm:$0xff] }
  0xc3   : > { %v763_v26 = vld [vmem:[#allocation3 + $0x28] sm:$0xff] }
  0xc4   : > { %625 = vst.msk [vmem:[#allocation3 + $0x30] sm:$0xff] %vm421_vm5, %v617_v24  ;;  %v829_v27 = vadd.f32 %v816_v19, %v763_v26  ;;  %v819_v28 = vpop.f32.mrf.mxu2 }
  0xc5   : > { %v852_v12 = vld [vmem:[#allocation3 + $0x20] sm:$0xff] }
  0xc6   : > { %837 = vst.msk [vmem:[#allocation3 + $0x28] sm:$0xff] %vm421_vm5, %v829_v27 }
  0xc7   : > { %v902_v30 = vpop.f32.mrf.mxu3 }
  0xc8   : > { %v922_v32 = vadd.f32 %v902_v30, %v848_v29  ;;  %v1002_v33 = vpop.f32.mrf.mxu0  ;;  %3569 = vmatmul.msk.bf16.gmra.mxu1 %vm467_vm1, %v3978_v15 }
  0xc9   : > { %v544_v34 = vld [vmem:[#allocation3 + $0x38] sm:$0xff] }
  0xca   : > { %930 = vst.msk [vmem:[#allocation3] sm:$0xff] %vm421_vm5, %v922_v32  ;;  %v618_v35 = vadd.f32 %v608_v25, %v544_v34  ;;  %v1212_v50 = vpop.f32.mrf.mxu1 }
  0xcb   : > { %v764_v38 = vld [vmem:[#allocation3 + $0x30] sm:$0xff] }
  0xcc   : > { %626 = vst.msk [vmem:[#allocation3 + $0x38] sm:$0xff] %vm421_vm5, %v618_v35  ;;  %v830_v39 = vadd.f32 %v819_v28, %v764_v38  ;;  %v821_v40 = vpop.f32.mrf.mxu2 }
  0xcd   : > { %v853_v25 = vld [vmem:[#allocation3 + $0x28] sm:$0xff] }
  0xce   : > { %838 = vst.msk [vmem:[#allocation3 + $0x30] sm:$0xff] %vm421_vm5, %v830_v39 }
  0xcf   : > { %v904_v42 = vpop.f32.mrf.mxu3 }
  0xd0   : > { %v923_v43 = vadd.f32 %v904_v42, %v849_v41  ;;  %v1005_v44 = vpop.f32.mrf.mxu0 }
  0xd1   : > { %v946_v46 = vld [vmem:[#allocation3] sm:$0xff] }
  0xd2   : > { %v1020_v47 = vadd.f32 %v1000_v22, %v946_v46  ;;  %931 = vst.msk [vmem:[#allocation3 + $0x8] sm:$0xff] %vm421_vm5, %v923_v43  ;;  %v1215_v1 = vpop.f32.mrf.mxu1 }
  0xd3   : > { %v765_v48 = vld [vmem:[#allocation3 + $0x38] sm:$0xff] }
  0xd4   : > { %1028 = vst.msk [vmem:[#allocation3] sm:$0xff] %vm421_vm5, %v1020_v47  ;;  %v831_v49 = vadd.f32 %v821_v40, %v765_v48  ;;  %v1309_v53 = vpop.f32.mrf.mxu2 }
  0xd5   : > { %v854_v38 = vld [vmem:[#allocation3 + $0x30] sm:$0xff] }
  0xd6   : > { %839 = vst.msk [vmem:[#allocation3 + $0x38] sm:$0xff] %vm421_vm5, %v831_v49 }
  0xd7   : > { %v907_v56 = vpop.f32.mrf.mxu3 }
  0xd8   : > { %v924_v57 = vadd.f32 %v907_v56, %v850_v55  ;;  %v1007_v58 = vpop.f32.mrf.mxu0  ;;  %3570 = vmatmul.msk.bf16.gmra.mxu1 %vm467_vm1, %v3999_v51  ;;  %v3753_v55 = vmov 0  }
  0xd9   : > { %v947_v59 = vld [vmem:[#allocation3 + $0x8] sm:$0xff]  ;;  %1695 = vst.msk [vmem:[#allocation2 + $0xc] sm:$0x1] %vm1692_vm7, %v3753_v55 }
  0xda   : > { %v1021_v60 = vadd.f32 %v1002_v33, %v947_v59  ;;  %932 = vst.msk [vmem:[#allocation3 + $0x10] sm:$0xff] %vm421_vm5, %v924_v57  ;;  %v1217_v17 = vpop.f32.mrf.mxu1 }
  0xdb   : > { %v1164_v61 = vld [vmem:[#allocation3] sm:$0xff]  ;;  %1693 = vst.msk [vmem:[#allocation2 + $0x4] sm:$0x1] %vm1692_vm7, %v3753_v55 }
  0xdc   : > { %1029 = vst.msk [vmem:[#allocation3 + $0x8] sm:$0xff] %vm421_vm5, %v1021_v60  ;;  %v1230_v62 = vadd.f32 %v1210_v36, %v1164_v61  ;;  %v1311_v3 = vpop.f32.mrf.mxu2 }
  0xdd   : > { %v855_v52 = vld [vmem:[#allocation3 + $0x38] sm:$0xff]  ;;  %1697 = vst.msk [vmem:[#allocation2 + $0x14] sm:$0x1] %vm1692_vm7, %v3753_v55 }
  0xde   : > { %1238 = vst.msk [vmem:[#allocation3] sm:$0xff] %vm421_vm5, %v1230_v62 }
  0xdf   : > { %v909_v45 = vpop.f32.mrf.mxu3  ;;  %1699 = vst.msk [vmem:[#allocation2 + $0x1c] sm:$0x1] %vm1692_vm7, %v3753_v55 }
  0xe0   : > { %v925_v4 = vadd.f32 %v909_v45, %v851_v2  ;;  %v1010_v5 = vpop.f32.mrf.mxu0  ;;  %1701 = vst.msk [vmem:[#allocation2 + $0x24] sm:$0x1] %vm1692_vm7, %v3753_v55 }
  0xe1   : > { %v948_v6 = vld [vmem:[#allocation3 + $0x10] sm:$0xff]  ;;  %1703 = vst.msk [vmem:[#allocation2 + $0x2c] sm:$0x1] %vm1692_vm7, %v3753_v55 }
  0xe2   : > { %v1022_v7 = vadd.f32 %v1005_v44, %v948_v6  ;;  %933 = vst.msk [vmem:[#allocation3 + $0x18] sm:$0xff] %vm421_vm5, %v925_v4  ;;  %v1220_v15 = vpop.f32.mrf.mxu1 }
  0xe3   : > { %v1165_v8 = vld [vmem:[#allocation3 + $0x8] sm:$0xff]  ;;  %1705 = vst.msk [vmem:[#allocation2 + $0x34] sm:$0x1] %vm1692_vm7, %v3753_v55 }
  0xe4   : > { %1030 = vst.msk [vmem:[#allocation3 + $0x10] sm:$0xff] %vm421_vm5, %v1022_v7  ;;  %v1231_v9 = vadd.f32 %v1212_v50, %v1165_v8  ;;  %v1314_v19 = vpop.f32.mrf.mxu2 }
  0xe5   : > { %v1255_v10 = vld [vmem:[#allocation3] sm:$0xff]  ;;  %1707 = vst.msk [vmem:[#allocation2 + $0x3c] sm:$0x1] %vm1692_vm7, %v3753_v55 }
  0xe6   : > { %1239 = vst.msk [vmem:[#allocation3 + $0x8] sm:$0xff] %vm421_vm5, %v1231_v9  ;;  %v1329_v11 = vadd.f32 %v1309_v53, %v1255_v10 }
  0xe7   : > { %v912_v13 = vpop.f32.mrf.mxu3  ;;  %1709 = vst.msk [vmem:[#allocation2 + $0x44] sm:$0x1] %vm1692_vm7, %v3753_v55 }
  0xe8   : > { %1337 = vst.msk [vmem:[#allocation3] sm:$0xff] %vm421_vm5, %v1329_v11  ;;  %v926_v14 = vadd.f32 %v912_v13, %v852_v12  ;;  %v1012_v16 = vpop.f32.mrf.mxu0  ;;  %3571 = vmatmul.msk.bf16.gmra.mxu1 %vm467_vm1, %v4026_v31 }
  0xe9   : > { %v949_v18 = vld [vmem:[#allocation3 + $0x18] sm:$0xff]  ;;  %1711 = vst.msk [vmem:[#allocation2 + $0x4c] sm:$0x1] %vm1692_vm7, %v3753_v55 }
  0xea   : > { %v1023_v20 = vadd.f32 %v1007_v58, %v949_v18  ;;  %934 = vst.msk [vmem:[#allocation3 + $0x20] sm:$0xff] %vm421_vm5, %v926_v14  ;;  %v1222_v47 = vpop.f32.mrf.mxu1 }
  0xeb   : > { %v1166_v21 = vld [vmem:[#allocation3 + $0x10] sm:$0xff]  ;;  %1691 = vst.msk [vmem:[#allocation2] sm:$0xf] %vm1690_vm8, %v3753_v55 }
  0xec   : > { %1031 = vst.msk [vmem:[#allocation3 + $0x18] sm:$0xff] %vm421_vm5, %v1023_v20  ;;  %v1232_v22 = vadd.f32 %v1215_v1, %v1166_v21  ;;  %v1316_v33 = vpop.f32.mrf.mxu2  ;;  %v3605_v20 = vld [vmem:[%s4593_s6 + $0x8] sm:$0xf] }
  0xed   : > { %v1256_v23 = vld [vmem:[#allocation3 + $0x8] sm:$0xff]  ;;  %1694 = vst.msk [vmem:[#allocation2 + $0x8] sm:$0xf] %vm1690_vm8, %v3753_v55 }
  0xee   : > { %1240 = vst.msk [vmem:[#allocation3 + $0x10] sm:$0xff] %vm421_vm5, %v1232_v22  ;;  %v1330_v24 = vadd.f32 %v1311_v3, %v1256_v23 }
  0xef   : > { %v914_v26 = vpop.f32.mrf.mxu3  ;;  %v1354_v63 = vld [vmem:[#allocation3] sm:$0xff]  ;;  %1696 = vst.msk [vmem:[#allocation2 + $0x10] sm:$0xf] %vm1690_vm8, %v3753_v55 }
  0xf0   : > { %1338 = vst.msk [vmem:[#allocation3 + $0x8] sm:$0xff] %vm421_vm5, %v1330_v24  ;;  %v927_v27 = vadd.f32 %v914_v26, %v853_v25  ;;  %v1015_v28 = vpop.f32.mrf.mxu0  ;;  %v2314_v24 = vsel %vm1953_vm6, %v3605_v20, 0  ;;  %v4194_v25 = vld [vmem:[%s4592_s5] ss:$0 sm:$0xff] }
  0xf1   : > { %v950_v29 = vld [vmem:[#allocation3 + $0x20] sm:$0xff]  ;;  %2323 = vmatpush.bf16.msrb.mxu0 %v2314_v24  ;;  %1698 = vst.msk [vmem:[#allocation2 + $0x18] sm:$0xf] %vm1690_vm8, %v3753_v55 }
  0xf2   : > { %v1024_v30 = vadd.f32 %v1010_v5, %v950_v29  ;;  %935 = vst.msk [vmem:[#allocation3 + $0x28] sm:$0xff] %vm421_vm5, %v927_v27  ;;  %v1225_v62 = vpop.f32.mrf.mxu1  ;;  %v3610_v29 = vld [vmem:[%s4593_s6 + $0xc] sm:$0xf] }
  0xf3   : > { %v1167_v32 = vld [vmem:[#allocation3 + $0x18] sm:$0xff]  ;;  %1700 = vst.msk [vmem:[#allocation2 + $0x20] sm:$0xf] %vm1690_vm8, %v3753_v55 }
  0xf4   : > { %1032 = vst.msk [vmem:[#allocation3 + $0x20] sm:$0xff] %vm421_vm5, %v1024_v30  ;;  %v1233_v34 = vadd.f32 %v1217_v17, %v1167_v32  ;;  %v1319_v49 = vpop.f32.mrf.mxu2 }
  0xf5   : > { %v1257_v35 = vld [vmem:[#allocation3 + $0x10] sm:$0xff]  ;;  %1702 = vst.msk [vmem:[#allocation2 + $0x28] sm:$0xf] %vm1690_vm8, %v3753_v55 }
  0xf6   : > { %1241 = vst.msk [vmem:[#allocation3 + $0x18] sm:$0xff] %vm421_vm5, %v1233_v34  ;;  %v1331_v36 = vadd.f32 %v1314_v19, %v1257_v35 }
  0xf7   : > { %v917_v39 = vpop.f32.mrf.mxu3  ;;  %v1355_v31 = vld [vmem:[#allocation3 + $0x8] sm:$0xff]  ;;  %1704 = vst.msk [vmem:[#allocation2 + $0x30] sm:$0xf] %vm1690_vm8, %v3753_v55 }
  0xf8   : > { %1339 = vst.msk [vmem:[#allocation3 + $0x10] sm:$0xff] %vm421_vm5, %v1331_v36  ;;  %v928_v40 = vadd.f32 %v917_v39, %v854_v38  ;;  %v1017_v42 = vpop.f32.mrf.mxu0 }
  0xf9   : > { %v951_v41 = vld [vmem:[#allocation3 + $0x28] sm:$0xff]  ;;  %1706 = vst.msk [vmem:[#allocation2 + $0x38] sm:$0xf] %vm1690_vm8, %v3753_v55 }
  0xfa   : > { %v1025_v43 = vadd.f32 %v1012_v16, %v951_v41  ;;  %936 = vst.msk [vmem:[#allocation3 + $0x30] sm:$0xff] %vm421_vm5, %v928_v40  ;;  %v1227_v12 = vpop.f32.mrf.mxu1  ;;  %v3592_v16 = vld [vmem:[%s4593_s6 + $0x4] sm:$0xf] }
  0xfb   : > { %v1168_v44 = vld [vmem:[#allocation3 + $0x20] sm:$0xff]  ;;  %v2165_v18 = vsel %vm1953_vm6, %v3592_v16, 0  ;;  %1708 = vst.msk [vmem:[#allocation2 + $0x40] sm:$0xf] %vm1690_vm8, %v3753_v55  ;;  %v2003_v16 = vld [vmem:[#allocation2 + $0x4] sm:$0x1] }
  0xfc   : > { %1033 = vst.msk [vmem:[#allocation3 + $0x28] sm:$0xff] %vm421_vm5, %v1025_v43  ;;  %v1234_v46 = vadd.f32 %v1220_v15, %v1168_v44  ;;  %v1321_v1 = vpop.f32.mrf.mxu2  ;;  %2174 = vmatpush.bf16.msrb.mxu3 %v2165_v18  ;;  %v2412_v15 = vsel %vm1953_vm6, %v3610_v29, 0 }
  0xfd   : > { %v1258_v48 = vld [vmem:[#allocation3 + $0x18] sm:$0xff]  ;;  %2421 = vmatpush.bf16.msrb.mxu1 %v2412_v15  ;;  %1710 = vst.msk [vmem:[#allocation2 + $0x48] sm:$0xf] %vm1690_vm8, %v3753_v55 }
  0xfe   : > { %1242 = vst.msk [vmem:[#allocation3 + $0x20] sm:$0xff] %vm421_vm5, %v1234_v46  ;;  %v1332_v50 = vadd.f32 %v1316_v33, %v1258_v48 }
  0xff   : > { %v919_v53 = vpop.f32.mrf.mxu3  ;;  %v1356_v21 = vld [vmem:[#allocation3 + $0x10] sm:$0xff] }
 0x100   : > { %1340 = vst.msk [vmem:[#allocation3 + $0x18] sm:$0xff] %vm421_vm5, %v1332_v50  ;;  %v929_v54 = vadd.f32 %v919_v53, %v855_v52  ;;  %v1618_v58 = vpop.f32.mrf.mxu0 }
 0x101   : > { %v952_v51 = vld [vmem:[#allocation3 + $0x30] sm:$0xff] }
 0x102   : > { %v1026_v56 = vadd.f32 %v1015_v28, %v952_v51  ;;  %937 = vst.msk [vmem:[#allocation3 + $0x38] sm:$0xff] %vm421_vm5, %v929_v54  ;;  %v1802_v54 = vld [vmem:[#allocation2 + $0xc] sm:$0x1] }
 0x103   : > { %v1169_v57 = vld [vmem:[#allocation3 + $0x28] sm:$0xff] }
 0x104   : > { %1034 = vst.msk [vmem:[#allocation3 + $0x30] sm:$0xff] %vm421_vm5, %v1026_v56  ;;  %v1235_v59 = vadd.f32 %v1222_v47, %v1169_v57  ;;  %v1324_v13 = vpop.f32.mrf.mxu2  ;;  %v1796_v57 = vld [vmem:[#allocation2 + $0x8] sm:$0xf] }
 0x105   : > { %v1259_v60 = vld [vmem:[#allocation3 + $0x20] sm:$0xff] }
 0x106   : > { %1243 = vst.msk [vmem:[#allocation3 + $0x28] sm:$0xff] %vm421_vm5, %v1235_v59  ;;  %v1333_v61 = vadd.f32 %v1319_v49, %v1259_v60  ;;  %v2002_v60 = vld [vmem:[#allocation2] sm:$0xf] }
 0x107   : > { %v1408_v0 = vpop.f32.mrf.mxu3  ;;  %v1357_v40 = vld [vmem:[#allocation3 + $0x18] sm:$0xff] }
 0x108   : > { %1341 = vst.msk [vmem:[#allocation3 + $0x20] sm:$0xff] %vm421_vm5, %v1333_v61  ;;  %v1428_v2 = vadd.f32 %v1408_v0, %v1354_v63  ;;  %v1620_v7 = vpop.f32.mrf.mxu0 }
 0x109   : > { %v953_v45 = vld [vmem:[#allocation3 + $0x38] sm:$0xff] }
 0x10a   : > { %v1027_v3 = vadd.f32 %v1017_v42, %v953_v45  ;;  %1436 = vst.msk [vmem:[#allocation3] sm:$0xff] %vm421_vm5, %v1428_v2  ;;  %v2212_v45 = vld [vmem:[#allocation2] sm:$0xe] }
 0x10b   : > { %v1170_v4 = vld [vmem:[#allocation3 + $0x30] sm:$0xff] }
 0x10c   : > { %1035 = vst.msk [vmem:[#allocation3 + $0x38] sm:$0xff] %vm421_vm5, %v1027_v3  ;;  %v1236_v5 = vadd.f32 %v1225_v62, %v1170_v4  ;;  %v1326_v34 = vpop.f32.mrf.mxu2  ;;  %v2213_v3 = vld [vmem:[#allocation2 + $0x4] sm:$0x1] }
 0x10d   : > { %v1260_v6 = vld [vmem:[#allocation3 + $0x28] sm:$0xff] }
 0x10e   : > { %v1334_v8 = vadd.f32 %v1321_v1, %v1260_v6  ;;  %1244 = vst.msk [vmem:[#allocation3 + $0x30] sm:$0xff] %vm421_vm5, %v1236_v5  ;;  %v2019_v6 = vshrl.u32 %v2002_v60, 16 }
 0x10f   : > { %v1410_v9 = vpop.f32.mrf.mxu3  ;;  %v1358_v62 = vld [vmem:[#allocation3 + $0x20] sm:$0xff] }
 0x110   : > { %v1429_v10 = vadd.f32 %v1410_v9, %v1355_v31  ;;  %1342 = vst.msk [vmem:[#allocation3 + $0x28] sm:$0xff] %vm421_vm5, %v1334_v8  ;;  %v1623_v23 = vpop.f32.mrf.mxu0 }
 0x111   : > { %v1572_v11 = vld [vmem:[#allocation3] sm:$0xff] }
 0x112   : > { %v1638_v14 = vadd.f32 %v1618_v58, %v1572_v11  ;;  %1437 = vst.msk [vmem:[#allocation3 + $0x8] sm:$0xff] %vm421_vm5, %v1429_v10  ;;  %v3597_v11 = vrot.slane %v2212_v45, 9 }
 0x113   : > { %v1171_v17 = vld [vmem:[#allocation3 + $0x38] sm:$0xff] }
 0x114   : > { %1646 = vst.msk [vmem:[#allocation3] sm:$0xff] %vm421_vm5, %v1638_v14  ;;  %v1237_v19 = vadd.f32 %v1227_v12, %v1171_v17  ;;  %v2249_v12 = vrot.slane %v2213_v3, 5  ;;  %v2021_v17 = vrot.slane %v2019_v6, 4 }
 0x115   : > { %v1261_v26 = vld [vmem:[#allocation3 + $0x30] sm:$0xff] }
 0x116   : > { %1245 = vst.msk [vmem:[#allocation3 + $0x38] sm:$0xff] %vm421_vm5, %v1237_v19  ;;  %v1335_v28 = vadd.f32 %v1324_v13, %v1261_v26  ;;  %v1808_v19 = vld [vmem:[#allocation2 + $0x14] sm:$0x1] }
 0x117   : > { %v1413_v22 = vpop.f32.mrf.mxu3  ;;  %v1359_v24 = vld [vmem:[#allocation3 + $0x28] sm:$0xff] }
 0x118   : > { %v1430_v27 = vadd.f32 %v1413_v22, %v1356_v21  ;;  %1343 = vst.msk [vmem:[#allocation3 + $0x30] sm:$0xff] %vm421_vm5, %v1335_v28  ;;  %v1625_v46 = vpop.f32.mrf.mxu0 }
 0x119   : > { %v1573_v30 = vld [vmem:[#allocation3 + $0x8] sm:$0xff] }
 0x11a   : > { %1438 = vst.msk [vmem:[#allocation3 + $0x10] sm:$0xff] %vm421_vm5, %v1430_v27  ;;  %v1639_v33 = vadd.f32 %v1620_v7, %v1573_v30  ;;  %v2022_v7 = vshll.u32 %v2002_v60, 16  ;;  %v1805_v27 = vld [vmem:[#allocation2 + $0x10] sm:$0xf]  ;;  %v3574_v30 = vld [vmem:[#allocation2] sm:$0xf] }
 0x11b   : > { %v1654_v32 = vld [vmem:[#allocation3] sm:$0xff] }
 0x11c   : > { %v1666_v35 = vadd.f32 %v4194_v25, %v1654_v32  ;;  %1647 = vst.msk [vmem:[#allocation3 + $0x8] sm:$0xff] %vm421_vm5, %v1639_v33  ;;  %v2024_v18 = vrot.slane %v2022_v7, 5  ;;  %v2028_v32 = vshll.u32 %v2003_v16, 16 }
 0x11d   : > { %v1262_v36 = vld [vmem:[#allocation3 + $0x38] sm:$0xff] }
 0x11e   : > { %v1674_v38 = vmax.f32 %v1666_v35, 0.0  ;;  %v1336_v39 = vadd.f32 %v1326_v34, %v1262_v36  ;;  %v2250_v35 = vsel %vm4241_vm15, %v3597_v11, %v2249_v12 }
 0x11f   : > { %v1415_v41 = vpop.f32.mrf.mxu3  ;;  %v2289_v60 = vunpack.c.l.b16 %v2250_v35  ;;  %v1360_v3 = vld [vmem:[#allocation3 + $0x30] sm:$0xff] }
 0x120   : > { %v1682_v42 = vpack.c.bf16 %v1674_v38, %v1674_v38  ;;  %1344 = vst.msk [vmem:[#allocation3 + $0x38] sm:$0xff] %vm421_vm5, %v1336_v39  ;;  %v1431_v43 = vadd.f32 %v1415_v41, %v1357_v40  ;;  %v1628_v9 = vpop.f32.mrf.mxu0  ;;  %v2025_v38 = vor.u32 %v2024_v18, %v2021_v17 }
 0x121   : > { %v1574_v44 = vld [vmem:[#allocation3 + $0x10] sm:$0xff] }
 0x122   : > { %v1713_v47 = vshrl.u32 %v1682_v42, 16  ;;  %v1640_v48 = vadd.f32 %v1623_v23, %v1574_v44  ;;  %1439 = vst.msk [vmem:[#allocation3 + $0x18] sm:$0xff] %vm421_vm5, %v1431_v43  ;;  %v1716_v50 = vshll.u32 %v1682_v42, 16  ;;  %v1814_v44 = vld [vmem:[#allocation2 + $0x1c] sm:$0x1] }
 0x123   : > { %v1655_v53 = vld [vmem:[#allocation3 + $0x8] sm:$0xff] }
 0x124   : > { %v1715_v49 = vrot.slane %v1713_v47, 7  ;;  %1648 = vst.msk [vmem:[#allocation3 + $0x10] sm:$0xff] %vm421_vm5, %v1640_v48  ;;  %v1667_v51 = vadd.f32 %v4194_v25, %v1655_v53  ;;  %v3631_v48 = vld [vmem:[%s4593_s6 + $0x10] sm:$0xf] }
 0x126   : > { %v1718_v58 = vor.u32 %v1716_v50, %v1715_v49  ;;  %v1719_v59 = vrot.slane %v1715_v49, 4  ;;  %v1675_v61 = vmax.f32 %v1667_v51, 0.0  ;;  %v1811_v50 = vld [vmem:[#allocation2 + $0x18] sm:$0xf]  ;;  %v2622_v51 = vsel %vm1953_vm6, %v3631_v48, 0 }
 0x127   : > { %v1418_v63 = vpop.f32.mrf.mxu3  ;;  %2631 = vmatpush.bf16.msrb.mxu2 %v2622_v51 }
 0x128   : > { %v1803_v0 = vsel %vm4219_vm11, %v1719_v59, %v1802_v54  ;;  %v1432_v1 = vadd.f32 %v1418_v63, %v1358_v62  ;;  %v1797_v2 = vsel %vm4226_vm12, %v1718_v58, %v1796_v57  ;;  %v1683_v4 = vpack.c.bf16 %v1675_v61, %v1675_v61  ;;  %v1630_v59 = vpop.f32.mrf.mxu0 }
 0x129   : > { %1804 = vst [vmem:[#allocation2 + $0xc] sm:$0x1] %v1803_v0  ;;  %v1575_v5 = vld [vmem:[#allocation3 + $0x18] sm:$0xff]  ;;  %v2026_v62 = vrot.slane %v2025_v38, 4  ;;  %v2030_v63 = vrot.slane %v2028_v32, 5 }
 0x12a   : > { %v1641_v8 = vadd.f32 %v1625_v46, %v1575_v5  ;;  %1440 = vst.msk [vmem:[#allocation3 + $0x20] sm:$0xff] %vm421_vm5, %v1432_v1  ;;  %v1721_v55 = vshrl.u32 %v1683_v4, 16  ;;  %v1724_v14 = vshll.u32 %v1683_v4, 16 }
 0x12b   : > { %v1656_v31 = vld [vmem:[#allocation3 + $0x10] sm:$0xff]  ;;  %1798 = vst [vmem:[#allocation2 + $0x8] sm:$0xf] %v1797_v2 }
 0x12c   : > { %v1668_v10 = vadd.f32 %v4194_v25, %v1656_v31  ;;  %1649 = vst.msk [vmem:[#allocation3 + $0x18] sm:$0xff] %vm421_vm5, %v1641_v8  ;;  %v1723_v13 = vrot.slane %v1721_v55, 7 }
 0x12e   : > { %v1676_v20 = vmax.f32 %v1668_v10, 0.0  ;;  %v1726_v22 = vor.u32 %v1724_v14, %v1723_v13  ;;  %v1727_v23 = vrot.slane %v1723_v13, 4 }
 0x12f   : > { %v1420_v26 = vpop.f32.mrf.mxu3 }
 0x130   : > { %v1684_v28 = vpack.c.bf16 %v1676_v20, %v1676_v20  ;;  %v1433_v29 = vadd.f32 %v1420_v26, %v1359_v24  ;;  %v2215_v15 = vld [vmem:[#allocation2 + $0xc] sm:$0x1]  ;;  %v1809_v33 = vsel %vm4219_vm11, %v1727_v23, %v1808_v19  ;;  %v1806_v43 = vsel %vm4226_vm12, %v1726_v22, %v1805_v27  ;;  %v1820_v22 = vld [vmem:[#allocation2 + $0x24] sm:$0x1] }
 0x131   : > { %v1576_v34 = vld [vmem:[#allocation3 + $0x20] sm:$0xff]  ;;  %v2253_v36 = vrot.slane %v2215_v15, 5  ;;  %1810 = vst [vmem:[#allocation2 + $0x14] sm:$0x1] %v1809_v33  ;;  %v2005_v58 = vld [vmem:[#allocation2 + $0xc] sm:$0x1]  ;;  %v2031_v19 = vsel %vm3867_vm4, %v2026_v62, %v2030_v63 }
 0x132   : > { %v1729_v39 = vshrl.u32 %v1684_v28, 16  ;;  %v1732_v40 = vshll.u32 %v1684_v28, 16  ;;  %v1642_v41 = vadd.f32 %v1628_v9, %v1576_v34  ;;  %v3715_v42 = vld [vmem:[#allocation2 + $0x4] sm:$0xf0]  ;;  %1441 = vst.msk [vmem:[#allocation3 + $0x28] sm:$0xff] %vm421_vm5, %v1433_v29  ;;  %v2042_v8 = vshll.u32 %v2005_v58, 16 }
 0x133   : > { %v1657_v46 = vld [vmem:[#allocation3 + $0x18] sm:$0xff]  ;;  %v3575_v47 = vor.u32 %v3715_v42, %v3574_v30  ;;  %1807 = vst [vmem:[#allocation2 + $0x10] sm:$0xf] %v1806_v43  ;;  %v2140_v35 = vunpack.c.l.b16 %v2031_v19  ;;  %v1817_v43 = vld [vmem:[#allocation2 + $0x20] sm:$0xf] }
 0x134   : > { %v2214_v49 = vld [vmem:[#allocation2 + $0x8] sm:$0xe]  ;;  %v1731_v53 = vrot.slane %v1729_v39, 7  ;;  %v1669_v54 = vadd.f32 %v4194_v25, %v1657_v46  ;;  %1650 = vst.msk [vmem:[#allocation3 + $0x20] sm:$0xff] %vm421_vm5, %v1642_v41  ;;  %v2044_v27 = vrot.slane %v2042_v8, 5 }
 0x135   : > { %v3598_v57 = vrot.slane %v2214_v49, 9  ;;  %3588 = vmatmul.msk.bf16.vlgmr.msra.gmra.mxu2 %vm421_vm5, %v3575_v47  ;;  %v2004_v61 = vld [vmem:[#allocation2 + $0x8] sm:$0xf] }
 0x136   : > { %v1734_v0 = vor.u32 %v1732_v40, %v1731_v53  ;;  %v1735_v1 = vrot.slane %v1731_v53, 4  ;;  %v1677_v2 = vmax.f32 %v1669_v54, 0.0  ;;  %v2033_v6 = vshrl.u32 %v2004_v61, 16  ;;  %v3613_v18 = vld [vmem:[#allocation2 + $0x8] sm:$0xf] }
 0x137   : > { %v2254_v45 = vsel %vm4241_vm15, %v3598_v57, %v2253_v36  ;;  %v1423_v4 = vpop.f32.mrf.mxu3  ;;  %v2036_v7 = vshll.u32 %v2004_v61, 16  ;;  %v1361_v47 = vld [vmem:[#allocation3 + $0x38] sm:$0xff] }
 0x138   : > { %v2290_v5 = vunpack.c.l.b16 %v2254_v45  ;;  %v1815_v55 = vsel %vm4219_vm11, %v1735_v1, %v1814_v44  ;;  %v1685_v31 = vpack.c.bf16 %v1677_v2, %v1677_v2  ;;  %v1434_v9 = vadd.f32 %v1423_v4, %v1360_v3  ;;  %v2217_v14 = vld [vmem:[#allocation2 + $0x14] sm:$0x1]  ;;  %v1633_v44 = vpop.f32.mrf.mxu0 }
 0x139   : > { %v1812_v10 = vsel %vm4226_vm12, %v1734_v0, %v1811_v50  ;;  %1816 = vst [vmem:[#allocation2 + $0x1c] sm:$0x1] %v1815_v55  ;;  %v2035_v12 = vrot.slane %v2033_v6, 4  ;;  %v2038_v13 = vrot.slane %v2036_v7, 5  ;;  %v1577_v17 = vld [vmem:[#allocation3 + $0x28] sm:$0xff]  ;;  %v2257_v15 = vrot.slane %v2217_v14, 5 }
 0x13a   : > { %v2297_v11 = vpack.c.b16 %v2290_v5, %v2289_v60  ;;  %v1737_v16 = vshrl.u32 %v1685_v31, 16  ;;  %1442 = vst.msk [vmem:[#allocation3 + $0x30] sm:$0xff] %vm421_vm5, %v1434_v9  ;;  %v1740_v20 = vshll.u32 %v1685_v31, 16  ;;  %v1643_v24 = vadd.f32 %v1630_v59, %v1577_v17  ;;  %v3719_v30 = vld [vmem:[#allocation2 + $0xc] sm:$0xf0] }
 0x13b   : > { %v1658_v23 = vld [vmem:[#allocation3 + $0x20] sm:$0xff]  ;;  %v2039_v26 = vor.u32 %v2038_v13, %v2035_v12  ;;  %1813 = vst [vmem:[#allocation2 + $0x18] sm:$0xf] %v1812_v10  ;;  %v3614_v33 = vor.u32 %v3719_v30, %v3613_v18  ;;  %v1826_v6 = vld [vmem:[#allocation2 + $0x2c] sm:$0x1] }
 0x13c   : > { %3606 = vmatmul.msk.bf16.vlgmr.msrb.gmra.mxu0 %vm421_vm5, %v2297_v11  ;;  %v1739_v28 = vrot.slane %v1737_v16, 7  ;;  %v1670_v29 = vadd.f32 %v4194_v25, %v1658_v23  ;;  %v4270_v32 = vld [vmem:[#allocation2 + $0x14] sm:$0x1]  ;;  %1651 = vst.msk [vmem:[#allocation3 + $0x28] sm:$0xff] %vm421_vm5, %v1643_v24  ;;  %v2216_v36 = vld [vmem:[#allocation2 + $0x10] sm:$0xe] }
 0x13d   : > { %v2040_v34 = vrot.slane %v2039_v26, 4  ;;  %v2006_v38 = vld [vmem:[#allocation2 + $0x10] sm:$0xf]  ;;  %v3599_v42 = vrot.slane %v2216_v36, 9  ;;  %3627 = vmatmul.msk.bf16.vlgmr.msrb.gmra.mxu1 %vm421_vm5, %v3614_v33  ;;  %v2056_v50 = vshll.u32 %v4270_v32, 16 }
 0x13e   : > { %v1742_v39 = vor.u32 %v1740_v20, %v1739_v28  ;;  %v1743_v40 = vrot.slane %v1739_v28, 4  ;;  %v1678_v41 = vmax.f32 %v1670_v29, 0.0  ;;  %v2047_v49 = vshrl.u32 %v2006_v38, 16  ;;  %v3578_v58 = vld [vmem:[#allocation2 + $0x10] sm:$0xf] }
 0x13f   : > { %v2045_v46 = vsel %vm3867_vm4, %v2040_v34, %v2044_v27  ;;  %v1425_v48 = vpop.f32.mrf.mxu3  ;;  %v2258_v61 = vsel %vm4241_vm15, %v3599_v42, %v2257_v15  ;;  %v2050_v0 = vshll.u32 %v2006_v38, 16  ;;  %v1823_v18 = vld [vmem:[#allocation2 + $0x28] sm:$0xf]  ;;  %v3644_v24 = vld [vmem:[%s4593_s6 + $0x14] sm:$0xf]  ;;  %v2058_v32 = vrot.slane %v2056_v50, 5 }
 0x140   : > { %v1821_v53 = vsel %vm4219_vm11, %v1743_v40, %v1820_v22  ;;  %v1686_v54 = vpack.c.bf16 %v1678_v41, %v1678_v41  ;;  %v2141_v51 = vunpack.c.l.b16 %v2045_v46  ;;  %v1435_v57 = vadd.f32 %v1425_v48, %v1361_v47  ;;  %v2219_v59 = vld [vmem:[#allocation2 + $0x1c] sm:$0x1]  ;;  %v1635_v38 = vpop.f32.mrf.mxu0  ;;  %v3649_v42 = vld [vmem:[%s4593_s6 + $0x18] sm:$0xf] }
 0x141   : > { %1822 = vst [vmem:[#allocation2 + $0x24] sm:$0x1] %v1821_v53  ;;  %v1578_v60 = vld [vmem:[#allocation3 + $0x30] sm:$0xff]  ;;  %v1818_v62 = vsel %vm4226_vm12, %v1742_v39, %v1817_v43  ;;  %v2009_v63 = vld [vmem:[#allocation2 + $0x1c] sm:$0x1]  ;;  %v2261_v4 = vrot.slane %v2219_v59, 5  ;;  %v2291_v11 = vunpack.c.l.b16 %v2258_v61 }
 0x142   : > { %v1745_v1 = vshrl.u32 %v1686_v54, 16  ;;  %v1644_v2 = vadd.f32 %v1633_v44, %v1578_v60  ;;  %v2148_v45 = vpack.c.b16 %v2141_v51, %v2140_v35  ;;  %1443 = vst.msk [vmem:[#allocation3 + $0x38] sm:$0xff] %vm421_vm5, %v1435_v57  ;;  %v3716_v3 = vld [vmem:[#allocation2 + $0x14] sm:$0xf0]  ;;  %v1748_v5 = vshll.u32 %v1686_v54, 16 }
 0x143   : > { %v3579_v7 = vor.u32 %v3716_v3, %v3578_v58  ;;  %v2218_v8 = vld [vmem:[#allocation2 + $0x18] sm:$0xe]  ;;  %1819 = vst [vmem:[#allocation2 + $0x20] sm:$0xf] %v1818_v62  ;;  %v2049_v55 = vrot.slane %v2047_v49, 4  ;;  %v2052_v14 = vrot.slane %v2050_v0, 5 }
 0x144   : > { %v1747_v31 = vrot.slane %v1745_v1, 7  ;;  %v1659_v9 = vld [vmem:[#allocation3 + $0x28] sm:$0xff]  ;;  %1652 = vst.msk [vmem:[#allocation3 + $0x30] sm:$0xff] %vm421_vm5, %v1644_v2  ;;  %3593 = vmatmul.msk.bf16.vlgmr.msrb.gmra.mxu3 %vm421_vm5, %v2148_v45  ;;  %v3600_v10 = vrot.slane %v2218_v8, 9  ;;  %v2070_v23 = vshll.u32 %v2009_v63, 16  ;;  %v2768_v41 = vsel %vm1953_vm6, %v3644_v24, 0 }
 0x145   : > { %v2008_v12 = vld [vmem:[#allocation2 + $0x18] sm:$0xf]  ;;  %v1671_v13 = vadd.f32 %v4194_v25, %v1659_v9  ;;  %3589 = vmatmul.msk.bf16.gmra.mxu2 %vm421_vm5, %v3579_v7  ;;  %v2053_v28 = vor.u32 %v2052_v14, %v2049_v55  ;;  %2777 = vmatpush.bf16.msra.mxu3 %v2768_v41  ;;  %v1832_v2 = vld [vmem:[#allocation2 + $0x34] sm:$0x1] }
 0x146   : > { %v2061_v16 = vshrl.u32 %v2008_v12, 16  ;;  %v2064_v17 = vshll.u32 %v2008_v12, 16  ;;  %v1750_v19 = vor.u32 %v1748_v5, %v1747_v31  ;;  %v1751_v20 = vrot.slane %v1747_v31, 4  ;;  %v3617_v15 = vld [vmem:[#allocation2 + $0x18] sm:$0xf] }
 0x147   : > { %v2262_v22 = vsel %vm4241_vm15, %v3600_v10, %v2261_v4  ;;  %v1679_v26 = vmax.f32 %v1671_v13, 0.0  ;;  %v2054_v40 = vrot.slane %v2053_v28, 4  ;;  %v2072_v54 = vrot.slane %v2070_v23, 5  ;;  %v1829_v4 = vld [vmem:[#allocation2 + $0x30] sm:$0xf] }
 0x148   : > { %v2292_v27 = vunpack.c.l.b16 %v2262_v22  ;;  %v2063_v29 = vrot.slane %v2061_v16, 4  ;;  %v1827_v30 = vsel %vm4219_vm11, %v1751_v20, %v1826_v6  ;;  %v2066_v33 = vrot.slane %v2064_v17, 5  ;;  %v2221_v47 = vld [vmem:[#allocation2 + $0x24] sm:$0x1]  ;;  %v1838_v28 = vld [vmem:[#allocation2 + $0x3c] sm:$0x1] }
 0x149   : > { %v1824_v34 = vsel %vm4226_vm12, %v1750_v19, %v1823_v18  ;;  %1828 = vst [vmem:[#allocation2 + $0x2c] sm:$0x1] %v1827_v30  ;;  %v1687_v35 = vpack.c.bf16 %v1679_v26, %v1679_v26  ;;  %v1579_v36 = vld [vmem:[#allocation3 + $0x38] sm:$0xff]  ;;  %v2059_v58 = vsel %vm3867_vm4, %v2054_v40, %v2058_v32  ;;  %v2265_v63 = vrot.slane %v2221_v47, 5  ;;  %v2011_v31 = vld [vmem:[#allocation2 + $0x24] sm:$0x1] }
 0x14a   : > { %v2298_v39 = vpack.c.b16 %v2292_v27, %v2291_v11  ;;  %v1645_v43 = vadd.f32 %v1635_v38, %v1579_v36  ;;  %v3720_v44 = vld [vmem:[#allocation2 + $0x1c] sm:$0xf0]  ;;  %v2067_v46 = vor.u32 %v2066_v33, %v2063_v29  ;;  %1825 = vst [vmem:[#allocation2 + $0x28] sm:$0xf] %v1824_v34  ;;  %v2867_v5 = vsel %vm1953_vm6, %v3649_v42, 0 }
 0x14b   : > { %v1753_v48 = vshrl.u32 %v1687_v35, 16  ;;  %v1756_v49 = vshll.u32 %v1687_v35, 16  ;;  %v1660_v50 = vld [vmem:[#allocation3 + $0x30] sm:$0xff]  ;;  %v3618_v53 = vor.u32 %v3720_v44, %v3617_v15  ;;  %v2142_v8 = vunpack.c.l.b16 %v2059_v58  ;;  %2876 = vmatpush.bf16.msra.mxu0 %v2867_v5  ;;  %v4316_v32 = vld [vmem:[#allocation2 + $0x8] sm:$0xf] }
 0x14c   : > { %3607 = vmatmul.msk.bf16.gmra.mxu0 %vm421_vm5, %v2298_v39  ;;  %v2220_v51 = vld [vmem:[#allocation2 + $0x20] sm:$0xe]  ;;  %v1672_v57 = vadd.f32 %v4194_v25, %v1660_v50  ;;  %1653 = vst.msk [vmem:[#allocation3 + $0x38] sm:$0xff] %vm421_vm5, %v1645_v43  ;;  %v2068_v59 = vrot.slane %v2067_v46, 4  ;;  %v2084_v27 = vshll.u32 %v2011_v31, 16 }
 0x14d   : > { %v3601_v60 = vrot.slane %v2220_v51, 9  ;;  %v2010_v61 = vld [vmem:[#allocation2 + $0x20] sm:$0xf]  ;;  %v1755_v62 = vrot.slane %v1753_v48, 7  ;;  %3628 = vmatmul.msk.bf16.gmra.mxu1 %vm421_vm5, %v3618_v53  ;;  %v1835_v44 = vld [vmem:[#allocation2 + $0x38] sm:$0xf] }
 0x14e   : > { %v2075_v0 = vshrl.u32 %v2010_v61, 16  ;;  %v2078_v1 = vshll.u32 %v2010_v61, 16  ;;  %v1680_v45 = vmax.f32 %v1672_v57, 0.0  ;;  %v2073_v3 = vsel %vm3867_vm4, %v2068_v59, %v2072_v54  ;;  %v3582_v10 = vld [vmem:[#allocation2 + $0x20] sm:$0xf] }
 0x14f   : > { %v1758_v6 = vor.u32 %v1756_v49, %v1755_v62  ;;  %v1759_v7 = vrot.slane %v1755_v62, 4  ;;  %v2143_v55 = vunpack.c.l.b16 %v2073_v3  ;;  %v2266_v12 = vsel %vm4241_vm15, %v3601_v60, %v2265_v63  ;;  %v4331_v57 = vld [vmem:[%s4594_s7] ss:$0 sm:$0xff]  ;;  %v1864_v63 = vpop.f32.mrf.mxu1 }
 0x150   : > { %v1688_v9 = vpack.c.bf16 %v1680_v45, %v1680_v45  ;;  %v2223_v11 = vld [vmem:[#allocation2 + $0x2c] sm:$0x1]  ;;  %v2077_v13 = vrot.slane %v2075_v0, 4  ;;  %v2080_v14 = vrot.slane %v2078_v1, 5  ;;  %v2293_v30 = vunpack.c.l.b16 %v2266_v12  ;;  %v3670_v45 = vld [vmem:[%s4593_s6 + $0x1c] sm:$0xf] }
 0x151   : > { %v1833_v16 = vsel %vm4219_vm11, %v1759_v7, %v1832_v2  ;;  %v2149_v17 = vpack.c.b16 %v2143_v55, %v2142_v8  ;;  %v3717_v18 = vld [vmem:[#allocation2 + $0x24] sm:$0xf0]  ;;  %v2269_v20 = vrot.slane %v2223_v11, 5  ;;  %v1830_v22 = vsel %vm4226_vm12, %v1758_v6, %v1829_v4  ;;  %v2013_v39 = vld [vmem:[#allocation2 + $0x2c] sm:$0x1] }
 0x152   : > { %v2222_v19 = vld [vmem:[#allocation2 + $0x28] sm:$0xe]  ;;  %1834 = vst [vmem:[#allocation2 + $0x34] sm:$0x1] %v1833_v16  ;;  %v1761_v23 = vshrl.u32 %v1688_v9, 16  ;;  %v3583_v24 = vor.u32 %v3717_v18, %v3582_v10  ;;  %v2081_v15 = vor.u32 %v2080_v14, %v2077_v13  ;;  %v1764_v34 = vshll.u32 %v1688_v9, 16 }
 0x153   : > { %v3602_v26 = vrot.slane %v2222_v19, 9  ;;  %v1661_v29 = vld [vmem:[#allocation3 + $0x38] sm:$0xff]  ;;  %1831 = vst [vmem:[#allocation2 + $0x30] sm:$0xf] %v1830_v22  ;;  %v2086_v49 = vrot.slane %v2084_v27, 5  ;;  %v2098_v51 = vshll.u32 %v2013_v39, 16 }
 0x154   : > { %v1763_v33 = vrot.slane %v1761_v23, 7  ;;  %v1673_v35 = vadd.f32 %v4194_v25, %v1661_v29  ;;  %3594 = vmatmul.msk.bf16.gmra.mxu3 %vm421_vm5, %v2149_v17  ;;  %v2012_v38 = vld [vmem:[#allocation2 + $0x28] sm:$0xf]  ;;  %v2082_v41 = vrot.slane %v2081_v15, 4  ;;  %v4326_v25 = vld [vmem:[%s4596_s9] ss:$0 sm:$0xff] }
 0x155   : > { %v2270_v36 = vsel %vm4241_vm15, %v3602_v26, %v2269_v20  ;;  %3590 = vmatmul.msk.bf16.gmra.mxu2 %vm421_vm5, %v3583_v24  ;;  %v2089_v42 = vshrl.u32 %v2012_v38, 16  ;;  %v2092_v43 = vshll.u32 %v2012_v38, 16  ;;  %v3621_v60 = vld [vmem:[#allocation2 + $0x28] sm:$0xf]  ;;  %v2476_v62 = vshrl.u32 %v4316_v32, 16 }
 0x156   : > { %v2294_v40 = vunpack.c.l.b16 %v2270_v36  ;;  %v1766_v46 = vor.u32 %v1764_v34, %v1763_v33  ;;  %v1767_v47 = vrot.slane %v1763_v33, 4  ;;  %v1681_v48 = vmax.f32 %v1673_v35, 0.0  ;;  %v1844_v7 = vld [vmem:[#allocation2 + $0x44] sm:$0x1]  ;;  %v1841_v10 = vld [vmem:[#allocation2 + $0x40] sm:$0xf] }
 0x157   : > { %v2091_v53 = vrot.slane %v2089_v42, 4  ;;  %v2094_v54 = vrot.slane %v2092_v43, 5  ;;  %v2087_v0 = vsel %vm3867_vm4, %v2082_v41, %v2086_v49  ;;  %v1865_v3 = vadd.f32 %v4326_v25, %v1864_v63  ;;  %v2461_v15 = vld [vmem:[#allocation2 + $0x10] sm:$0xf]  ;;  %v3683_v63 = vld [vmem:[%s4593_s6 + $0x20] sm:$0xf] }
 0x158   : > { %v2299_v50 = vpack.c.b16 %v2294_v40, %v2293_v30  ;;  %v1839_v58 = vsel %vm4219_vm11, %v1767_v47, %v1838_v28  ;;  %v1689_v59 = vpack.c.bf16 %v1681_v48, %v1681_v48  ;;  %v1836_v61 = vsel %vm4226_vm12, %v1766_v46, %v1835_v44 }
 0x159   : > { %1840 = vst [vmem:[#allocation2 + $0x3c] sm:$0x1] %v1839_v58  ;;  %v2095_v1 = vor.u32 %v2094_v54, %v2091_v53  ;;  %v2225_v2 = vld [vmem:[#allocation2 + $0x34] sm:$0x1]  ;;  %v2479_v6 = vshll.u32 %v4316_v32, 16  ;;  %v2100_v31 = vrot.slane %v2098_v51, 5  ;;  %v1888_v11 = vadd.f32 %v4331_v57, %v1865_v3 }
 0x15a   : > { %v1769_v4 = vshrl.u32 %v1689_v59, 16  ;;  %v3721_v5 = vld [vmem:[#allocation2 + $0x2c] sm:$0xf0]  ;;  %1837 = vst [vmem:[#allocation2 + $0x38] sm:$0xf] %v1836_v61  ;;  %v1772_v13 = vshll.u32 %v1689_v59, 16  ;;  %v2144_v14 = vunpack.c.l.b16 %v2087_v0  ;;  %v1866_v59 = vpop.f32.mrf.mxu1 }
 0x15b   : > { %v3622_v8 = vor.u32 %v3721_v5, %v3621_v60  ;;  %v2096_v55 = vrot.slane %v2095_v1, 4  ;;  %v2224_v9 = vld [vmem:[#allocation2 + $0x30] sm:$0xe]  ;;  %v3077_v17 = vsel %vm1953_vm6, %v3670_v45, 0  ;;  %v2273_v19 = vrot.slane %v2225_v2, 5  ;;  %1896 = vst.msk [vmem:[#allocation3] sm:$0xff] %vm421_vm5, %v1888_v11 }
 0x15c   : > { %3608 = vmatmul.msk.bf16.gmra.mxu0 %vm421_vm5, %v2299_v50  ;;  %v1771_v12 = vrot.slane %v1769_v4, 7  ;;  %v2014_v16 = vld [vmem:[#allocation2 + $0x30] sm:$0xf]  ;;  %v2015_v20 = vld [vmem:[#allocation2 + $0x34] sm:$0x1]  ;;  %3086 = vmatpush.bf16.msra.mxu1 %v3077_v17  ;;  %v3603_v28 = vrot.slane %v2224_v9, 9 }
 0x15d   : > { %v2101_v18 = vsel %vm3867_vm4, %v2096_v55, %v2100_v31  ;;  %v2103_v22 = vshrl.u32 %v2014_v16, 16  ;;  %v2106_v23 = vshll.u32 %v2014_v16, 16  ;;  %3629 = vmatmul.msk.bf16.gmra.mxu1 %vm421_vm5, %v3622_v8  ;;  %v2478_v32 = vrot.slane %v2476_v62, 4  ;;  %v3586_v36 = vld [vmem:[#allocation2 + $0x30] sm:$0xf] }
 0x15e   : > { %v1774_v24 = vor.u32 %v1772_v13, %v1771_v12  ;;  %v1775_v26 = vrot.slane %v1771_v12, 4  ;;  %v2145_v27 = vunpack.c.l.b16 %v2101_v18  ;;  %v2481_v33 = vrot.slane %v2479_v6, 5  ;;  %v2460_v51 = vld [vmem:[#allocation2 + $0xc] sm:$0x1]  ;;  %v2914_v0 = vld [vmem:[#allocation2 + $0x10] sm:$0xf] }
 0x15f   : > { %v2105_v29 = vrot.slane %v2103_v22, 4  ;;  %v2108_v30 = vrot.slane %v2106_v23, 5  ;;  %v2112_v40 = vshll.u32 %v2015_v20, 16  ;;  %v2274_v46 = vsel %vm4241_vm15, %v3603_v28, %v2273_v19  ;;  %v2462_v4 = vld [vmem:[#allocation2 + $0x14] sm:$0x1] }
 0x160   : > { %v1845_v34 = vsel %vm4219_vm11, %v1775_v26, %v1844_v7  ;;  %v2150_v35 = vpack.c.b16 %v2145_v27, %v2144_v14  ;;  %v2227_v38 = vld [vmem:[#allocation2 + $0x3c] sm:$0x1]  ;;  %v1842_v39 = vsel %vm4226_vm12, %v1774_v24, %v1841_v10  ;;  %v2482_v50 = vor.u32 %v2481_v33, %v2478_v32  ;;  %v2916_v55 = vld [vmem:[#allocation2 + $0x18] sm:$0xf] }
 0x161   : > { %1846 = vst [vmem:[#allocation2 + $0x44] sm:$0x1] %v1845_v34  ;;  %v3718_v41 = vld [vmem:[#allocation2 + $0x34] sm:$0xf0]  ;;  %v2109_v43 = vor.u32 %v2108_v30, %v2105_v29  ;;  %v2277_v48 = vrot.slane %v2227_v38, 5  ;;  %v2490_v58 = vshrl.u32 %v2461_v15, 16  ;;  %v2295_v60 = vunpack.c.l.b16 %v2274_v46 }
 0x162   : > { %v2226_v42 = vld [vmem:[#allocation2 + $0x38] sm:$0xe]  ;;  %v3587_v44 = vor.u32 %v3718_v41, %v3586_v36  ;;  %1843 = vst [vmem:[#allocation2 + $0x40] sm:$0xf] %v1842_v39  ;;  %v2017_v49 = vld [vmem:[#allocation2 + $0x3c] sm:$0x1]  ;;  %v1869_v33 = vpop.f32.mrf.mxu1 }
 0x163   : > { %v3604_v47 = vrot.slane %v2226_v42, 9  ;;  %v2016_v52 = vld [vmem:[#allocation2 + $0x38] sm:$0xf]  ;;  %v2110_v62 = vrot.slane %v2109_v43, 4  ;;  %v2114_v1 = vrot.slane %v2112_v40, 5  ;;  %v2126_v3 = vshll.u32 %v2017_v49, 16 }
 0x164   : > { %3595 = vmatmul.msk.bf16.gmra.mxu3 %vm421_vm5, %v2150_v35  ;;  %v2117_v53 = vshrl.u32 %v2016_v52, 16  ;;  %v2120_v54 = vshll.u32 %v2016_v52, 16  ;;  %v2483_v6 = vrot.slane %v2482_v50, 4  ;;  %v2492_v7 = vrot.slane %v2490_v58, 4  ;;  %v3625_v31 = vld [vmem:[#allocation2 + $0x38] sm:$0xf] }
 0x165   : > { %v2278_v56 = vsel %vm4241_vm15, %v3604_v47, %v2277_v48  ;;  %3591 = vmatmul.msk.bf16.gmra.mxu2 %vm421_vm5, %v3587_v44  ;;  %v2493_v8 = vshll.u32 %v2461_v15, 16  ;;  %v2485_v10 = vshll.u32 %v2460_v51, 16  ;;  %v3223_v11 = vsel %vm1953_vm6, %v3683_v63, 0  ;;  %v2915_v15 = vld [vmem:[#allocation2 + $0x14] sm:$0x1] }
 0x166   : > { %v2296_v61 = vunpack.c.l.b16 %v2278_v56  ;;  %v2119_v2 = vrot.slane %v2117_v53, 4  ;;  %v2122_v45 = vrot.slane %v2120_v54, 5  ;;  %v2931_v12 = vshrl.u32 %v2914_v0, 16  ;;  %3232 = vmatpush.bf16.msra.mxu2 %v3223_v11  ;;  %v2917_v38 = vld [vmem:[#allocation2 + $0x1c] sm:$0x1] }
 0x167   : > { %v2115_v14 = vsel %vm3867_vm4, %v2110_v62, %v2114_v1  ;;  %v2495_v16 = vrot.slane %v2493_v8, 5  ;;  %v2499_v17 = vshll.u32 %v2462_v4, 16  ;;  %v2934_v18 = vshll.u32 %v2914_v0, 16  ;;  %v3723_v43 = vld [vmem:[#allocation2 + $0x14] sm:$0xf0] }
 0x168   : > { %v2300_v5 = vpack.c.b16 %v2296_v61, %v2295_v60  ;;  %v2123_v9 = vor.u32 %v2122_v45, %v2119_v2  ;;  %v2128_v22 = vrot.slane %v2126_v3, 5  ;;  %v2945_v23 = vshrl.u32 %v2916_v55, 16  ;;  %v2463_v48 = vld [vmem:[#allocation2 + $0x18] sm:$0xf]  ;;  %v3652_v50 = vld [vmem:[#allocation2 + $0x10] sm:$0xf] }
 0x169   : > { %v3722_v13 = vld [vmem:[#allocation2 + $0x3c] sm:$0xf0]  ;;  %v2496_v24 = vor.u32 %v2495_v16, %v2492_v7  ;;  %v2933_v26 = vrot.slane %v2931_v12, 4  ;;  %v2936_v27 = vrot.slane %v2934_v18, 5  ;;  %v2948_v28 = vshll.u32 %v2916_v55, 16 }
 0x16a   : > { %v3626_v19 = vor.u32 %v3722_v13, %v3625_v31  ;;  %v2124_v20 = vrot.slane %v2123_v9, 4  ;;  %v2487_v30 = vrot.slane %v2485_v10, 5  ;;  %v2947_v32 = vrot.slane %v2945_v23, 4  ;;  %v2671_v51 = vld [vmem:[#allocation2 + $0x10] sm:$0xe]  ;;  %v1871_v9 = vpop.f32.mrf.mxu1 }
 0x16b   : > { %v2497_v35 = vrot.slane %v2496_v24, 4  ;;  %v2501_v36 = vrot.slane %v2499_v17, 5  ;;  %v2950_v39 = vrot.slane %v2948_v28, 5  ;;  %v2146_v40 = vunpack.c.l.b16 %v2115_v14  ;;  %v2672_v58 = vld [vmem:[#allocation2 + $0x14] sm:$0x1] }
 0x16c   : > { %3609 = vmatmul.msk.bf16.gmra.mxu0 %vm421_vm5, %v2300_v5  ;;  %v2129_v29 = vsel %vm3867_vm4, %v2124_v20, %v2128_v22  ;;  %v2488_v41 = vsel %vm3867_vm4, %v2483_v6, %v2487_v30  ;;  %v2937_v44 = vor.u32 %v2936_v27, %v2933_v26  ;;  %v2940_v46 = vshll.u32 %v2915_v15, 16  ;;  %v2465_v60 = vld [vmem:[#allocation2 + $0x20] sm:$0xf]  ;;  %v2464_v0 = vld [vmem:[#allocation2 + $0x1c] sm:$0x1] }
 0x16d   : > { %v2147_v34 = vunpack.c.l.b16 %v2129_v29  ;;  %3630 = vmatmul.msk.bf16.gmra.mxu1 %vm421_vm5, %v3626_v19  ;;  %v2502_v42 = vsel %vm3867_vm4, %v2497_v35, %v2501_v36  ;;  %v2951_v47 = vor.u32 %v2950_v39, %v2947_v32  ;;  %v2954_v56 = vshll.u32 %v2917_v38, 16  ;;  %v2466_v1 = vld [vmem:[#allocation2 + $0x24] sm:$0x1]  ;;  %v2918_v6 = vld [vmem:[#allocation2 + $0x20] sm:$0xf] }
 0x16e   : > { %v2598_v49 = vunpack.c.l.b16 %v2502_v42  ;;  %v1867_v53 = vadd.f32 %v4326_v25, %v1866_v59  ;;  %v2597_v54 = vunpack.c.l.b16 %v2488_v41  ;;  %v3653_v61 = vor.u32 %v3723_v43, %v3652_v50  ;;  %v2669_v59 = vld [vmem:[#allocation2 + $0x8] sm:$0xe]  ;;  %v2670_v17 = vld [vmem:[#allocation2 + $0xc] sm:$0x1] }
 0x16f   : > { %v2151_v52 = vpack.c.b16 %v2147_v34, %v2146_v40  ;;  %v2952_v62 = vrot.slane %v2951_v47, 4  ;;  %v2504_v2 = vshrl.u32 %v2463_v48, 16  ;;  %v2938_v3 = vrot.slane %v2937_v44, 4  ;;  %v2920_v14 = vld [vmem:[#allocation2 + $0x28] sm:$0xf] }
 0x170   : > { %v1889_v63 = vadd.f32 %v4331_v57, %v1867_v53  ;;  %v2605_v45 = vpack.c.b16 %v2598_v49, %v2597_v54  ;;  %v2942_v4 = vrot.slane %v2940_v46, 5  ;;  %v2507_v5 = vshll.u32 %v2463_v48, 16  ;;  %v2467_v43 = vld [vmem:[#allocation2 + $0x28] sm:$0xf]  ;;  %v2921_v47 = vld [vmem:[#allocation2 + $0x2c] sm:$0x1] }
 0x171   : > { %v2956_v7 = vrot.slane %v2954_v56, 5  ;;  %v2506_v8 = vrot.slane %v2504_v2, 4  ;;  %v2518_v55 = vshrl.u32 %v2465_v60, 16  ;;  %v2521_v31 = vshll.u32 %v2465_v60, 16  ;;  %v2919_v53 = vld [vmem:[#allocation2 + $0x24] sm:$0x1] }
 0x172   : > { %1897 = vst.msk [vmem:[#allocation3 + $0x8] sm:$0xff] %vm421_vm5, %v1889_v63  ;;  %v3637_v10 = vrot.slane %v2671_v51, 9  ;;  %v2707_v11 = vrot.slane %v2672_v58, 5  ;;  %v2509_v12 = vrot.slane %v2507_v5, 5  ;;  %v1870_v13 = vadd.f32 %v4326_v25, %v1869_v33  ;;  %v1874_v49 = vpop.f32.mrf.mxu1 }
 0x173   : > { %v2957_v16 = vsel %vm3867_vm4, %v2952_v62, %v2956_v7  ;;  %v2520_v18 = vrot.slane %v2518_v55, 4  ;;  %v2523_v19 = vrot.slane %v2521_v31, 5  ;;  %v2527_v20 = vshll.u32 %v2466_v1, 16  ;;  %v2674_v7 = vld [vmem:[#allocation2 + $0x1c] sm:$0x1] }
 0x174   : > { %3596 = vmatmul.msk.bf16.gmra.mxu3 %vm421_vm5, %v2151_v52  ;;  %v2943_v22 = vsel %vm3867_vm4, %v2938_v3, %v2942_v4  ;;  %v2510_v23 = vor.u32 %v2509_v12, %v2506_v8  ;;  %v2513_v24 = vshll.u32 %v2464_v0, 16  ;;  %v1890_v26 = vadd.f32 %v4331_v57, %v1870_v13  ;;  %v2469_v0 = vld [vmem:[#allocation2 + $0x30] sm:$0xf]  ;;  %v2675_v55 = vld [vmem:[#allocation2 + $0x20] sm:$0xe] }
 0x175   : > { %3632 = vmatmul.msk.bf16.vlgmr.msrb.gmra.mxu2 %vm421_vm5, %v2605_v45  ;;  %v2524_v27 = vor.u32 %v2523_v19, %v2520_v18  ;;  %v2959_v28 = vshrl.u32 %v2918_v6, 16  ;;  %v2962_v29 = vshll.u32 %v2918_v6, 16  ;;  %v2973_v30 = vshrl.u32 %v2920_v14, 16  ;;  %v2673_v6 = vld [vmem:[#allocation2 + $0x18] sm:$0xe] }
 0x176   : > { %v3053_v15 = vunpack.c.l.b16 %v2957_v16  ;;  %v3636_v32 = vrot.slane %v2669_v59, 9  ;;  %v2703_v33 = vrot.slane %v2670_v17, 5  ;;  %1898 = vst.msk [vmem:[#allocation3 + $0x10] sm:$0xff] %vm421_vm5, %v1890_v26  ;;  %v2976_v34 = vshll.u32 %v2920_v14, 16  ;;  %v2676_v31 = vld [vmem:[#allocation2 + $0x24] sm:$0x1] }
 0x177   : > { %v2511_v35 = vrot.slane %v2510_v23, 4  ;;  %v2525_v36 = vrot.slane %v2524_v27, 4  ;;  %v2529_v38 = vrot.slane %v2527_v20, 5  ;;  %v2975_v39 = vrot.slane %v2973_v30, 4  ;;  %v2470_v14 = vld [vmem:[#allocation2 + $0x34] sm:$0x1] }
 0x178   : > { %v3052_v40 = vunpack.c.l.b16 %v2943_v22  ;;  %v2708_v41 = vsel %vm4241_vm15, %v3637_v10, %v2707_v11  ;;  %v2978_v42 = vrot.slane %v2976_v34, 5  ;;  %v2515_v44 = vrot.slane %v2513_v24, 5  ;;  %v2924_v18 = vld [vmem:[#allocation2 + $0x38] sm:$0xf]  ;;  %v2468_v22 = vld [vmem:[#allocation2 + $0x2c] sm:$0x1] }
 0x179   : > { %v2530_v46 = vsel %vm3867_vm4, %v2525_v36, %v2529_v38  ;;  %v2961_v48 = vrot.slane %v2959_v28, 4  ;;  %v2964_v52 = vrot.slane %v2962_v29, 5  ;;  %v2704_v56 = vsel %vm4241_vm15, %v3636_v32, %v2703_v33  ;;  %v2922_v30 = vld [vmem:[#allocation2 + $0x30] sm:$0xf]  ;;  %v3724_v32 = vld [vmem:[#allocation2 + $0x24] sm:$0xf0] }
 0x17a   : > { %v3060_v50 = vpack.c.b16 %v3053_v15, %v3052_v40  ;;  %v2979_v54 = vor.u32 %v2978_v42, %v2975_v39  ;;  %v2744_v51 = vunpack.c.l.b16 %v2708_v41  ;;  %v2516_v58 = vsel %vm3867_vm4, %v2511_v35, %v2515_v44  ;;  %v1876_v15 = vpop.f32.mrf.mxu1  ;;  %v3656_v42 = vld [vmem:[#allocation2 + $0x20] sm:$0xf] }
 0x17b   : > { %v1872_v60 = vadd.f32 %v4326_v25, %v1871_v9  ;;  %v2600_v62 = vunpack.c.l.b16 %v2530_v46  ;;  %v2982_v63 = vshll.u32 %v2921_v47, 16  ;;  %v2743_v1 = vunpack.c.l.b16 %v2704_v56 }
 0x17c   : > { %3666 = vmatmul.msk.bf16.vlgmr.msra.gmra.mxu0 %vm421_vm5, %v3653_v61  ;;  %v2532_v61 = vshrl.u32 %v2467_v43, 16  ;;  %v2965_v2 = vor.u32 %v2964_v52, %v2961_v48  ;;  %v2968_v45 = vshll.u32 %v2919_v53, 16  ;;  %v2599_v4 = vunpack.c.l.b16 %v2516_v58 }
 0x17d   : > { %3671 = vmatmul.msk.bf16.vlgmr.msra.gmra.mxu1 %vm421_vm5, %v3060_v50  ;;  %v1891_v3 = vadd.f32 %v4331_v57, %v1872_v60  ;;  %v2980_v5 = vrot.slane %v2979_v54, 4  ;;  %v2535_v59 = vshll.u32 %v2467_v43, 16  ;;  %v2751_v8 = vpack.c.b16 %v2744_v51, %v2743_v1  ;;  %v2471_v54 = vld [vmem:[#allocation2 + $0x38] sm:$0xf] }
 0x17e   : > { %v2534_v9 = vrot.slane %v2532_v61, 4  ;;  %v2546_v10 = vshrl.u32 %v2469_v0, 16  ;;  %v2549_v11 = vshll.u32 %v2469_v0, 16  ;;  %v2606_v12 = vpack.c.b16 %v2600_v62, %v2599_v4  ;;  %v2473_v4 = vld [vmem:[#allocation2 + $0x40] sm:$0xf] }
 0x17f   : > { %1899 = vst.msk [vmem:[#allocation3 + $0x18] sm:$0xff] %vm421_vm5, %v1891_v3  ;;  %v2984_v13 = vrot.slane %v2982_v63, 5  ;;  %v2537_v16 = vrot.slane %v2535_v59, 5  ;;  %v1875_v17 = vadd.f32 %v4326_v25, %v1874_v49  ;;  %v2966_v19 = vrot.slane %v2965_v2, 4  ;;  %v2925_v63 = vld [vmem:[#allocation2 + $0x3c] sm:$0x1] }
 0x180   : > { %v2970_v20 = vrot.slane %v2968_v45, 5  ;;  %v2548_v23 = vrot.slane %v2546_v10, 4  ;;  %v2551_v24 = vrot.slane %v2549_v11, 5  ;;  %v3638_v27 = vrot.slane %v2673_v6, 9  ;;  %v2923_v3 = vld [vmem:[#allocation2 + $0x34] sm:$0x1] }
 0x181   : > { %v2985_v26 = vsel %vm3867_vm4, %v2980_v5, %v2984_v13  ;;  %v2711_v28 = vrot.slane %v2674_v7, 5  ;;  %v1892_v29 = vadd.f32 %v4331_v57, %v1875_v17  ;;  %v2538_v33 = vor.u32 %v2537_v16, %v2534_v9 }
 0x182   : > { %v2552_v34 = vor.u32 %v2551_v24, %v2548_v23  ;;  %v2555_v35 = vshll.u32 %v2470_v14, 16  ;;  %v3001_v36 = vshrl.u32 %v2924_v18, 16  ;;  %v3639_v38 = vrot.slane %v2675_v55, 9  ;;  %v1879_v11 = vpop.f32.mrf.mxu1  ;;  %v2679_v14 = vld [vmem:[#allocation2 + $0x30] sm:$0xe] }
 0x183   : > { %v2715_v39 = vrot.slane %v2676_v31, 5  ;;  %v2541_v40 = vshll.u32 %v2468_v22, 16  ;;  %1900 = vst.msk [vmem:[#allocation3 + $0x20] sm:$0xff] %vm421_vm5, %v1892_v29  ;;  %v3004_v41 = vshll.u32 %v2924_v18, 16  ;;  %v2971_v43 = vsel %vm3867_vm4, %v2966_v19, %v2970_v20  ;;  %v2680_v19 = vld [vmem:[#allocation2 + $0x34] sm:$0x1] }
 0x184   : > { %3645 = vmatmul.msk.bf16.vlgmr.msra.gmra.mxu3 %vm421_vm5, %v2751_v8  ;;  %v2553_v44 = vrot.slane %v2552_v34, 4  ;;  %v2987_v46 = vshrl.u32 %v2922_v30, 16  ;;  %v2990_v47 = vshll.u32 %v2922_v30, 16  ;;  %v3657_v48 = vor.u32 %v3724_v32, %v3656_v42  ;;  %v2474_v20 = vld [vmem:[#allocation2 + $0x44] sm:$0x1] }
 0x185   : > { %3633 = vmatmul.msk.bf16.gmra.mxu2 %vm421_vm5, %v2606_v12  ;;  %v3055_v52 = vunpack.c.l.b16 %v2985_v26  ;;  %v2539_v49 = vrot.slane %v2538_v33, 4  ;;  %v2557_v50 = vrot.slane %v2555_v35, 5  ;;  %v3003_v56 = vrot.slane %v3001_v36, 4  ;;  %v2678_v34 = vld [vmem:[#allocation2 + $0x2c] sm:$0x1] }
 0x186   : > { %v3006_v53 = vrot.slane %v3004_v41, 5  ;;  %v3054_v51 = vunpack.c.l.b16 %v2971_v43  ;;  %v2712_v58 = vsel %vm4241_vm15, %v3638_v27, %v2711_v28  ;;  %v2716_v60 = vsel %vm4241_vm15, %v3639_v38, %v2715_v39  ;;  %v2677_v28 = vld [vmem:[#allocation2 + $0x28] sm:$0xe]  ;;  %v3725_v38 = vld [vmem:[#allocation2 + $0x34] sm:$0xf0] }
 0x187   : > { %v2543_v61 = vrot.slane %v2541_v40, 5  ;;  %v2558_v62 = vsel %vm3867_vm4, %v2553_v44, %v2557_v50  ;;  %v2989_v0 = vrot.slane %v2987_v46, 4  ;;  %v2992_v1 = vrot.slane %v2990_v47, 5  ;;  %v2928_v36 = vld [vmem:[#allocation2 + $0x48] sm:$0xf] }
 0x188   : > { %v1877_v2 = vadd.f32 %v4326_v25, %v1876_v15  ;;  %v3061_v45 = vpack.c.b16 %v3055_v52, %v3054_v51  ;;  %v2560_v5 = vshrl.u32 %v2471_v54, 16  ;;  %v2746_v6 = vunpack.c.l.b16 %v2716_v60  ;;  %v2926_v15 = vld [vmem:[#allocation2 + $0x40] sm:$0xf]  ;;  %v2472_v44 = vld [vmem:[#allocation2 + $0x3c] sm:$0x1] }
 0x189   : > { %v2544_v7 = vsel %vm3867_vm4, %v2539_v49, %v2543_v61  ;;  %v3007_v59 = vor.u32 %v3006_v53, %v3003_v56  ;;  %v2745_v55 = vunpack.c.l.b16 %v2712_v58  ;;  %v2602_v31 = vunpack.c.l.b16 %v2558_v62  ;;  %v3660_v52 = vld [vmem:[#allocation2 + $0x30] sm:$0xf] }
 0x18a   : > { %v1893_v8 = vadd.f32 %v4331_v57, %v1877_v2  ;;  %v3010_v9 = vshll.u32 %v2925_v63, 16  ;;  %v2563_v10 = vshll.u32 %v2471_v54, 16  ;;  %v2993_v12 = vor.u32 %v2992_v1, %v2989_v0 }
 0x18b   : > { %v2996_v13 = vshll.u32 %v2923_v3, 16  ;;  %v2574_v16 = vshrl.u32 %v2473_v4, 16  ;;  %v2577_v17 = vshll.u32 %v2473_v4, 16  ;;  %v2601_v18 = vunpack.c.l.b16 %v2544_v7  ;;  %v1881_v3 = vpop.f32.mrf.mxu1 }
 0x18c   : > { %3667 = vmatmul.msk.bf16.gmra.mxu0 %vm421_vm5, %v3657_v48  ;;  %1901 = vst.msk [vmem:[#allocation3 + $0x28] sm:$0xff] %vm421_vm5, %v1893_v8  ;;  %v2562_v22 = vrot.slane %v2560_v5, 4  ;;  %v2565_v23 = vrot.slane %v2563_v10, 5  ;;  %v1880_v24 = vadd.f32 %v4326_v25, %v1879_v11  ;;  %v2752_v26 = vpack.c.b16 %v2746_v6, %v2745_v55  ;;  %v2929_v8 = vld [vmem:[#allocation2 + $0x4c] sm:$0x1] }
 0x18d   : > { %3672 = vmatmul.msk.bf16.gmra.mxu1 %vm421_vm5, %v3061_v45  ;;  %v3008_v27 = vrot.slane %v3007_v59, 4  ;;  %v2576_v29 = vrot.slane %v2574_v16, 4  ;;  %v2579_v30 = vrot.slane %v2577_v17, 5  ;;  %v2607_v32 = vpack.c.b16 %v2602_v31, %v2601_v18 }
 0x18e   : > { %v3012_v33 = vrot.slane %v3010_v9, 5  ;;  %v1894_v35 = vadd.f32 %v4331_v57, %v1880_v24  ;;  %v2994_v39 = vrot.slane %v2993_v12, 4  ;;  %v3641_v40 = vrot.slane %v2679_v14, 9 }
 0x18f   : > { %v2723_v41 = vrot.slane %v2680_v19, 5  ;;  %v2580_v42 = vor.u32 %v2579_v30, %v2576_v29  ;;  %v2998_v43 = vrot.slane %v2996_v13, 5  ;;  %v2566_v46 = vor.u32 %v2565_v23, %v2562_v22  ;;  %v2927_v13 = vld [vmem:[#allocation2 + $0x44] sm:$0x1]  ;;  %v2683_v30 = vld [vmem:[#allocation2 + $0x40] sm:$0xe] }
 0x190   : > { %v2583_v47 = vshll.u32 %v2474_v20, 16  ;;  %1902 = vst.msk [vmem:[#allocation3 + $0x30] sm:$0xff] %vm421_vm5, %v1894_v35  ;;  %v3015_v48 = vshrl.u32 %v2926_v15, 16  ;;  %v3013_v49 = vsel %vm3867_vm4, %v3008_v27, %v3012_v33  ;;  %v3018_v50 = vshll.u32 %v2926_v15, 16  ;;  %v2684_v15 = vld [vmem:[#allocation2 + $0x44] sm:$0x1] }
 0x191   : > { %v3029_v56 = vshrl.u32 %v2928_v36, 16  ;;  %v3032_v53 = vshll.u32 %v2928_v36, 16  ;;  %v3661_v54 = vor.u32 %v3725_v38, %v3660_v52  ;;  %v3640_v51 = vrot.slane %v2677_v28, 9  ;;  %v3126_v28 = vld [vmem:[#allocation2 + $0x18] sm:$0xe] }
 0x192   : > { %v2719_v58 = vrot.slane %v2678_v34, 5  ;;  %v2999_v60 = vsel %vm3867_vm4, %v2994_v39, %v2998_v43  ;;  %v2724_v61 = vsel %vm4241_vm15, %v3641_v40, %v2723_v41  ;;  %v2569_v62 = vshll.u32 %v2472_v44, 16  ;;  %v3726_v33 = vld [vmem:[#allocation2 + $0x44] sm:$0xf0]  ;;  %v3127_v34 = vld [vmem:[#allocation2 + $0x1c] sm:$0x1] }
 0x193   : > { %v2581_v63 = vrot.slane %v2580_v42, 4  ;;  %v3057_v0 = vunpack.c.l.b16 %v3013_v49  ;;  %v2567_v1 = vrot.slane %v2566_v46, 4  ;;  %v2585_v2 = vrot.slane %v2583_v47, 5  ;;  %v2681_v38 = vld [vmem:[#allocation2 + $0x38] sm:$0xe] }
 0x194   : > { %3646 = vmatmul.msk.bf16.gmra.mxu3 %vm421_vm5, %v2752_v26  ;;  %v3017_v45 = vrot.slane %v3015_v48, 4  ;;  %v3020_v4 = vrot.slane %v3018_v50, 5  ;;  %v3031_v5 = vrot.slane %v3029_v56, 4  ;;  %v3034_v6 = vrot.slane %v3032_v53, 5  ;;  %v2682_v39 = vld [vmem:[#allocation2 + $0x3c] sm:$0x1] }
 0x195   : > { %3634 = vmatmul.msk.bf16.gmra.mxu2 %vm421_vm5, %v2607_v32  ;;  %v1882_v7 = vadd.f32 %v4326_v25, %v1881_v3  ;;  %v3056_v59 = vunpack.c.l.b16 %v2999_v60  ;;  %v2571_v55 = vrot.slane %v2569_v62, 5  ;;  %v2586_v31 = vsel %vm3867_vm4, %v2581_v63, %v2585_v2  ;;  %v3664_v32 = vld [vmem:[#allocation2 + $0x40] sm:$0xf]  ;;  %v3124_v42 = vld [vmem:[#allocation2 + $0x10] sm:$0xe] }
 0x196   : > { %v2720_v11 = vsel %vm4241_vm15, %v3640_v51, %v2719_v58  ;;  %v2748_v12 = vunpack.c.l.b16 %v2724_v61  ;;  %v3021_v25 = vor.u32 %v3020_v4, %v3017_v45  ;;  %v3035_v16 = vor.u32 %v3034_v6, %v3031_v5  ;;  %v3125_v43 = vld [vmem:[#allocation2 + $0x14] sm:$0x1]  ;;  %v3130_v45 = vld [vmem:[#allocation2 + $0x28] sm:$0xe]  ;;  %v3131_v3 = vld [vmem:[#allocation2 + $0x2c] sm:$0x1] }
 0x197   : > { %v1895_v9 = vadd.f32 %v4331_v57, %v1882_v7  ;;  %v3062_v10 = vpack.c.b16 %v3057_v0, %v3056_v59  ;;  %v2572_v14 = vsel %vm3867_vm4, %v2567_v1, %v2571_v55  ;;  %v3038_v17 = vshll.u32 %v2929_v8, 16  ;;  %v1912_v4 = vld [vmem:[#allocation3] sm:$0xff]  ;;  %v3128_v5 = vld [vmem:[#allocation2 + $0x20] sm:$0xe]  ;;  %v3129_v6 = vld [vmem:[#allocation2 + $0x24] sm:$0x1] }
 0x198   : > { %v2604_v18 = vunpack.c.l.b16 %v2586_v31  ;;  %v2747_v19 = vunpack.c.l.b16 %v2720_v11  ;;  %v3024_v20 = vshll.u32 %v2927_v13, 16  ;;  %v2603_v57 = vunpack.c.l.b16 %v2572_v14 }
 0x199   : > { %1903 = vst.msk [vmem:[#allocation3 + $0x38] sm:$0xff] %vm421_vm5, %v1895_v9  ;;  %v3022_v23 = vrot.slane %v3021_v25, 4  ;;  %v3036_v24 = vrot.slane %v3035_v16, 4  ;;  %v3040_v26 = vrot.slane %v3038_v17, 5  ;;  %v3643_v40 = vrot.slane %v2683_v30, 9  ;;  %v1913_v16 = vld [vmem:[#allocation3 + $0x8] sm:$0xff] }
 0x19a   : > { %v2753_v22 = vpack.c.b16 %v2748_v12, %v2747_v19  ;;  %v2608_v27 = vpack.c.b16 %v2604_v18, %v2603_v57  ;;  %v3026_v29 = vrot.slane %v3024_v20, 5  ;;  %v2731_v41 = vrot.slane %v2684_v15, 5 }
 0x19b   : > { %v3041_v36 = vsel %vm3867_vm4, %v3036_v24, %v3040_v26  ;;  %v3665_v44 = vor.u32 %v3726_v33, %v3664_v32  ;;  %v3676_v46 = vrot.slane %v3126_v28, 9  ;;  %v3162_v47 = vrot.slane %v3127_v34, 5  ;;  %v1914_v24 = vld [vmem:[#allocation3 + $0x10] sm:$0xff]  ;;  %v3133_v28 = vld [vmem:[#allocation2 + $0x34] sm:$0x1] }
 0x19c   : > { %3668 = vmatmul.msk.bf16.gmra.mxu0 %vm421_vm5, %v3661_v54  ;;  %v3027_v35 = vsel %vm3867_vm4, %v3022_v23, %v3026_v29  ;;  %v3059_v52 = vunpack.c.l.b16 %v3041_v36  ;;  %v3642_v49 = vrot.slane %v2681_v38, 9  ;;  %v2727_v50 = vrot.slane %v2682_v39, 5  ;;  %v3135_v23 = vld [vmem:[#allocation2 + $0x3c] sm:$0x1] }
 0x19d   : > { %3673 = vmatmul.msk.bf16.gmra.mxu1 %vm421_vm5, %v3062_v10  ;;  %v3058_v48 = vunpack.c.l.b16 %v3027_v35  ;;  %v3675_v56 = vrot.slane %v3124_v42, 9  ;;  %v3158_v53 = vrot.slane %v3125_v43, 5  ;;  %v2732_v37 = vsel %vm4241_vm15, %v3643_v40, %v2731_v41 }
 0x19e   : > { %v3163_v54 = vsel %vm4241_vm15, %v3676_v46, %v3162_v47  ;;  %v2728_v58 = vsel %vm4241_vm15, %v3642_v49, %v2727_v50  ;;  %v2750_v60 = vunpack.c.l.b16 %v2732_v37  ;;  %v3678_v8 = vrot.slane %v3130_v45, 9  ;;  %v1915_v46 = vld [vmem:[#allocation3 + $0x18] sm:$0xff] }
 0x19f   : > { %v3063_v51 = vpack.c.b16 %v3059_v52, %v3058_v48  ;;  %v3159_v61 = vsel %vm4241_vm15, %v3675_v56, %v3158_v53  ;;  %v3199_v62 = vunpack.c.l.b16 %v3163_v54  ;;  %v2749_v63 = vunpack.c.l.b16 %v2728_v58  ;;  %v3136_v54 = vld [vmem:[#allocation2 + $0x40] sm:$0xe] }
 0x1a0   : > { %v3198_v0 = vunpack.c.l.b16 %v3159_v61  ;;  %v3170_v55 = vrot.slane %v3131_v3, 5  ;;  %v3677_v9 = vrot.slane %v3128_v5, 9  ;;  %v3166_v10 = vrot.slane %v3129_v6, 5  ;;  %v3139_v61 = vld [vmem:[#allocation2 + $0x4c] sm:$0x1] }
 0x1a1   : > { %v2754_v1 = vpack.c.b16 %v2750_v60, %v2749_v63  ;;  %v3178_v33 = vrot.slane %v3135_v23, 5  ;;  %v3174_v38 = vrot.slane %v3133_v28, 5  ;;  %v3138_v60 = vld [vmem:[#allocation2 + $0x48] sm:$0xe] }
 0x1a2   : > { %v3206_v2 = vpack.c.b16 %v3199_v62, %v3198_v0  ;;  %v3171_v11 = vsel %vm4241_vm15, %v3678_v8, %v3170_v55  ;;  %v3167_v12 = vsel %vm4241_vm15, %v3677_v9, %v3166_v10  ;;  %v1916_v62 = vld [vmem:[#allocation3 + $0x20] sm:$0xff]  ;;  %v3681_v0 = vrot.slane %v3136_v54, 9 }
 0x1a3   : > { %v3201_v14 = vunpack.c.l.b16 %v3171_v11  ;;  %v3200_v19 = vunpack.c.l.b16 %v3167_v12  ;;  %v3682_v3 = vrot.slane %v3138_v60, 9 }
 0x1a4   : > { %3647 = vmatmul.msk.bf16.gmra.mxu3 %vm421_vm5, %v2753_v22  ;;  %v3134_v22 = vld [vmem:[#allocation2 + $0x38] sm:$0xe] }
 0x1a5   : > { %3635 = vmatmul.msk.bf16.gmra.mxu2 %vm421_vm5, %v2608_v27  ;;  %v3207_v20 = vpack.c.b16 %v3201_v14, %v3200_v19  ;;  %v3132_v27 = vld [vmem:[#allocation2 + $0x30] sm:$0xe]  ;;  %v3680_v32 = vrot.slane %v3134_v22, 9 }
 0x1a6   : > { %v3679_v36 = vrot.slane %v3132_v27, 9 }
 0x1a7   : > { %v3179_v39 = vsel %vm4241_vm15, %v3680_v32, %v3178_v33 }
 0x1a8   : > { %v3175_v41 = vsel %vm4241_vm15, %v3679_v36, %v3174_v38  ;;  %v3203_v43 = vunpack.c.l.b16 %v3179_v39 }
 0x1a9   : > { %v3202_v50 = vunpack.c.l.b16 %v3175_v41 }
 0x1ab   : > { %v3208_v37 = vpack.c.b16 %v3203_v43, %v3202_v50 }
 0x1ac   : > { %3669 = vmatmul.msk.bf16.gmra.mxu0 %vm421_vm5, %v3665_v44 }
 0x1ad   : > { %3674 = vmatmul.msk.bf16.gmra.mxu1 %vm421_vm5, %v3063_v51  ;;  %v3137_v51 = vld [vmem:[#allocation2 + $0x44] sm:$0x1] }
 0x1ae   : > { %v3182_v45 = vrot.slane %v3137_v51, 5 }
 0x1b0   : > { %v3183_v8 = vsel %vm4241_vm15, %v3681_v0, %v3182_v45 }
 0x1b1   : > { %v3204_v11 = vunpack.c.l.b16 %v3183_v8 }
 0x1b4   : > { %3648 = vmatmul.msk.bf16.gmra.mxu3 %vm421_vm5, %v2754_v1 }
 0x1b5   : > { %3684 = vmatmul.msk.bf16.vlgmr.msra.gmra.mxu2 %vm421_vm5, %v3206_v2 }
 0x1b8   : > { %v1966_v59 = vpop.f32.mrf.mxu2 }
 0x1b9   : > { %v2325_v7 = vpop.f32.mrf.mxu0  ;;  %v1986_v31 = vadd.f32 %v1966_v59, %v1912_v4  ;;  %v3186_v4 = vrot.slane %v3139_v61, 5 }
 0x1ba   : > { %v4468_v13 = vpop.f32.mrf.mxu1 }
 0x1bb   : > { %1994 = vst.msk [vmem:[#allocation3] sm:$0xff] %vm421_vm5, %v1986_v31  ;;  %v3187_v55 = vsel %vm4241_vm15, %v3682_v3, %v3186_v4 }
 0x1bc   : > { %v3205_v12 = vunpack.c.l.b16 %v3187_v55 }
 0x1c0   : > { %v1968_v17 = vpop.f32.mrf.mxu2 }
 0x1c1   : > { %v2327_v25 = vpop.f32.mrf.mxu0  ;;  %v1987_v18 = vadd.f32 %v1968_v17, %v1913_v16 }
 0x1c2   : > { %v2130_v57 = vld [vmem:[#allocation3] sm:$0xff]  ;;  %v4472_v34 = vpop.f32.mrf.mxu1 }
 0x1c3   : > { %1995 = vst.msk [vmem:[#allocation3 + $0x8] sm:$0xff] %vm421_vm5, %v1987_v18 }
 0x1c5   : > { %3685 = vmatmul.msk.bf16.gmra.mxu2 %vm421_vm5, %v3207_v20  ;;  %v3209_v20 = vpack.c.b16 %v3205_v12, %v3204_v11 }
 0x1c7   : > { %v2176_v26 = vpop.f32.mrf.mxu3 }
 0x1c8   : > { %v2196_v29 = vadd.f32 %v2176_v26, %v2130_v57  ;;  %v1971_v15 = vpop.f32.mrf.mxu2 }
 0x1c9   : > { %v2330_v30 = vpop.f32.mrf.mxu0  ;;  %v1988_v35 = vadd.f32 %v1971_v15, %v1914_v24  ;;  %v1918_v24 = vld [vmem:[#allocation3 + $0x30] sm:$0xff] }
 0x1ca   : > { %2204 = vst.msk [vmem:[#allocation3] sm:$0xff] %vm421_vm5, %v2196_v29  ;;  %v2131_v40 = vld [vmem:[#allocation3 + $0x8] sm:$0xff]  ;;  %v4481_v53 = vpop.f32.mrf.mxu1 }
 0x1cb   : > { %1996 = vst.msk [vmem:[#allocation3 + $0x10] sm:$0xff] %vm421_vm5, %v1988_v35 }
 0x1cf   : > { %v2178_v42 = vpop.f32.mrf.mxu3 }
 0x1d0   : > { %v2197_v44 = vadd.f32 %v2178_v42, %v2131_v40  ;;  %v1973_v47 = vpop.f32.mrf.mxu2  ;;  %v1919_v40 = vld [vmem:[#allocation3 + $0x38] sm:$0xff] }
 0x1d1   : > { %v2279_v48 = vld [vmem:[#allocation3] sm:$0xff]  ;;  %v2332_v52 = vpop.f32.mrf.mxu0  ;;  %v1989_v49 = vadd.f32 %v1973_v47, %v1915_v46 }
 0x1d2   : > { %v2345_v56 = vadd.f32 %v2325_v7, %v2279_v48  ;;  %2205 = vst.msk [vmem:[#allocation3 + $0x8] sm:$0xff] %vm421_vm5, %v2197_v44  ;;  %v2132_v58 = vld [vmem:[#allocation3 + $0x10] sm:$0xff]  ;;  %v4493_v31 = vpop.f32.mrf.mxu1 }
 0x1d3   : > { %1997 = vst.msk [vmem:[#allocation3 + $0x18] sm:$0xff] %vm421_vm5, %v1989_v49 }
 0x1d4   : > { %2353 = vst.msk [vmem:[#allocation3] sm:$0xff] %vm421_vm5, %v2345_v56 }
 0x1d5   : > { %3686 = vmatmul.msk.bf16.gmra.mxu2 %vm421_vm5, %v3208_v37 }
 0x1d7   : > { %v2181_v63 = vpop.f32.mrf.mxu3 }
 0x1d8   : > { %v2198_v1 = vadd.f32 %v2181_v63, %v2132_v58  ;;  %v1976_v2 = vpop.f32.mrf.mxu2 }
 0x1d9   : > { %v2280_v5 = vld [vmem:[#allocation3 + $0x8] sm:$0xff]  ;;  %v1990_v6 = vadd.f32 %v1976_v2, %v1916_v62  ;;  %v2335_v59 = vpop.f32.mrf.mxu0 }
 0x1da   : > { %v2346_v7 = vadd.f32 %v2327_v25, %v2280_v5  ;;  %2206 = vst.msk [vmem:[#allocation3 + $0x10] sm:$0xff] %vm421_vm5, %v2198_v1  ;;  %v2133_v9 = vld [vmem:[#allocation3 + $0x18] sm:$0xff]  ;;  %v1917_v25 = vld [vmem:[#allocation3 + $0x28] sm:$0xff]  ;;  %v2433_v26 = vpop.f32.mrf.mxu1 }
 0x1db   : > { %1998 = vst.msk [vmem:[#allocation3 + $0x20] sm:$0xff] %vm421_vm5, %v1990_v6  ;;  %v2369_v21 = vld [vmem:[#allocation3] sm:$0xff] }
 0x1dc   : > { %2354 = vst.msk [vmem:[#allocation3 + $0x8] sm:$0xff] %vm421_vm5, %v2346_v7  ;;  %v2443_v23 = vadd.f32 %v4468_v13, %v2369_v21 }
 0x1de   : > { %2451 = vst.msk [vmem:[#allocation3] sm:$0xff] %vm421_vm5, %v2443_v23 }
 0x1df   : > { %v2183_v10 = vpop.f32.mrf.mxu3 }
 0x1e0   : > { %v2199_v14 = vadd.f32 %v2183_v10, %v2133_v9  ;;  %v1978_v16 = vpop.f32.mrf.mxu2 }
 0x1e1   : > { %v2281_v17 = vld [vmem:[#allocation3 + $0x10] sm:$0xff]  ;;  %v1991_v18 = vadd.f32 %v1978_v16, %v1917_v25  ;;  %v2337_v57 = vpop.f32.mrf.mxu0 }
 0x1e2   : > { %v2347_v19 = vadd.f32 %v2330_v30, %v2281_v17  ;;  %2207 = vst.msk [vmem:[#allocation3 + $0x18] sm:$0xff] %vm421_vm5, %v2199_v14  ;;  %v2134_v22 = vld [vmem:[#allocation3 + $0x20] sm:$0xff]  ;;  %v2435_v42 = vpop.f32.mrf.mxu1 }
 0x1e3   : > { %1999 = vst.msk [vmem:[#allocation3 + $0x28] sm:$0xff] %vm421_vm5, %v1991_v18  ;;  %v2370_v33 = vld [vmem:[#allocation3 + $0x8] sm:$0xff] }
 0x1e4   : > { %2355 = vst.msk [vmem:[#allocation3 + $0x10] sm:$0xff] %vm421_vm5, %v2347_v19  ;;  %v2444_v13 = vadd.f32 %v4472_v34, %v2370_v33 }
 0x1e5   : > { %3687 = vmatmul.msk.bf16.gmra.mxu2 %vm421_vm5, %v3209_v20  ;;  %v2587_v50 = vld [vmem:[#allocation3] sm:$0xff] }
 0x1e6   : > { %2452 = vst.msk [vmem:[#allocation3 + $0x8] sm:$0xff] %vm421_vm5, %v2444_v13 }
 0x1e7   : > { %v2186_v27 = vpop.f32.mrf.mxu3 }
 0x1e8   : > { %v2200_v28 = vadd.f32 %v2186_v27, %v2134_v22  ;;  %v1981_v29 = vpop.f32.mrf.mxu2 }
 0x1e9   : > { %v2282_v30 = vld [vmem:[#allocation3 + $0x18] sm:$0xff]  ;;  %v1992_v15 = vadd.f32 %v1981_v29, %v1918_v24  ;;  %v2340_v36 = vpop.f32.mrf.mxu0 }
 0x1ea   : > { %v2348_v32 = vadd.f32 %v2332_v52, %v2282_v30  ;;  %2208 = vst.msk [vmem:[#allocation3 + $0x20] sm:$0xff] %vm421_vm5, %v2200_v28  ;;  %v2135_v35 = vld [vmem:[#allocation3 + $0x28] sm:$0xff]  ;;  %v2438_v60 = vpop.f32.mrf.mxu1 }
 0x1eb   : > { %2000 = vst.msk [vmem:[#allocation3 + $0x30] sm:$0xff] %vm421_vm5, %v1992_v15  ;;  %v2371_v47 = vld [vmem:[#allocation3 + $0x10] sm:$0xff] }
 0x1ec   : > { %2356 = vst.msk [vmem:[#allocation3 + $0x18] sm:$0xff] %vm421_vm5, %v2348_v32  ;;  %v2445_v34 = vadd.f32 %v4481_v53, %v2371_v47 }
 0x1ed   : > { %v2588_v1 = vld [vmem:[#allocation3 + $0x8] sm:$0xff] }
 0x1ee   : > { %2453 = vst.msk [vmem:[#allocation3 + $0x10] sm:$0xff] %vm421_vm5, %v2445_v34 }
 0x1ef   : > { %v2188_v38 = vpop.f32.mrf.mxu3 }
 0x1f0   : > { %v2201_v39 = vadd.f32 %v2188_v38, %v2135_v35  ;;  %v1983_v41 = vpop.f32.mrf.mxu2 }
 0x1f1   : > { %v2283_v43 = vld [vmem:[#allocation3 + $0x20] sm:$0xff]  ;;  %v1993_v44 = vadd.f32 %v1983_v41, %v1919_v40  ;;  %v2342_v54 = vpop.f32.mrf.mxu0 }
 0x1f2   : > { %v2349_v46 = vadd.f32 %v2335_v59, %v2283_v43  ;;  %2209 = vst.msk [vmem:[#allocation3 + $0x28] sm:$0xff] %vm421_vm5, %v2201_v39  ;;  %v2136_v48 = vld [vmem:[#allocation3 + $0x30] sm:$0xff]  ;;  %v2440_v7 = vpop.f32.mrf.mxu1 }
 0x1f3   : > { %2001 = vst.msk [vmem:[#allocation3 + $0x38] sm:$0xff] %vm421_vm5, %v1993_v44  ;;  %v2372_v61 = vld [vmem:[#allocation3 + $0x18] sm:$0xff] }
 0x1f4   : > { %2357 = vst.msk [vmem:[#allocation3 + $0x20] sm:$0xff] %vm421_vm5, %v2349_v46  ;;  %v2446_v53 = vadd.f32 %v4493_v31, %v2372_v61 }
 0x1f5   : > { %v2589_v9 = vld [vmem:[#allocation3 + $0x10] sm:$0xff] }
 0x1f6   : > { %2454 = vst.msk [vmem:[#allocation3 + $0x18] sm:$0xff] %vm421_vm5, %v2446_v53 }
 0x1f7   : > { %v2191_v52 = vpop.f32.mrf.mxu3 }
 0x1f8   : > { %v2202_v49 = vadd.f32 %v2191_v52, %v2136_v48  ;;  %v2633_v56 = vpop.f32.mrf.mxu2 }
 0x1f9   : > { %v2284_v37 = vld [vmem:[#allocation3 + $0x28] sm:$0xff]  ;;  %v2653_v51 = vadd.f32 %v2633_v56, %v2587_v50  ;;  %v2878_v5 = vpop.f32.mrf.mxu0 }
 0x1fa   : > { %v2350_v58 = vadd.f32 %v2337_v57, %v2284_v37  ;;  %2210 = vst.msk [vmem:[#allocation3 + $0x30] sm:$0xff] %vm421_vm5, %v2202_v49  ;;  %v2137_v62 = vld [vmem:[#allocation3 + $0x38] sm:$0xff]  ;;  %v3088_v19 = vpop.f32.mrf.mxu1 }
 0x1fb   : > { %2661 = vst.msk [vmem:[#allocation3] sm:$0xff] %vm421_vm5, %v2653_v51  ;;  %v2373_v6 = vld [vmem:[#allocation3 + $0x20] sm:$0xff] }
 0x1fc   : > { %2358 = vst.msk [vmem:[#allocation3 + $0x28] sm:$0xff] %vm421_vm5, %v2350_v58  ;;  %v2447_v8 = vadd.f32 %v2433_v26, %v2373_v6 }
 0x1fd   : > { %v2590_v57 = vld [vmem:[#allocation3 + $0x18] sm:$0xff] }
 0x1fe   : > { %2455 = vst.msk [vmem:[#allocation3 + $0x20] sm:$0xff] %vm421_vm5, %v2447_v8 }
 0x1ff   : > { %v2193_v63 = vpop.f32.mrf.mxu3 }
 0x200   : > { %v2203_v0 = vadd.f32 %v2193_v63, %v2137_v62  ;;  %v2635_v2 = vpop.f32.mrf.mxu2 }
 0x201   : > { %v2285_v45 = vld [vmem:[#allocation3 + $0x30] sm:$0xff]  ;;  %v2654_v3 = vadd.f32 %v2635_v2, %v2588_v1  ;;  %v2880_v16 = vpop.f32.mrf.mxu0 }
 0x202   : > { %v2351_v4 = vadd.f32 %v2340_v36, %v2285_v45  ;;  %2211 = vst.msk [vmem:[#allocation3 + $0x38] sm:$0xff] %vm421_vm5, %v2203_v0  ;;  %v2733_v59 = vld [vmem:[#allocation3] sm:$0xff]  ;;  %v3090_v13 = vpop.f32.mrf.mxu1 }
 0x203   : > { %2662 = vst.msk [vmem:[#allocation3 + $0x8] sm:$0xff] %vm421_vm5, %v2654_v3  ;;  %v2374_v25 = vld [vmem:[#allocation3 + $0x28] sm:$0xff] }
 0x204   : > { %2359 = vst.msk [vmem:[#allocation3 + $0x30] sm:$0xff] %vm421_vm5, %v2351_v4  ;;  %v2448_v18 = vadd.f32 %v2435_v42, %v2374_v25 }
 0x205   : > { %v2591_v33 = vld [vmem:[#allocation3 + $0x20] sm:$0xff] }
 0x206   : > { %2456 = vst.msk [vmem:[#allocation3 + $0x28] sm:$0xff] %vm421_vm5, %v2448_v18 }
 0x207   : > { %v2779_v55 = vpop.f32.mrf.mxu3 }
 0x208   : > { %v2799_v31 = vadd.f32 %v2779_v55, %v2733_v59  ;;  %v2638_v10 = vpop.f32.mrf.mxu2 }
 0x209   : > { %v2286_v11 = vld [vmem:[#allocation3 + $0x38] sm:$0xff]  ;;  %v2655_v12 = vadd.f32 %v2638_v10, %v2589_v9  ;;  %v2883_v30 = vpop.f32.mrf.mxu0 }
 0x20a   : > { %v2352_v14 = vadd.f32 %v2342_v54, %v2286_v11  ;;  %2807 = vst.msk [vmem:[#allocation3] sm:$0xff] %vm421_vm5, %v2799_v31  ;;  %v2734_v17 = vld [vmem:[#allocation3 + $0x8] sm:$0xff]  ;;  %v3093_v50 = vpop.f32.mrf.mxu1 }
 0x20b   : > { %2663 = vst.msk [vmem:[#allocation3 + $0x10] sm:$0xff] %vm421_vm5, %v2655_v12  ;;  %v2375_v27 = vld [vmem:[#allocation3 + $0x30] sm:$0xff] }
 0x20c   : > { %2360 = vst.msk [vmem:[#allocation3 + $0x38] sm:$0xff] %vm421_vm5, %v2352_v14  ;;  %v2449_v29 = vadd.f32 %v2438_v60, %v2375_v27 }
 0x20d   : > { %v2592_v46 = vld [vmem:[#allocation3 + $0x28] sm:$0xff] }
 0x20e   : > { %2457 = vst.msk [vmem:[#allocation3 + $0x30] sm:$0xff] %vm421_vm5, %v2449_v29 }
 0x20f   : > { %v2781_v20 = vpop.f32.mrf.mxu3 }
 0x210   : > { %v2800_v21 = vadd.f32 %v2781_v20, %v2734_v17  ;;  %v2640_v22 = vpop.f32.mrf.mxu2 }
 0x211   : > { %v2824_v23 = vld [vmem:[#allocation3] sm:$0xff]  ;;  %v2656_v24 = vadd.f32 %v2640_v22, %v2590_v57  ;;  %v2885_v48 = vpop.f32.mrf.mxu0 }
 0x212   : > { %v2898_v26 = vadd.f32 %v2878_v5, %v2824_v23  ;;  %2808 = vst.msk [vmem:[#allocation3 + $0x8] sm:$0xff] %vm421_vm5, %v2800_v21  ;;  %v2735_v28 = vld [vmem:[#allocation3 + $0x10] sm:$0xff]  ;;  %v3095_v2 = vpop.f32.mrf.mxu1 }
 0x213   : > { %2664 = vst.msk [vmem:[#allocation3 + $0x18] sm:$0xff] %vm421_vm5, %v2656_v24  ;;  %v2376_v40 = vld [vmem:[#allocation3 + $0x38] sm:$0xff] }
 0x214   : > { %2906 = vst.msk [vmem:[#allocation3] sm:$0xff] %vm421_vm5, %v2898_v26  ;;  %v2450_v42 = vadd.f32 %v2440_v7, %v2376_v40 }
 0x215   : > { %v2593_v60 = vld [vmem:[#allocation3 + $0x30] sm:$0xff] }
 0x216   : > { %2458 = vst.msk [vmem:[#allocation3 + $0x38] sm:$0xff] %vm421_vm5, %v2450_v42 }
 0x217   : > { %v2784_v15 = vpop.f32.mrf.mxu3 }
 0x218   : > { %v2801_v32 = vadd.f32 %v2784_v15, %v2735_v28  ;;  %v2643_v35 = vpop.f32.mrf.mxu2 }
 0x219   : > { %v2825_v36 = vld [vmem:[#allocation3 + $0x8] sm:$0xff]  ;;  %v2657_v38 = vadd.f32 %v2643_v35, %v2591_v33  ;;  %v2888_v0 = vpop.f32.mrf.mxu0 }
 0x21a   : > { %v2899_v39 = vadd.f32 %v2880_v16, %v2825_v36  ;;  %2809 = vst.msk [vmem:[#allocation3 + $0x10] sm:$0xff] %vm421_vm5, %v2801_v32  ;;  %v2736_v41 = vld [vmem:[#allocation3 + $0x18] sm:$0xff]  ;;  %v3098_v25 = vpop.f32.mrf.mxu1 }
 0x21b   : > { %2665 = vst.msk [vmem:[#allocation3 + $0x20] sm:$0xff] %vm421_vm5, %v2657_v38  ;;  %v3042_v56 = vld [vmem:[#allocation3] sm:$0xff] }
 0x21c   : > { %2907 = vst.msk [vmem:[#allocation3 + $0x8] sm:$0xff] %vm421_vm5, %v2899_v39  ;;  %v3108_v54 = vadd.f32 %v3088_v19, %v3042_v56 }
 0x21d   : > { %v2594_v59 = vld [vmem:[#allocation3 + $0x38] sm:$0xff] }
 0x21e   : > { %3116 = vst.msk [vmem:[#allocation3] sm:$0xff] %vm421_vm5, %v3108_v54 }
 0x21f   : > { %v2786_v43 = vpop.f32.mrf.mxu3 }
 0x220   : > { %v2802_v44 = vadd.f32 %v2786_v43, %v2736_v41  ;;  %v2645_v47 = vpop.f32.mrf.mxu2 }
 0x221   : > { %v2826_v34 = vld [vmem:[#allocation3 + $0x10] sm:$0xff]  ;;  %v2658_v52 = vadd.f32 %v2645_v47, %v2592_v46  ;;  %v2890_v10 = vpop.f32.mrf.mxu0 }
 0x222   : > { %v2900_v49 = vadd.f32 %v2883_v30, %v2826_v34  ;;  %2810 = vst.msk [vmem:[#allocation3 + $0x18] sm:$0xff] %vm421_vm5, %v2802_v44  ;;  %v2737_v37 = vld [vmem:[#allocation3 + $0x20] sm:$0xff]  ;;  %v3100_v15 = vpop.f32.mrf.mxu1 }
 0x223   : > { %2666 = vst.msk [vmem:[#allocation3 + $0x28] sm:$0xff] %vm421_vm5, %v2658_v52  ;;  %v3043_v1 = vld [vmem:[#allocation3 + $0x8] sm:$0xff] }
 0x224   : > { %2908 = vst.msk [vmem:[#allocation3 + $0x10] sm:$0xff] %vm421_vm5, %v2900_v49  ;;  %v3109_v3 = vadd.f32 %v3090_v13, %v3043_v1 }
 0x225   : > { %v3188_v18 = vld [vmem:[#allocation3] sm:$0xff] }
 0x226   : > { %3117 = vst.msk [vmem:[#allocation3 + $0x8] sm:$0xff] %vm421_vm5, %v3109_v3 }
 0x227   : > { %v2789_v51 = vpop.f32.mrf.mxu3 }
 0x228   : > { %v2803_v58 = vadd.f32 %v2789_v51, %v2737_v37  ;;  %v2648_v61 = vpop.f32.mrf.mxu2 }
 0x229   : > { %v2827_v62 = vld [vmem:[#allocation3 + $0x18] sm:$0xff]  ;;  %v2659_v53 = vadd.f32 %v2648_v61, %v2593_v60  ;;  %v2893_v26 = vpop.f32.mrf.mxu0 }
 0x22a   : > { %v2901_v63 = vadd.f32 %v2885_v48, %v2827_v62  ;;  %2811 = vst.msk [vmem:[#allocation3 + $0x20] sm:$0xff] %vm421_vm5, %v2803_v58  ;;  %v2738_v45 = vld [vmem:[#allocation3 + $0x28] sm:$0xff]  ;;  %v3103_v48 = vpop.f32.mrf.mxu1 }
 0x22b   : > { %2667 = vst.msk [vmem:[#allocation3 + $0x30] sm:$0xff] %vm421_vm5, %v2659_v53  ;;  %v3044_v4 = vld [vmem:[#allocation3 + $0x10] sm:$0xff] }
 0x22c   : > { %2909 = vst.msk [vmem:[#allocation3 + $0x18] sm:$0xff] %vm421_vm5, %v2901_v63  ;;  %v3110_v5 = vadd.f32 %v3093_v50, %v3044_v4 }
 0x22d   : > { %v3189_v29 = vld [vmem:[#allocation3 + $0x8] sm:$0xff] }
 0x22e   : > { %3118 = vst.msk [vmem:[#allocation3 + $0x10] sm:$0xff] %vm421_vm5, %v3110_v5 }
 0x22f   : > { %v2791_v6 = vpop.f32.mrf.mxu3 }
 0x230   : > { %v2804_v7 = vadd.f32 %v2791_v6, %v2738_v45  ;;  %v2650_v8 = vpop.f32.mrf.mxu2 }
 0x231   : > { %v2828_v55 = vld [vmem:[#allocation3 + $0x20] sm:$0xff]  ;;  %v2660_v31 = vadd.f32 %v2650_v8, %v2594_v59  ;;  %v2895_v42 = vpop.f32.mrf.mxu0 }
 0x232   : > { %v2902_v9 = vadd.f32 %v2888_v0, %v2828_v55  ;;  %2812 = vst.msk [vmem:[#allocation3 + $0x28] sm:$0xff] %vm421_vm5, %v2804_v7  ;;  %v2739_v11 = vld [vmem:[#allocation3 + $0x30] sm:$0xff]  ;;  %v3105_v58 = vpop.f32.mrf.mxu1 }
 0x233   : > { %2668 = vst.msk [vmem:[#allocation3 + $0x38] sm:$0xff] %vm421_vm5, %v2660_v31  ;;  %v3045_v12 = vld [vmem:[#allocation3 + $0x18] sm:$0xff] }
 0x234   : > { %2910 = vst.msk [vmem:[#allocation3 + $0x20] sm:$0xff] %vm421_vm5, %v2902_v9  ;;  %v3111_v14 = vadd.f32 %v3095_v2, %v3045_v12 }
 0x235   : > { %v3190_v40 = vld [vmem:[#allocation3 + $0x10] sm:$0xff] }
 0x236   : > { %3119 = vst.msk [vmem:[#allocation3 + $0x18] sm:$0xff] %vm421_vm5, %v3111_v14 }
 0x237   : > { %v2794_v16 = vpop.f32.mrf.mxu3 }
 0x238   : > { %v2805_v17 = vadd.f32 %v2794_v16, %v2739_v11  ;;  %v3234_v19 = vpop.f32.mrf.mxu2 }
 0x239   : > { %v2829_v20 = vld [vmem:[#allocation3 + $0x28] sm:$0xff]  ;;  %v3254_v21 = vadd.f32 %v3234_v19, %v3188_v18 }
 0x23a   : > { %v2903_v57 = vadd.f32 %v2890_v10, %v2829_v20  ;;  %2813 = vst.msk [vmem:[#allocation3 + $0x30] sm:$0xff] %vm421_vm5, %v2805_v17  ;;  %v2740_v22 = vld [vmem:[#allocation3 + $0x38] sm:$0xff] }
 0x23b   : > { %3262 = vst.msk [vmem:[#allocation3] sm:$0xff] %vm421_vm5, %v3254_v21  ;;  %v3046_v23 = vld [vmem:[#allocation3 + $0x20] sm:$0xff] }
 0x23c   : > { %2911 = vst.msk [vmem:[#allocation3 + $0x28] sm:$0xff] %vm421_vm5, %v2903_v57  ;;  %v3112_v24 = vadd.f32 %v3098_v25, %v3046_v23 }
 0x23d   : > { %v3191_v50 = vld [vmem:[#allocation3 + $0x18] sm:$0xff] }
 0x23e   : > { %3120 = vst.msk [vmem:[#allocation3 + $0x20] sm:$0xff] %vm421_vm5, %v3112_v24 }
 0x23f   : > { %v2796_v27 = vpop.f32.mrf.mxu3 }
 0x240   : > { %v2806_v28 = vadd.f32 %v2796_v27, %v2740_v22  ;;  %v3236_v30 = vpop.f32.mrf.mxu2 }
 0x241   : > { %v2830_v32 = vld [vmem:[#allocation3 + $0x30] sm:$0xff]  ;;  %v3255_v33 = vadd.f32 %v3236_v30, %v3189_v29 }
 0x242   : > { %v2904_v35 = vadd.f32 %v2893_v26, %v2830_v32  ;;  %v3270_v13 = vld [vmem:[#allocation3] sm:$0xff]  ;;  %2814 = vst.msk [vmem:[#allocation3 + $0x38] sm:$0xff] %vm421_vm5, %v2806_v28 }
 0x243   : > { %v3278_v36 = vmax.f32 %v3270_v13, 0.0  ;;  %3263 = vst.msk [vmem:[#allocation3 + $0x8] sm:$0xff] %vm421_vm5, %v3255_v33  ;;  %v3047_v38 = vld [vmem:[#allocation3 + $0x28] sm:$0xff] }
 0x244   : > { %2912 = vst.msk [vmem:[#allocation3 + $0x30] sm:$0xff] %vm421_vm5, %v2904_v35  ;;  %v3113_v39 = vadd.f32 %v3100_v15, %v3047_v38 }
 0x245   : > { %3286 = vst.msk [vmem:[%s4553_s21] sm:$0xff] %vm421_vm5, %v3278_v36  ;;  %v3192_v62 = vld [vmem:[#allocation3 + $0x20] sm:$0xff] }
 0x246   : > { %3121 = vst.msk [vmem:[#allocation3 + $0x28] sm:$0xff] %vm421_vm5, %v3113_v39 }
 0x248   : > { %v3239_v41 = vpop.f32.mrf.mxu2 }
 0x249   : > { %v2831_v43 = vld [vmem:[#allocation3 + $0x38] sm:$0xff]  ;;  %v3256_v44 = vadd.f32 %v3239_v41, %v3190_v40 }
 0x24a   : > { %v2905_v46 = vadd.f32 %v2895_v42, %v2831_v43  ;;  %v3271_v47 = vld [vmem:[#allocation3 + $0x8] sm:$0xff] }
 0x24b   : > { %v3279_v34 = vmax.f32 %v3271_v47, 0.0  ;;  %3264 = vst.msk [vmem:[#allocation3 + $0x10] sm:$0xff] %vm421_vm5, %v3256_v44  ;;  %v3048_v52 = vld [vmem:[#allocation3 + $0x30] sm:$0xff] }
 0x24c   : > { %2913 = vst.msk [vmem:[#allocation3 + $0x38] sm:$0xff] %vm421_vm5, %v2905_v46  ;;  %v3114_v49 = vadd.f32 %v3103_v48, %v3048_v52 }
 0x24d   : > { %3287 = vst.msk [vmem:[%s4553_s21 + $0x8] sm:$0xff] %vm421_vm5, %v3279_v34  ;;  %v3193_v2 = vld [vmem:[#allocation3 + $0x28] sm:$0xff] }
 0x24e   : > { %3122 = vst.msk [vmem:[#allocation3 + $0x30] sm:$0xff] %vm421_vm5, %v3114_v49 }
 0x250   : > { %v3241_v56 = vpop.f32.mrf.mxu2 }
 0x251   : > { %v3257_v37 = vadd.f32 %v3241_v56, %v3191_v50 }
 0x252   : > { %v3272_v54 = vld [vmem:[#allocation3 + $0x10] sm:$0xff] }
 0x253   : > { %v3280_v51 = vmax.f32 %v3272_v54, 0.0  ;;  %3265 = vst.msk [vmem:[#allocation3 + $0x18] sm:$0xff] %vm421_vm5, %v3257_v37  ;;  %v3049_v60 = vld [vmem:[#allocation3 + $0x38] sm:$0xff] }
 0x254   : > { %v3115_v61 = vadd.f32 %v3105_v58, %v3049_v60 }
 0x255   : > { %3288 = vst.msk [vmem:[%s4553_s21 + $0x10] sm:$0xff] %vm421_vm5, %v3280_v51  ;;  %v3194_v6 = vld [vmem:[#allocation3 + $0x30] sm:$0xff] }
 0x256   : > { %3123 = vst.msk [vmem:[#allocation3 + $0x38] sm:$0xff] %vm421_vm5, %v3115_v61 }
 0x258   : > { %v3244_v53 = vpop.f32.mrf.mxu2 }
 0x259   : > { %v3258_v63 = vadd.f32 %v3244_v53, %v3192_v62 }
 0x25a   : > { %v3273_v0 = vld [vmem:[#allocation3 + $0x18] sm:$0xff] }
 0x25b   : > { %v3281_v1 = vmax.f32 %v3273_v0, 0.0  ;;  %3266 = vst.msk [vmem:[#allocation3 + $0x20] sm:$0xff] %vm421_vm5, %v3258_v63 }
 0x25d   : > { %3289 = vst.msk [vmem:[%s4553_s21 + $0x18] sm:$0xff] %vm421_vm5, %v3281_v1  ;;  %v3195_v31 = vld [vmem:[#allocation3 + $0x38] sm:$0xff] }
 0x260   : > { %v3246_v45 = vpop.f32.mrf.mxu2 }
 0x261   : > { %v3259_v3 = vadd.f32 %v3246_v45, %v3193_v2 }
 0x262   : > { %v3274_v4 = vld [vmem:[#allocation3 + $0x20] sm:$0xff] }
 0x263   : > { %v3282_v5 = vmax.f32 %v3274_v4, 0.0  ;;  %3267 = vst.msk [vmem:[#allocation3 + $0x28] sm:$0xff] %vm421_vm5, %v3259_v3 }
 0x265   : > { %3290 = vst.msk [vmem:[%s4553_s21 + $0x20] sm:$0xff] %vm421_vm5, %v3282_v5 }
 0x268   : > { %v3249_v7 = vpop.f32.mrf.mxu2 }
 0x269   : > { %v3260_v59 = vadd.f32 %v3249_v7, %v3194_v6 }
 0x26a   : > { %v3275_v8 = vld [vmem:[#allocation3 + $0x28] sm:$0xff] }
 0x26b   : > { %v3283_v55 = vmax.f32 %v3275_v8, 0.0  ;;  %3268 = vst.msk [vmem:[#allocation3 + $0x30] sm:$0xff] %vm421_vm5, %v3260_v59 }
 0x26d   : > { %3291 = vst.msk [vmem:[%s4553_s21 + $0x28] sm:$0xff] %vm421_vm5, %v3283_v55 }
 0x270   : > { %v3251_v9 = vpop.f32.mrf.mxu2 }
 0x271   : > { %v3261_v10 = vadd.f32 %v3251_v9, %v3195_v31 }
 0x272   : > { %v3276_v11 = vld [vmem:[#allocation3 + $0x30] sm:$0xff] }
 0x273   : > { %v3284_v12 = vmax.f32 %v3276_v11, 0.0  ;;  %3269 = vst.msk [vmem:[#allocation3 + $0x38] sm:$0xff] %vm421_vm5, %v3261_v10 }
 0x275   : > { %3292 = vst.msk [vmem:[%s4553_s21 + $0x30] sm:$0xff] %vm421_vm5, %v3284_v12 }
 0x27a   : > { %v3277_v14 = vld [vmem:[#allocation3 + $0x38] sm:$0xff] }
 0x27b   : > { %v3285_v25 = vmax.f32 %v3277_v14, 0.0 }
 0x27d   : > { %3293 = vst.msk [vmem:[%s4553_s21 + $0x38] sm:$0xff] %vm421_vm5, %v3285_v25 }
 0x27e PF: > { %s20_s13 = sadd.s32 1, %s3750_s13  }
 0x27f   : > { %p17_p4 = scmp.ge.s32.totalorder %s20_s13, 4  }
 0x281   :  { %19 = sbr.rel (!%p17_p4) target bundleno = 1 (0x1), region = 119 }

</bundles_post_ra>
